<compile_context>
chip_gen: v7x
topology: tpu7x:2x2x1
jax: 0.10.0
libtpu: 0.0.40
codegen_flags: <defaults>
</compile_context>

<pallas_src>
import jax
import jax.numpy as jnp
import numpy as np
from jax import lax
from jax.experimental import pallas as pl
from jax.experimental.pallas import tpu as pltpu

KSIZE = 7
PAD = KSIZE // 2


def _tree_sum(terms):
    """Balanced-tree sum of a list of arrays (exposes ILP across VALU slots)."""
    terms = list(terms)
    while len(terms) > 1:
        nxt = [terms[i] + terms[i + 1] for i in range(0, len(terms) - 1, 2)]
        if len(terms) % 2:
            nxt.append(terms[-1])
        terms = nxt
    return terms[0]


def _make_kernel(H, W, HWp):
    def kernel(x_ref, w_ref, row_ref, col_ref, o_ref):
        # x_ref  : (Nb, C, HWp)   lane-dense input block                (VMEM)
        # w_ref  : (2*7*7,) f32   conv weights, flattened OIHW [avg,max] (SMEM)
        # row_ref: (1, HWp) i32   flat index -> row id                   (VMEM)
        # col_ref: (1, HWp) i32   flat index -> col id                   (VMEM)
        # o_ref  : (Nb, C, HWp)   lane-dense output block                (VMEM)
        Nb = x_ref.shape[0]

        # ---- channel reductions (f32 accumulation), lane-dense --------------
        # The f32 cast is a transient consumed here; it is NOT kept live for the
        # final gating store (which re-reads x_ref in its own dtype).
        xf = x_ref[...].astype(jnp.float32)            # (Nb, C, HWp)
        avg = jnp.mean(xf, axis=1)                     # (Nb, HWp)
        mx = jnp.max(xf, axis=1)                       # (Nb, HWp)

        # ---- replicate-edge masks (hoisted, broadcast once) ------------------
        row = row_ref[...]                             # (1, HWp) i32
        col = col_ref[...]
        last_row = jnp.broadcast_to(row == (H - 1), (Nb, HWp))
        first_row = jnp.broadcast_to(row == 0, (Nb, HWp))
        last_col = jnp.broadcast_to(col == (W - 1), (Nb, HWp))
        first_col = jnp.broadcast_to(col == 0, (Nb, HWp))

        def shift_left(v, amt):    # out[k] = v[k + amt]   (XLU lane rotate)
            s = (HWp - amt) % HWp
            return v if s == 0 else pltpu.roll(v, s, axis=1)

        def shift_right(v, amt):   # out[k] = v[k - amt]
            s = amt % HWp
            return v if s == 0 else pltpu.roll(v, s, axis=1)

        def col_pass(v, base):
            # sum_dx w[base + PAD + dx] * v[:, clamp(col + dx)]  on the flat HW axis.
            terms = [w_ref[base + PAD] * v]
            rgt = v
            for k in range(1, PAD + 1):                # dx = +k  (clamp at col W-1)
                rgt = jnp.where(last_col, rgt, shift_left(rgt, 1))
                terms.append(w_ref[base + PAD + k] * rgt)
            lft = v
            for k in range(1, PAD + 1):                # dx = -k  (clamp at col 0)
                lft = jnp.where(first_col, lft, shift_right(lft, 1))
                terms.append(w_ref[base + PAD - k] * lft)
            return _tree_sum(terms)

        def conv_map(m, cbase):
            # 7x7 replicate-padded cross-correlation of one flat (Nb, HWp) map.
            parts = [col_pass(m, cbase + PAD * KSIZE)]          # dy = 0
            dn = m
            for k in range(1, PAD + 1):                          # dy = +k (clamp H-1)
                dn = jnp.where(last_row, dn, shift_left(dn, W))
                parts.append(col_pass(dn, cbase + (PAD + k) * KSIZE))
            up = m
            for k in range(1, PAD + 1):                          # dy = -k (clamp 0)
                up = jnp.where(first_row, up, shift_right(up, W))
                parts.append(col_pass(up, cbase + (PAD - k) * KSIZE))
            return _tree_sum(parts)

        # Weight layout (OIHW flattened): channel 0 = avg map, channel 1 = max map.
        acc = conv_map(avg, 0) + conv_map(mx, KSIZE * KSIZE)     # (Nb, HWp) f32

        # ---- sigmoid gate, multiply in the output dtype (packed bf16 if bf16) --
        gate = jax.nn.sigmoid(acc)[:, None, :].astype(o_ref.dtype)   # (Nb, 1, HWp)
        o_ref[...] = gate * x_ref[...]

    return kernel


def _vmem_capacity_bytes():
    try:
        cap = getattr(pltpu.get_tpu_info(), "vmem_capacity_bytes", None)
        if cap:
            return int(cap)
    except Exception:
        pass
    return 64 << 20   # conservative fallback (v7x per-core capacity)


def _choose_block_batch(N, C, HWp, itemsize, vmem_bytes):
    """Images per grid step: multi-MiB blocks sized from device VMEM capacity."""
    per_image_io = C * HWp * itemsize
    budget = min(vmem_bytes // 4, 16 << 20)
    # double-buffered in + out (4x) + transient f32 reduce copy + conv working set
    per_image_tot = 4 * per_image_io + C * HWp * 4 + 8 * HWp * 4
    nb = max(1, budget // per_image_tot)
    return int(min(nb, N))


@jax.jit
def spatial_attention_pallas(x, conv_w):
    """x: (N, C, H, W); conv_w: (1, 2, 7, 7) as in nn.Conv2d(2, 1, 7, bias=False)."""
    N, C, H, W = x.shape
    HW = H * W
    HWp = ((HW + 127) // 128) * 128                    # lane-dense streamed last dim
    x3 = x.reshape(N, C, HW)
    if HWp != HW:
        x3 = jnp.pad(x3, ((0, 0), (0, 0), (0, HWp - HW)))
    w_flat = conv_w.reshape(-1).astype(jnp.float32)    # (2*7*7,), OIHW flatten

    flat = np.arange(HWp, dtype=np.int64)
    row_ids = jnp.asarray((flat // W).astype(np.int32).reshape(1, HWp))
    col_ids = jnp.asarray((flat % W).astype(np.int32).reshape(1, HWp))

    vmem = _vmem_capacity_bytes()
    Nb = _choose_block_batch(N, C, HWp, x.dtype.itemsize, vmem)
    grid = (pl.cdiv(N, Nb),)
    vmem_limit = int(min(max(vmem // 2, 32 << 20), 64 << 20))

    out3 = pl.pallas_call(
        _make_kernel(H, W, HWp),
        out_shape=jax.ShapeDtypeStruct((N, C, HWp), x.dtype),
        grid=grid,
        in_specs=[
            pl.BlockSpec((Nb, C, HWp), lambda n: (n, 0, 0)),               # x
            pl.BlockSpec(memory_space=pltpu.MemorySpace.SMEM),             # weights
            pl.BlockSpec((1, HWp), lambda n: (0, 0)),                      # row ids
            pl.BlockSpec((1, HWp), lambda n: (0, 0)),                      # col ids
        ],
        out_specs=pl.BlockSpec((Nb, C, HWp), lambda n: (n, 0, 0)),
        compiler_params=pltpu.CompilerParams(
            dimension_semantics=("parallel",),
            vmem_limit_bytes=vmem_limit,
        ),
    )(x3, w_flat, row_ids, col_ids)

    if HWp != HW:
        out3 = out3[..., :HW]
    return out3.reshape(N, C, H, W)


def _reference(x, conv_w):
    # Pure-JAX reference mirroring the PyTorch module exactly.
    x_avg = jnp.mean(x, axis=1, keepdims=True)
    x_max = jnp.max(x, axis=1, keepdims=True)
    wts = jnp.concatenate([x_avg, x_max], axis=1)                       # (N,2,H,W)
    wts_pad = jnp.pad(wts, ((0, 0), (0, 0), (PAD, PAD), (PAD, PAD)), mode="edge")
    conv = lax.conv_general_dilated(
        wts_pad, conv_w, window_strides=(1, 1), padding="VALID",
        dimension_numbers=("NCHW", "OIHW", "NCHW"))                     # (N,1,H,W)
    return jax.nn.sigmoid(conv) * x


if __name__ == "__main__":
    key = jax.random.PRNGKey(0)
    key_x, key_w = jax.random.split(key)

    N, C, H, W = 2, 4, 16, 16
    x = jax.random.normal(key_x, (N, C, H, W), dtype=jnp.float32)

    # Deterministic weight init mimicking PyTorch Conv2d default (kaiming uniform):
    fan_in = 2 * KSIZE * KSIZE
    bound = 1.0 / np.sqrt(fan_in)
    conv_w = jax.random.uniform(key_w, (1, 2, KSIZE, KSIZE),
                                minval=-bound, maxval=bound, dtype=jnp.float32)

    out = jax.block_until_ready(spatial_attention_pallas(x, conv_w))
    ref = jax.block_until_ready(_reference(x, conv_w))
    np.testing.assert_allclose(np.asarray(out), np.asarray(ref), rtol=1e-5, atol=1e-5)

    print("KERNEL_OK")
</pallas_src>

<mosaic_0001>
module attributes {stable_mosaic.version = 11 : i64} {
  func.func @kernel(%arg0: i32, %arg1: memref<2x4x256xf32, #tpu.memory_space<vmem>>, %arg2: memref<98xf32, #tpu.memory_space<smem>>, %arg3: memref<1x256xi32, #tpu.memory_space<vmem>>, %arg4: memref<1x256xi32, #tpu.memory_space<vmem>>, %arg5: memref<2x4x256xf32, #tpu.memory_space<vmem>>) attributes {dimension_semantics = [#tpu.dimension_semantics<parallel>], iteration_bounds = array<i64: 1>, scalar_prefetch = 0 : i64, scratch_operands = 0 : i64, tpu.core_type = #tpu.core_type<tc>, window_params = [{transform_indices = @transform_0, window_bounds = array<i64: 2, 4, 256>}, {transform_indices = @transform_1, window_bounds = array<i64: 98>}, {pipeline_mode = #tpu.pipeline_mode<synchronous>, transform_indices = @transform_2, window_bounds = array<i64: 1, 256>}, {pipeline_mode = #tpu.pipeline_mode<synchronous>, transform_indices = @transform_3, window_bounds = array<i64: 1, 256>}, {transform_indices = @transform_4, window_bounds = array<i64: 2, 4, 256>}]} {
    %c0 = arith.constant 0 : index
    %c0_0 = arith.constant 0 : index
    %c0_1 = arith.constant 0 : index
    %0 = vector.load %arg1[%c0, %c0_0, %c0_1] : memref<2x4x256xf32, #tpu.memory_space<vmem>>, vector<2x4x256xf32>
    %cst = arith.constant dense<0.000000e+00> : vector<2x256xf32>
    %1 = vector.multi_reduction <add>, %0, %cst [1] : vector<2x4x256xf32> to vector<2x256xf32>
    %cst_2 = arith.constant 4.000000e+00 : f32
    %2 = vector.broadcast %cst_2 : f32 to vector<2x256xf32>
    %3 = arith.divf %1, %2 : vector<2x256xf32>
    %cst_3 = arith.constant dense<0xFF800000> : vector<2x256xf32>
    %4 = vector.multi_reduction <maximumf>, %0, %cst_3 [1] : vector<2x4x256xf32> to vector<2x256xf32>
    %c0_4 = arith.constant 0 : index
    %c0_5 = arith.constant 0 : index
    %5 = vector.load %arg3[%c0_4, %c0_5] : memref<1x256xi32, #tpu.memory_space<vmem>>, vector<1x256xi32>
    %c0_6 = arith.constant 0 : index
    %c0_7 = arith.constant 0 : index
    %6 = vector.load %arg4[%c0_6, %c0_7] : memref<1x256xi32, #tpu.memory_space<vmem>>, vector<1x256xi32>
    %c15_i32 = arith.constant 15 : i32
    %7 = vector.broadcast %c15_i32 : i32 to vector<1x256xi32>
    %8 = arith.cmpi eq, %5, %7 : vector<1x256xi32>
    %9 = vector.shape_cast %8 : vector<1x256xi1> to vector<1x256xi1>
    %10 = vector.broadcast %9 : vector<1x256xi1> to vector<2x256xi1>
    %c0_i32 = arith.constant 0 : i32
    %11 = vector.broadcast %c0_i32 : i32 to vector<1x256xi32>
    %12 = arith.cmpi eq, %5, %11 : vector<1x256xi32>
    %13 = vector.shape_cast %12 : vector<1x256xi1> to vector<1x256xi1>
    %14 = vector.broadcast %13 : vector<1x256xi1> to vector<2x256xi1>
    %c15_i32_8 = arith.constant 15 : i32
    %15 = vector.broadcast %c15_i32_8 : i32 to vector<1x256xi32>
    %16 = arith.cmpi eq, %6, %15 : vector<1x256xi32>
    %17 = vector.shape_cast %16 : vector<1x256xi1> to vector<1x256xi1>
    %18 = vector.broadcast %17 : vector<1x256xi1> to vector<2x256xi1>
    %c0_i32_9 = arith.constant 0 : i32
    %19 = vector.broadcast %c0_i32_9 : i32 to vector<1x256xi32>
    %20 = arith.cmpi eq, %6, %19 : vector<1x256xi32>
    %21 = vector.shape_cast %20 : vector<1x256xi1> to vector<1x256xi1>
    %22 = vector.broadcast %21 : vector<1x256xi1> to vector<2x256xi1>
    %c24 = arith.constant 24 : index
    %23 = memref.load %arg2[%c24] : memref<98xf32, #tpu.memory_space<smem>>
    %24 = vector.broadcast %23 : f32 to vector<2x256xf32>
    %25 = arith.mulf %24, %3 : vector<2x256xf32>
    %c255_i32 = arith.constant 255 : i32
    %26 = tpu.dynamic_rotate %3 by %c255_i32 dim 1 : vector<2x256xf32>, i32 -> vector<2x256xf32>
    %27 = arith.select %18, %3, %26 : vector<2x256xi1>, vector<2x256xf32>
    %c25 = arith.constant 25 : index
    %28 = memref.load %arg2[%c25] : memref<98xf32, #tpu.memory_space<smem>>
    %29 = vector.broadcast %28 : f32 to vector<2x256xf32>
    %30 = arith.mulf %29, %27 : vector<2x256xf32>
    %c255_i32_10 = arith.constant 255 : i32
    %31 = tpu.dynamic_rotate %27 by %c255_i32_10 dim 1 : vector<2x256xf32>, i32 -> vector<2x256xf32>
    %32 = arith.select %18, %27, %31 : vector<2x256xi1>, vector<2x256xf32>
    %c26 = arith.constant 26 : index
    %33 = memref.load %arg2[%c26] : memref<98xf32, #tpu.memory_space<smem>>
    %34 = vector.broadcast %33 : f32 to vector<2x256xf32>
    %35 = arith.mulf %34, %32 : vector<2x256xf32>
    %c255_i32_11 = arith.constant 255 : i32
    %36 = tpu.dynamic_rotate %32 by %c255_i32_11 dim 1 : vector<2x256xf32>, i32 -> vector<2x256xf32>
    %37 = arith.select %18, %32, %36 : vector<2x256xi1>, vector<2x256xf32>
    %c27 = arith.constant 27 : index
    %38 = memref.load %arg2[%c27] : memref<98xf32, #tpu.memory_space<smem>>
    %39 = vector.broadcast %38 : f32 to vector<2x256xf32>
    %40 = arith.mulf %39, %37 : vector<2x256xf32>
    %c1_i32 = arith.constant 1 : i32
    %41 = tpu.dynamic_rotate %3 by %c1_i32 dim 1 : vector<2x256xf32>, i32 -> vector<2x256xf32>
    %42 = arith.select %22, %3, %41 : vector<2x256xi1>, vector<2x256xf32>
    %c23 = arith.constant 23 : index
    %43 = memref.load %arg2[%c23] : memref<98xf32, #tpu.memory_space<smem>>
    %44 = vector.broadcast %43 : f32 to vector<2x256xf32>
    %45 = arith.mulf %44, %42 : vector<2x256xf32>
    %c1_i32_12 = arith.constant 1 : i32
    %46 = tpu.dynamic_rotate %42 by %c1_i32_12 dim 1 : vector<2x256xf32>, i32 -> vector<2x256xf32>
    %47 = arith.select %22, %42, %46 : vector<2x256xi1>, vector<2x256xf32>
    %c22 = arith.constant 22 : index
    %48 = memref.load %arg2[%c22] : memref<98xf32, #tpu.memory_space<smem>>
    %49 = vector.broadcast %48 : f32 to vector<2x256xf32>
    %50 = arith.mulf %49, %47 : vector<2x256xf32>
    %c1_i32_13 = arith.constant 1 : i32
    %51 = tpu.dynamic_rotate %47 by %c1_i32_13 dim 1 : vector<2x256xf32>, i32 -> vector<2x256xf32>
    %52 = arith.select %22, %47, %51 : vector<2x256xi1>, vector<2x256xf32>
    %c21 = arith.constant 21 : index
    %53 = memref.load %arg2[%c21] : memref<98xf32, #tpu.memory_space<smem>>
    %54 = vector.broadcast %53 : f32 to vector<2x256xf32>
    %55 = arith.mulf %54, %52 : vector<2x256xf32>
    %56 = arith.addf %25, %30 : vector<2x256xf32>
    %57 = arith.addf %35, %40 : vector<2x256xf32>
    %58 = arith.addf %45, %50 : vector<2x256xf32>
    %59 = arith.addf %56, %57 : vector<2x256xf32>
    %60 = arith.addf %58, %55 : vector<2x256xf32>
    %61 = arith.addf %59, %60 : vector<2x256xf32>
    %c240_i32 = arith.constant 240 : i32
    %62 = tpu.dynamic_rotate %3 by %c240_i32 dim 1 : vector<2x256xf32>, i32 -> vector<2x256xf32>
    %63 = arith.select %10, %3, %62 : vector<2x256xi1>, vector<2x256xf32>
    %c31 = arith.constant 31 : index
    %64 = memref.load %arg2[%c31] : memref<98xf32, #tpu.memory_space<smem>>
    %65 = vector.broadcast %64 : f32 to vector<2x256xf32>
    %66 = arith.mulf %65, %63 : vector<2x256xf32>
    %c255_i32_14 = arith.constant 255 : i32
    %67 = tpu.dynamic_rotate %63 by %c255_i32_14 dim 1 : vector<2x256xf32>, i32 -> vector<2x256xf32>
    %68 = arith.select %18, %63, %67 : vector<2x256xi1>, vector<2x256xf32>
    %c32 = arith.constant 32 : index
    %69 = memref.load %arg2[%c32] : memref<98xf32, #tpu.memory_space<smem>>
    %70 = vector.broadcast %69 : f32 to vector<2x256xf32>
    %71 = arith.mulf %70, %68 : vector<2x256xf32>
    %c255_i32_15 = arith.constant 255 : i32
    %72 = tpu.dynamic_rotate %68 by %c255_i32_15 dim 1 : vector<2x256xf32>, i32 -> vector<2x256xf32>
    %73 = arith.select %18, %68, %72 : vector<2x256xi1>, vector<2x256xf32>
    %c33 = arith.constant 33 : index
    %74 = memref.load %arg2[%c33] : memref<98xf32, #tpu.memory_space<smem>>
    %75 = vector.broadcast %74 : f32 to vector<2x256xf32>
    %76 = arith.mulf %75, %73 : vector<2x256xf32>
    %c255_i32_16 = arith.constant 255 : i32
    %77 = tpu.dynamic_rotate %73 by %c255_i32_16 dim 1 : vector<2x256xf32>, i32 -> vector<2x256xf32>
    %78 = arith.select %18, %73, %77 : vector<2x256xi1>, vector<2x256xf32>
    %c34 = arith.constant 34 : index
    %79 = memref.load %arg2[%c34] : memref<98xf32, #tpu.memory_space<smem>>
    %80 = vector.broadcast %79 : f32 to vector<2x256xf32>
    %81 = arith.mulf %80, %78 : vector<2x256xf32>
    %c1_i32_17 = arith.constant 1 : i32
    %82 = tpu.dynamic_rotate %63 by %c1_i32_17 dim 1 : vector<2x256xf32>, i32 -> vector<2x256xf32>
    %83 = arith.select %22, %63, %82 : vector<2x256xi1>, vector<2x256xf32>
    %c30 = arith.constant 30 : index
    %84 = memref.load %arg2[%c30] : memref<98xf32, #tpu.memory_space<smem>>
    %85 = vector.broadcast %84 : f32 to vector<2x256xf32>
    %86 = arith.mulf %85, %83 : vector<2x256xf32>
    %c1_i32_18 = arith.constant 1 : i32
    %87 = tpu.dynamic_rotate %83 by %c1_i32_18 dim 1 : vector<2x256xf32>, i32 -> vector<2x256xf32>
    %88 = arith.select %22, %83, %87 : vector<2x256xi1>, vector<2x256xf32>
    %c29 = arith.constant 29 : index
    %89 = memref.load %arg2[%c29] : memref<98xf32, #tpu.memory_space<smem>>
    %90 = vector.broadcast %89 : f32 to vector<2x256xf32>
    %91 = arith.mulf %90, %88 : vector<2x256xf32>
    %c1_i32_19 = arith.constant 1 : i32
    %92 = tpu.dynamic_rotate %88 by %c1_i32_19 dim 1 : vector<2x256xf32>, i32 -> vector<2x256xf32>
    %93 = arith.select %22, %88, %92 : vector<2x256xi1>, vector<2x256xf32>
    %c28 = arith.constant 28 : index
    %94 = memref.load %arg2[%c28] : memref<98xf32, #tpu.memory_space<smem>>
    %95 = vector.broadcast %94 : f32 to vector<2x256xf32>
    %96 = arith.mulf %95, %93 : vector<2x256xf32>
    %97 = arith.addf %66, %71 : vector<2x256xf32>
    %98 = arith.addf %76, %81 : vector<2x256xf32>
    %99 = arith.addf %86, %91 : vector<2x256xf32>
    %100 = arith.addf %97, %98 : vector<2x256xf32>
    %101 = arith.addf %99, %96 : vector<2x256xf32>
    %102 = arith.addf %100, %101 : vector<2x256xf32>
    %c240_i32_20 = arith.constant 240 : i32
    %103 = tpu.dynamic_rotate %63 by %c240_i32_20 dim 1 : vector<2x256xf32>, i32 -> vector<2x256xf32>
    %104 = arith.select %10, %63, %103 : vector<2x256xi1>, vector<2x256xf32>
    %c38 = arith.constant 38 : index
    %105 = memref.load %arg2[%c38] : memref<98xf32, #tpu.memory_space<smem>>
    %106 = vector.broadcast %105 : f32 to vector<2x256xf32>
    %107 = arith.mulf %106, %104 : vector<2x256xf32>
    %c255_i32_21 = arith.constant 255 : i32
    %108 = tpu.dynamic_rotate %104 by %c255_i32_21 dim 1 : vector<2x256xf32>, i32 -> vector<2x256xf32>
    %109 = arith.select %18, %104, %108 : vector<2x256xi1>, vector<2x256xf32>
    %c39 = arith.constant 39 : index
    %110 = memref.load %arg2[%c39] : memref<98xf32, #tpu.memory_space<smem>>
    %111 = vector.broadcast %110 : f32 to vector<2x256xf32>
    %112 = arith.mulf %111, %109 : vector<2x256xf32>
    %c255_i32_22 = arith.constant 255 : i32
    %113 = tpu.dynamic_rotate %109 by %c255_i32_22 dim 1 : vector<2x256xf32>, i32 -> vector<2x256xf32>
    %114 = arith.select %18, %109, %113 : vector<2x256xi1>, vector<2x256xf32>
    %c40 = arith.constant 40 : index
    %115 = memref.load %arg2[%c40] : memref<98xf32, #tpu.memory_space<smem>>
    %116 = vector.broadcast %115 : f32 to vector<2x256xf32>
    %117 = arith.mulf %116, %114 : vector<2x256xf32>
    %c255_i32_23 = arith.constant 255 : i32
    %118 = tpu.dynamic_rotate %114 by %c255_i32_23 dim 1 : vector<2x256xf32>, i32 -> vector<2x256xf32>
    %119 = arith.select %18, %114, %118 : vector<2x256xi1>, vector<2x256xf32>
    %c41 = arith.constant 41 : index
    %120 = memref.load %arg2[%c41] : memref<98xf32, #tpu.memory_space<smem>>
    %121 = vector.broadcast %120 : f32 to vector<2x256xf32>
    %122 = arith.mulf %121, %119 : vector<2x256xf32>
    %c1_i32_24 = arith.constant 1 : i32
    %123 = tpu.dynamic_rotate %104 by %c1_i32_24 dim 1 : vector<2x256xf32>, i32 -> vector<2x256xf32>
    %124 = arith.select %22, %104, %123 : vector<2x256xi1>, vector<2x256xf32>
    %c37 = arith.constant 37 : index
    %125 = memref.load %arg2[%c37] : memref<98xf32, #tpu.memory_space<smem>>
    %126 = vector.broadcast %125 : f32 to vector<2x256xf32>
    %127 = arith.mulf %126, %124 : vector<2x256xf32>
    %c1_i32_25 = arith.constant 1 : i32
    %128 = tpu.dynamic_rotate %124 by %c1_i32_25 dim 1 : vector<2x256xf32>, i32 -> vector<2x256xf32>
    %129 = arith.select %22, %124, %128 : vector<2x256xi1>, vector<2x256xf32>
    %c36 = arith.constant 36 : index
    %130 = memref.load %arg2[%c36] : memref<98xf32, #tpu.memory_space<smem>>
    %131 = vector.broadcast %130 : f32 to vector<2x256xf32>
    %132 = arith.mulf %131, %129 : vector<2x256xf32>
    %c1_i32_26 = arith.constant 1 : i32
    %133 = tpu.dynamic_rotate %129 by %c1_i32_26 dim 1 : vector<2x256xf32>, i32 -> vector<2x256xf32>
    %134 = arith.select %22, %129, %133 : vector<2x256xi1>, vector<2x256xf32>
    %c35 = arith.constant 35 : index
    %135 = memref.load %arg2[%c35] : memref<98xf32, #tpu.memory_space<smem>>
    %136 = vector.broadcast %135 : f32 to vector<2x256xf32>
    %137 = arith.mulf %136, %134 : vector<2x256xf32>
    %138 = arith.addf %107, %112 : vector<2x256xf32>
    %139 = arith.addf %117, %122 : vector<2x256xf32>
    %140 = arith.addf %127, %132 : vector<2x256xf32>
    %141 = arith.addf %138, %139 : vector<2x256xf32>
    %142 = arith.addf %140, %137 : vector<2x256xf32>
    %143 = arith.addf %141, %142 : vector<2x256xf32>
    %c240_i32_27 = arith.constant 240 : i32
    %144 = tpu.dynamic_rotate %104 by %c240_i32_27 dim 1 : vector<2x256xf32>, i32 -> vector<2x256xf32>
    %145 = arith.select %10, %104, %144 : vector<2x256xi1>, vector<2x256xf32>
    %c45 = arith.constant 45 : index
    %146 = memref.load %arg2[%c45] : memref<98xf32, #tpu.memory_space<smem>>
    %147 = vector.broadcast %146 : f32 to vector<2x256xf32>
    %148 = arith.mulf %147, %145 : vector<2x256xf32>
    %c255_i32_28 = arith.constant 255 : i32
    %149 = tpu.dynamic_rotate %145 by %c255_i32_28 dim 1 : vector<2x256xf32>, i32 -> vector<2x256xf32>
    %150 = arith.select %18, %145, %149 : vector<2x256xi1>, vector<2x256xf32>
    %c46 = arith.constant 46 : index
    %151 = memref.load %arg2[%c46] : memref<98xf32, #tpu.memory_space<smem>>
    %152 = vector.broadcast %151 : f32 to vector<2x256xf32>
    %153 = arith.mulf %152, %150 : vector<2x256xf32>
    %c255_i32_29 = arith.constant 255 : i32
    %154 = tpu.dynamic_rotate %150 by %c255_i32_29 dim 1 : vector<2x256xf32>, i32 -> vector<2x256xf32>
    %155 = arith.select %18, %150, %154 : vector<2x256xi1>, vector<2x256xf32>
    %c47 = arith.constant 47 : index
    %156 = memref.load %arg2[%c47] : memref<98xf32, #tpu.memory_space<smem>>
    %157 = vector.broadcast %156 : f32 to vector<2x256xf32>
    %158 = arith.mulf %157, %155 : vector<2x256xf32>
    %c255_i32_30 = arith.constant 255 : i32
    %159 = tpu.dynamic_rotate %155 by %c255_i32_30 dim 1 : vector<2x256xf32>, i32 -> vector<2x256xf32>
    %160 = arith.select %18, %155, %159 : vector<2x256xi1>, vector<2x256xf32>
    %c48 = arith.constant 48 : index
    %161 = memref.load %arg2[%c48] : memref<98xf32, #tpu.memory_space<smem>>
    %162 = vector.broadcast %161 : f32 to vector<2x256xf32>
    %163 = arith.mulf %162, %160 : vector<2x256xf32>
    %c1_i32_31 = arith.constant 1 : i32
    %164 = tpu.dynamic_rotate %145 by %c1_i32_31 dim 1 : vector<2x256xf32>, i32 -> vector<2x256xf32>
    %165 = arith.select %22, %145, %164 : vector<2x256xi1>, vector<2x256xf32>
    %c44 = arith.constant 44 : index
    %166 = memref.load %arg2[%c44] : memref<98xf32, #tpu.memory_space<smem>>
    %167 = vector.broadcast %166 : f32 to vector<2x256xf32>
    %168 = arith.mulf %167, %165 : vector<2x256xf32>
    %c1_i32_32 = arith.constant 1 : i32
    %169 = tpu.dynamic_rotate %165 by %c1_i32_32 dim 1 : vector<2x256xf32>, i32 -> vector<2x256xf32>
    %170 = arith.select %22, %165, %169 : vector<2x256xi1>, vector<2x256xf32>
    %c43 = arith.constant 43 : index
    %171 = memref.load %arg2[%c43] : memref<98xf32, #tpu.memory_space<smem>>
    %172 = vector.broadcast %171 : f32 to vector<2x256xf32>
    %173 = arith.mulf %172, %170 : vector<2x256xf32>
    %c1_i32_33 = arith.constant 1 : i32
    %174 = tpu.dynamic_rotate %170 by %c1_i32_33 dim 1 : vector<2x256xf32>, i32 -> vector<2x256xf32>
    %175 = arith.select %22, %170, %174 : vector<2x256xi1>, vector<2x256xf32>
    %c42 = arith.constant 42 : index
    %176 = memref.load %arg2[%c42] : memref<98xf32, #tpu.memory_space<smem>>
    %177 = vector.broadcast %176 : f32 to vector<2x256xf32>
    %178 = arith.mulf %177, %175 : vector<2x256xf32>
    %179 = arith.addf %148, %153 : vector<2x256xf32>
    %180 = arith.addf %158, %163 : vector<2x256xf32>
    %181 = arith.addf %168, %173 : vector<2x256xf32>
    %182 = arith.addf %179, %180 : vector<2x256xf32>
    %183 = arith.addf %181, %178 : vector<2x256xf32>
    %184 = arith.addf %182, %183 : vector<2x256xf32>
    %c16_i32 = arith.constant 16 : i32
    %185 = tpu.dynamic_rotate %3 by %c16_i32 dim 1 : vector<2x256xf32>, i32 -> vector<2x256xf32>
    %186 = arith.select %14, %3, %185 : vector<2x256xi1>, vector<2x256xf32>
    %c17 = arith.constant 17 : index
    %187 = memref.load %arg2[%c17] : memref<98xf32, #tpu.memory_space<smem>>
    %188 = vector.broadcast %187 : f32 to vector<2x256xf32>
    %189 = arith.mulf %188, %186 : vector<2x256xf32>
    %c255_i32_34 = arith.constant 255 : i32
    %190 = tpu.dynamic_rotate %186 by %c255_i32_34 dim 1 : vector<2x256xf32>, i32 -> vector<2x256xf32>
    %191 = arith.select %18, %186, %190 : vector<2x256xi1>, vector<2x256xf32>
    %c18 = arith.constant 18 : index
    %192 = memref.load %arg2[%c18] : memref<98xf32, #tpu.memory_space<smem>>
    %193 = vector.broadcast %192 : f32 to vector<2x256xf32>
    %194 = arith.mulf %193, %191 : vector<2x256xf32>
    %c255_i32_35 = arith.constant 255 : i32
    %195 = tpu.dynamic_rotate %191 by %c255_i32_35 dim 1 : vector<2x256xf32>, i32 -> vector<2x256xf32>
    %196 = arith.select %18, %191, %195 : vector<2x256xi1>, vector<2x256xf32>
    %c19 = arith.constant 19 : index
    %197 = memref.load %arg2[%c19] : memref<98xf32, #tpu.memory_space<smem>>
    %198 = vector.broadcast %197 : f32 to vector<2x256xf32>
    %199 = arith.mulf %198, %196 : vector<2x256xf32>
    %c255_i32_36 = arith.constant 255 : i32
    %200 = tpu.dynamic_rotate %196 by %c255_i32_36 dim 1 : vector<2x256xf32>, i32 -> vector<2x256xf32>
    %201 = arith.select %18, %196, %200 : vector<2x256xi1>, vector<2x256xf32>
    %c20 = arith.constant 20 : index
    %202 = memref.load %arg2[%c20] : memref<98xf32, #tpu.memory_space<smem>>
    %203 = vector.broadcast %202 : f32 to vector<2x256xf32>
    %204 = arith.mulf %203, %201 : vector<2x256xf32>
    %c1_i32_37 = arith.constant 1 : i32
    %205 = tpu.dynamic_rotate %186 by %c1_i32_37 dim 1 : vector<2x256xf32>, i32 -> vector<2x256xf32>
    %206 = arith.select %22, %186, %205 : vector<2x256xi1>, vector<2x256xf32>
    %c16 = arith.constant 16 : index
    %207 = memref.load %arg2[%c16] : memref<98xf32, #tpu.memory_space<smem>>
    %208 = vector.broadcast %207 : f32 to vector<2x256xf32>
    %209 = arith.mulf %208, %206 : vector<2x256xf32>
    %c1_i32_38 = arith.constant 1 : i32
    %210 = tpu.dynamic_rotate %206 by %c1_i32_38 dim 1 : vector<2x256xf32>, i32 -> vector<2x256xf32>
    %211 = arith.select %22, %206, %210 : vector<2x256xi1>, vector<2x256xf32>
    %c15 = arith.constant 15 : index
    %212 = memref.load %arg2[%c15] : memref<98xf32, #tpu.memory_space<smem>>
    %213 = vector.broadcast %212 : f32 to vector<2x256xf32>
    %214 = arith.mulf %213, %211 : vector<2x256xf32>
    %c1_i32_39 = arith.constant 1 : i32
    %215 = tpu.dynamic_rotate %211 by %c1_i32_39 dim 1 : vector<2x256xf32>, i32 -> vector<2x256xf32>
    %216 = arith.select %22, %211, %215 : vector<2x256xi1>, vector<2x256xf32>
    %c14 = arith.constant 14 : index
    %217 = memref.load %arg2[%c14] : memref<98xf32, #tpu.memory_space<smem>>
    %218 = vector.broadcast %217 : f32 to vector<2x256xf32>
    %219 = arith.mulf %218, %216 : vector<2x256xf32>
    %220 = arith.addf %189, %194 : vector<2x256xf32>
    %221 = arith.addf %199, %204 : vector<2x256xf32>
    %222 = arith.addf %209, %214 : vector<2x256xf32>
    %223 = arith.addf %220, %221 : vector<2x256xf32>
    %224 = arith.addf %222, %219 : vector<2x256xf32>
    %225 = arith.addf %223, %224 : vector<2x256xf32>
    %c16_i32_40 = arith.constant 16 : i32
    %226 = tpu.dynamic_rotate %186 by %c16_i32_40 dim 1 : vector<2x256xf32>, i32 -> vector<2x256xf32>
    %227 = arith.select %14, %186, %226 : vector<2x256xi1>, vector<2x256xf32>
    %c10 = arith.constant 10 : index
    %228 = memref.load %arg2[%c10] : memref<98xf32, #tpu.memory_space<smem>>
    %229 = vector.broadcast %228 : f32 to vector<2x256xf32>
    %230 = arith.mulf %229, %227 : vector<2x256xf32>
    %c255_i32_41 = arith.constant 255 : i32
    %231 = tpu.dynamic_rotate %227 by %c255_i32_41 dim 1 : vector<2x256xf32>, i32 -> vector<2x256xf32>
    %232 = arith.select %18, %227, %231 : vector<2x256xi1>, vector<2x256xf32>
    %c11 = arith.constant 11 : index
    %233 = memref.load %arg2[%c11] : memref<98xf32, #tpu.memory_space<smem>>
    %234 = vector.broadcast %233 : f32 to vector<2x256xf32>
    %235 = arith.mulf %234, %232 : vector<2x256xf32>
    %c255_i32_42 = arith.constant 255 : i32
    %236 = tpu.dynamic_rotate %232 by %c255_i32_42 dim 1 : vector<2x256xf32>, i32 -> vector<2x256xf32>
    %237 = arith.select %18, %232, %236 : vector<2x256xi1>, vector<2x256xf32>
    %c12 = arith.constant 12 : index
    %238 = memref.load %arg2[%c12] : memref<98xf32, #tpu.memory_space<smem>>
    %239 = vector.broadcast %238 : f32 to vector<2x256xf32>
    %240 = arith.mulf %239, %237 : vector<2x256xf32>
    %c255_i32_43 = arith.constant 255 : i32
    %241 = tpu.dynamic_rotate %237 by %c255_i32_43 dim 1 : vector<2x256xf32>, i32 -> vector<2x256xf32>
    %242 = arith.select %18, %237, %241 : vector<2x256xi1>, vector<2x256xf32>
    %c13 = arith.constant 13 : index
    %243 = memref.load %arg2[%c13] : memref<98xf32, #tpu.memory_space<smem>>
    %244 = vector.broadcast %243 : f32 to vector<2x256xf32>
    %245 = arith.mulf %244, %242 : vector<2x256xf32>
    %c1_i32_44 = arith.constant 1 : i32
    %246 = tpu.dynamic_rotate %227 by %c1_i32_44 dim 1 : vector<2x256xf32>, i32 -> vector<2x256xf32>
    %247 = arith.select %22, %227, %246 : vector<2x256xi1>, vector<2x256xf32>
    %c9 = arith.constant 9 : index
    %248 = memref.load %arg2[%c9] : memref<98xf32, #tpu.memory_space<smem>>
    %249 = vector.broadcast %248 : f32 to vector<2x256xf32>
    %250 = arith.mulf %249, %247 : vector<2x256xf32>
    %c1_i32_45 = arith.constant 1 : i32
    %251 = tpu.dynamic_rotate %247 by %c1_i32_45 dim 1 : vector<2x256xf32>, i32 -> vector<2x256xf32>
    %252 = arith.select %22, %247, %251 : vector<2x256xi1>, vector<2x256xf32>
    %c8 = arith.constant 8 : index
    %253 = memref.load %arg2[%c8] : memref<98xf32, #tpu.memory_space<smem>>
    %254 = vector.broadcast %253 : f32 to vector<2x256xf32>
    %255 = arith.mulf %254, %252 : vector<2x256xf32>
    %c1_i32_46 = arith.constant 1 : i32
    %256 = tpu.dynamic_rotate %252 by %c1_i32_46 dim 1 : vector<2x256xf32>, i32 -> vector<2x256xf32>
    %257 = arith.select %22, %252, %256 : vector<2x256xi1>, vector<2x256xf32>
    %c7 = arith.constant 7 : index
    %258 = memref.load %arg2[%c7] : memref<98xf32, #tpu.memory_space<smem>>
    %259 = vector.broadcast %258 : f32 to vector<2x256xf32>
    %260 = arith.mulf %259, %257 : vector<2x256xf32>
    %261 = arith.addf %230, %235 : vector<2x256xf32>
    %262 = arith.addf %240, %245 : vector<2x256xf32>
    %263 = arith.addf %250, %255 : vector<2x256xf32>
    %264 = arith.addf %261, %262 : vector<2x256xf32>
    %265 = arith.addf %263, %260 : vector<2x256xf32>
    %266 = arith.addf %264, %265 : vector<2x256xf32>
    %c16_i32_47 = arith.constant 16 : i32
    %267 = tpu.dynamic_rotate %227 by %c16_i32_47 dim 1 : vector<2x256xf32>, i32 -> vector<2x256xf32>
    %268 = arith.select %14, %227, %267 : vector<2x256xi1>, vector<2x256xf32>
    %c3 = arith.constant 3 : index
    %269 = memref.load %arg2[%c3] : memref<98xf32, #tpu.memory_space<smem>>
    %270 = vector.broadcast %269 : f32 to vector<2x256xf32>
    %271 = arith.mulf %270, %268 : vector<2x256xf32>
    %c255_i32_48 = arith.constant 255 : i32
    %272 = tpu.dynamic_rotate %268 by %c255_i32_48 dim 1 : vector<2x256xf32>, i32 -> vector<2x256xf32>
    %273 = arith.select %18, %268, %272 : vector<2x256xi1>, vector<2x256xf32>
    %c4 = arith.constant 4 : index
    %274 = memref.load %arg2[%c4] : memref<98xf32, #tpu.memory_space<smem>>
    %275 = vector.broadcast %274 : f32 to vector<2x256xf32>
    %276 = arith.mulf %275, %273 : vector<2x256xf32>
    %c255_i32_49 = arith.constant 255 : i32
    %277 = tpu.dynamic_rotate %273 by %c255_i32_49 dim 1 : vector<2x256xf32>, i32 -> vector<2x256xf32>
    %278 = arith.select %18, %273, %277 : vector<2x256xi1>, vector<2x256xf32>
    %c5 = arith.constant 5 : index
    %279 = memref.load %arg2[%c5] : memref<98xf32, #tpu.memory_space<smem>>
    %280 = vector.broadcast %279 : f32 to vector<2x256xf32>
    %281 = arith.mulf %280, %278 : vector<2x256xf32>
    %c255_i32_50 = arith.constant 255 : i32
    %282 = tpu.dynamic_rotate %278 by %c255_i32_50 dim 1 : vector<2x256xf32>, i32 -> vector<2x256xf32>
    %283 = arith.select %18, %278, %282 : vector<2x256xi1>, vector<2x256xf32>
    %c6 = arith.constant 6 : index
    %284 = memref.load %arg2[%c6] : memref<98xf32, #tpu.memory_space<smem>>
    %285 = vector.broadcast %284 : f32 to vector<2x256xf32>
    %286 = arith.mulf %285, %283 : vector<2x256xf32>
    %c1_i32_51 = arith.constant 1 : i32
    %287 = tpu.dynamic_rotate %268 by %c1_i32_51 dim 1 : vector<2x256xf32>, i32 -> vector<2x256xf32>
    %288 = arith.select %22, %268, %287 : vector<2x256xi1>, vector<2x256xf32>
    %c2 = arith.constant 2 : index
    %289 = memref.load %arg2[%c2] : memref<98xf32, #tpu.memory_space<smem>>
    %290 = vector.broadcast %289 : f32 to vector<2x256xf32>
    %291 = arith.mulf %290, %288 : vector<2x256xf32>
    %c1_i32_52 = arith.constant 1 : i32
    %292 = tpu.dynamic_rotate %288 by %c1_i32_52 dim 1 : vector<2x256xf32>, i32 -> vector<2x256xf32>
    %293 = arith.select %22, %288, %292 : vector<2x256xi1>, vector<2x256xf32>
    %c1 = arith.constant 1 : index
    %294 = memref.load %arg2[%c1] : memref<98xf32, #tpu.memory_space<smem>>
    %295 = vector.broadcast %294 : f32 to vector<2x256xf32>
    %296 = arith.mulf %295, %293 : vector<2x256xf32>
    %c1_i32_53 = arith.constant 1 : i32
    %297 = tpu.dynamic_rotate %293 by %c1_i32_53 dim 1 : vector<2x256xf32>, i32 -> vector<2x256xf32>
    %298 = arith.select %22, %293, %297 : vector<2x256xi1>, vector<2x256xf32>
    %c0_54 = arith.constant 0 : index
    %299 = memref.load %arg2[%c0_54] : memref<98xf32, #tpu.memory_space<smem>>
    %300 = vector.broadcast %299 : f32 to vector<2x256xf32>
    %301 = arith.mulf %300, %298 : vector<2x256xf32>
    %302 = arith.addf %271, %276 : vector<2x256xf32>
    %303 = arith.addf %281, %286 : vector<2x256xf32>
    %304 = arith.addf %291, %296 : vector<2x256xf32>
    %305 = arith.addf %302, %303 : vector<2x256xf32>
    %306 = arith.addf %304, %301 : vector<2x256xf32>
    %307 = arith.addf %305, %306 : vector<2x256xf32>
    %308 = arith.addf %61, %102 : vector<2x256xf32>
    %309 = arith.addf %143, %184 : vector<2x256xf32>
    %310 = arith.addf %225, %266 : vector<2x256xf32>
    %311 = arith.addf %308, %309 : vector<2x256xf32>
    %312 = arith.addf %310, %307 : vector<2x256xf32>
    %313 = arith.addf %311, %312 : vector<2x256xf32>
    %c73 = arith.constant 73 : index
    %314 = memref.load %arg2[%c73] : memref<98xf32, #tpu.memory_space<smem>>
    %315 = vector.broadcast %314 : f32 to vector<2x256xf32>
    %316 = arith.mulf %315, %4 : vector<2x256xf32>
    %c255_i32_55 = arith.constant 255 : i32
    %317 = tpu.dynamic_rotate %4 by %c255_i32_55 dim 1 : vector<2x256xf32>, i32 -> vector<2x256xf32>
    %318 = arith.select %18, %4, %317 : vector<2x256xi1>, vector<2x256xf32>
    %c74 = arith.constant 74 : index
    %319 = memref.load %arg2[%c74] : memref<98xf32, #tpu.memory_space<smem>>
    %320 = vector.broadcast %319 : f32 to vector<2x256xf32>
    %321 = arith.mulf %320, %318 : vector<2x256xf32>
    %c255_i32_56 = arith.constant 255 : i32
    %322 = tpu.dynamic_rotate %318 by %c255_i32_56 dim 1 : vector<2x256xf32>, i32 -> vector<2x256xf32>
    %323 = arith.select %18, %318, %322 : vector<2x256xi1>, vector<2x256xf32>
    %c75 = arith.constant 75 : index
    %324 = memref.load %arg2[%c75] : memref<98xf32, #tpu.memory_space<smem>>
    %325 = vector.broadcast %324 : f32 to vector<2x256xf32>
    %326 = arith.mulf %325, %323 : vector<2x256xf32>
    %c255_i32_57 = arith.constant 255 : i32
    %327 = tpu.dynamic_rotate %323 by %c255_i32_57 dim 1 : vector<2x256xf32>, i32 -> vector<2x256xf32>
    %328 = arith.select %18, %323, %327 : vector<2x256xi1>, vector<2x256xf32>
    %c76 = arith.constant 76 : index
    %329 = memref.load %arg2[%c76] : memref<98xf32, #tpu.memory_space<smem>>
    %330 = vector.broadcast %329 : f32 to vector<2x256xf32>
    %331 = arith.mulf %330, %328 : vector<2x256xf32>
    %c1_i32_58 = arith.constant 1 : i32
    %332 = tpu.dynamic_rotate %4 by %c1_i32_58 dim 1 : vector<2x256xf32>, i32 -> vector<2x256xf32>
    %333 = arith.select %22, %4, %332 : vector<2x256xi1>, vector<2x256xf32>
    %c72 = arith.constant 72 : index
    %334 = memref.load %arg2[%c72] : memref<98xf32, #tpu.memory_space<smem>>
    %335 = vector.broadcast %334 : f32 to vector<2x256xf32>
    %336 = arith.mulf %335, %333 : vector<2x256xf32>
    %c1_i32_59 = arith.constant 1 : i32
    %337 = tpu.dynamic_rotate %333 by %c1_i32_59 dim 1 : vector<2x256xf32>, i32 -> vector<2x256xf32>
    %338 = arith.select %22, %333, %337 : vector<2x256xi1>, vector<2x256xf32>
    %c71 = arith.constant 71 : index
    %339 = memref.load %arg2[%c71] : memref<98xf32, #tpu.memory_space<smem>>
    %340 = vector.broadcast %339 : f32 to vector<2x256xf32>
    %341 = arith.mulf %340, %338 : vector<2x256xf32>
    %c1_i32_60 = arith.constant 1 : i32
    %342 = tpu.dynamic_rotate %338 by %c1_i32_60 dim 1 : vector<2x256xf32>, i32 -> vector<2x256xf32>
    %343 = arith.select %22, %338, %342 : vector<2x256xi1>, vector<2x256xf32>
    %c70 = arith.constant 70 : index
    %344 = memref.load %arg2[%c70] : memref<98xf32, #tpu.memory_space<smem>>
    %345 = vector.broadcast %344 : f32 to vector<2x256xf32>
    %346 = arith.mulf %345, %343 : vector<2x256xf32>
    %347 = arith.addf %316, %321 : vector<2x256xf32>
    %348 = arith.addf %326, %331 : vector<2x256xf32>
    %349 = arith.addf %336, %341 : vector<2x256xf32>
    %350 = arith.addf %347, %348 : vector<2x256xf32>
    %351 = arith.addf %349, %346 : vector<2x256xf32>
    %352 = arith.addf %350, %351 : vector<2x256xf32>
    %c240_i32_61 = arith.constant 240 : i32
    %353 = tpu.dynamic_rotate %4 by %c240_i32_61 dim 1 : vector<2x256xf32>, i32 -> vector<2x256xf32>
    %354 = arith.select %10, %4, %353 : vector<2x256xi1>, vector<2x256xf32>
    %c80 = arith.constant 80 : index
    %355 = memref.load %arg2[%c80] : memref<98xf32, #tpu.memory_space<smem>>
    %356 = vector.broadcast %355 : f32 to vector<2x256xf32>
    %357 = arith.mulf %356, %354 : vector<2x256xf32>
    %c255_i32_62 = arith.constant 255 : i32
    %358 = tpu.dynamic_rotate %354 by %c255_i32_62 dim 1 : vector<2x256xf32>, i32 -> vector<2x256xf32>
    %359 = arith.select %18, %354, %358 : vector<2x256xi1>, vector<2x256xf32>
    %c81 = arith.constant 81 : index
    %360 = memref.load %arg2[%c81] : memref<98xf32, #tpu.memory_space<smem>>
    %361 = vector.broadcast %360 : f32 to vector<2x256xf32>
    %362 = arith.mulf %361, %359 : vector<2x256xf32>
    %c255_i32_63 = arith.constant 255 : i32
    %363 = tpu.dynamic_rotate %359 by %c255_i32_63 dim 1 : vector<2x256xf32>, i32 -> vector<2x256xf32>
    %364 = arith.select %18, %359, %363 : vector<2x256xi1>, vector<2x256xf32>
    %c82 = arith.constant 82 : index
    %365 = memref.load %arg2[%c82] : memref<98xf32, #tpu.memory_space<smem>>
    %366 = vector.broadcast %365 : f32 to vector<2x256xf32>
    %367 = arith.mulf %366, %364 : vector<2x256xf32>
    %c255_i32_64 = arith.constant 255 : i32
    %368 = tpu.dynamic_rotate %364 by %c255_i32_64 dim 1 : vector<2x256xf32>, i32 -> vector<2x256xf32>
    %369 = arith.select %18, %364, %368 : vector<2x256xi1>, vector<2x256xf32>
    %c83 = arith.constant 83 : index
    %370 = memref.load %arg2[%c83] : memref<98xf32, #tpu.memory_space<smem>>
    %371 = vector.broadcast %370 : f32 to vector<2x256xf32>
    %372 = arith.mulf %371, %369 : vector<2x256xf32>
    %c1_i32_65 = arith.constant 1 : i32
    %373 = tpu.dynamic_rotate %354 by %c1_i32_65 dim 1 : vector<2x256xf32>, i32 -> vector<2x256xf32>
    %374 = arith.select %22, %354, %373 : vector<2x256xi1>, vector<2x256xf32>
    %c79 = arith.constant 79 : index
    %375 = memref.load %arg2[%c79] : memref<98xf32, #tpu.memory_space<smem>>
    %376 = vector.broadcast %375 : f32 to vector<2x256xf32>
    %377 = arith.mulf %376, %374 : vector<2x256xf32>
    %c1_i32_66 = arith.constant 1 : i32
    %378 = tpu.dynamic_rotate %374 by %c1_i32_66 dim 1 : vector<2x256xf32>, i32 -> vector<2x256xf32>
    %379 = arith.select %22, %374, %378 : vector<2x256xi1>, vector<2x256xf32>
    %c78 = arith.constant 78 : index
    %380 = memref.load %arg2[%c78] : memref<98xf32, #tpu.memory_space<smem>>
    %381 = vector.broadcast %380 : f32 to vector<2x256xf32>
    %382 = arith.mulf %381, %379 : vector<2x256xf32>
    %c1_i32_67 = arith.constant 1 : i32
    %383 = tpu.dynamic_rotate %379 by %c1_i32_67 dim 1 : vector<2x256xf32>, i32 -> vector<2x256xf32>
    %384 = arith.select %22, %379, %383 : vector<2x256xi1>, vector<2x256xf32>
    %c77 = arith.constant 77 : index
    %385 = memref.load %arg2[%c77] : memref<98xf32, #tpu.memory_space<smem>>
    %386 = vector.broadcast %385 : f32 to vector<2x256xf32>
    %387 = arith.mulf %386, %384 : vector<2x256xf32>
    %388 = arith.addf %357, %362 : vector<2x256xf32>
    %389 = arith.addf %367, %372 : vector<2x256xf32>
    %390 = arith.addf %377, %382 : vector<2x256xf32>
    %391 = arith.addf %388, %389 : vector<2x256xf32>
    %392 = arith.addf %390, %387 : vector<2x256xf32>
    %393 = arith.addf %391, %392 : vector<2x256xf32>
    %c240_i32_68 = arith.constant 240 : i32
    %394 = tpu.dynamic_rotate %354 by %c240_i32_68 dim 1 : vector<2x256xf32>, i32 -> vector<2x256xf32>
    %395 = arith.select %10, %354, %394 : vector<2x256xi1>, vector<2x256xf32>
    %c87 = arith.constant 87 : index
    %396 = memref.load %arg2[%c87] : memref<98xf32, #tpu.memory_space<smem>>
    %397 = vector.broadcast %396 : f32 to vector<2x256xf32>
    %398 = arith.mulf %397, %395 : vector<2x256xf32>
    %c255_i32_69 = arith.constant 255 : i32
    %399 = tpu.dynamic_rotate %395 by %c255_i32_69 dim 1 : vector<2x256xf32>, i32 -> vector<2x256xf32>
    %400 = arith.select %18, %395, %399 : vector<2x256xi1>, vector<2x256xf32>
    %c88 = arith.constant 88 : index
    %401 = memref.load %arg2[%c88] : memref<98xf32, #tpu.memory_space<smem>>
    %402 = vector.broadcast %401 : f32 to vector<2x256xf32>
    %403 = arith.mulf %402, %400 : vector<2x256xf32>
    %c255_i32_70 = arith.constant 255 : i32
    %404 = tpu.dynamic_rotate %400 by %c255_i32_70 dim 1 : vector<2x256xf32>, i32 -> vector<2x256xf32>
    %405 = arith.select %18, %400, %404 : vector<2x256xi1>, vector<2x256xf32>
    %c89 = arith.constant 89 : index
    %406 = memref.load %arg2[%c89] : memref<98xf32, #tpu.memory_space<smem>>
    %407 = vector.broadcast %406 : f32 to vector<2x256xf32>
    %408 = arith.mulf %407, %405 : vector<2x256xf32>
    %c255_i32_71 = arith.constant 255 : i32
    %409 = tpu.dynamic_rotate %405 by %c255_i32_71 dim 1 : vector<2x256xf32>, i32 -> vector<2x256xf32>
    %410 = arith.select %18, %405, %409 : vector<2x256xi1>, vector<2x256xf32>
    %c90 = arith.constant 90 : index
    %411 = memref.load %arg2[%c90] : memref<98xf32, #tpu.memory_space<smem>>
    %412 = vector.broadcast %411 : f32 to vector<2x256xf32>
    %413 = arith.mulf %412, %410 : vector<2x256xf32>
    %c1_i32_72 = arith.constant 1 : i32
    %414 = tpu.dynamic_rotate %395 by %c1_i32_72 dim 1 : vector<2x256xf32>, i32 -> vector<2x256xf32>
    %415 = arith.select %22, %395, %414 : vector<2x256xi1>, vector<2x256xf32>
    %c86 = arith.constant 86 : index
    %416 = memref.load %arg2[%c86] : memref<98xf32, #tpu.memory_space<smem>>
    %417 = vector.broadcast %416 : f32 to vector<2x256xf32>
    %418 = arith.mulf %417, %415 : vector<2x256xf32>
    %c1_i32_73 = arith.constant 1 : i32
    %419 = tpu.dynamic_rotate %415 by %c1_i32_73 dim 1 : vector<2x256xf32>, i32 -> vector<2x256xf32>
    %420 = arith.select %22, %415, %419 : vector<2x256xi1>, vector<2x256xf32>
    %c85 = arith.constant 85 : index
    %421 = memref.load %arg2[%c85] : memref<98xf32, #tpu.memory_space<smem>>
    %422 = vector.broadcast %421 : f32 to vector<2x256xf32>
    %423 = arith.mulf %422, %420 : vector<2x256xf32>
    %c1_i32_74 = arith.constant 1 : i32
    %424 = tpu.dynamic_rotate %420 by %c1_i32_74 dim 1 : vector<2x256xf32>, i32 -> vector<2x256xf32>
    %425 = arith.select %22, %420, %424 : vector<2x256xi1>, vector<2x256xf32>
    %c84 = arith.constant 84 : index
    %426 = memref.load %arg2[%c84] : memref<98xf32, #tpu.memory_space<smem>>
    %427 = vector.broadcast %426 : f32 to vector<2x256xf32>
    %428 = arith.mulf %427, %425 : vector<2x256xf32>
    %429 = arith.addf %398, %403 : vector<2x256xf32>
    %430 = arith.addf %408, %413 : vector<2x256xf32>
    %431 = arith.addf %418, %423 : vector<2x256xf32>
    %432 = arith.addf %429, %430 : vector<2x256xf32>
    %433 = arith.addf %431, %428 : vector<2x256xf32>
    %434 = arith.addf %432, %433 : vector<2x256xf32>
    %c240_i32_75 = arith.constant 240 : i32
    %435 = tpu.dynamic_rotate %395 by %c240_i32_75 dim 1 : vector<2x256xf32>, i32 -> vector<2x256xf32>
    %436 = arith.select %10, %395, %435 : vector<2x256xi1>, vector<2x256xf32>
    %c94 = arith.constant 94 : index
    %437 = memref.load %arg2[%c94] : memref<98xf32, #tpu.memory_space<smem>>
    %438 = vector.broadcast %437 : f32 to vector<2x256xf32>
    %439 = arith.mulf %438, %436 : vector<2x256xf32>
    %c255_i32_76 = arith.constant 255 : i32
    %440 = tpu.dynamic_rotate %436 by %c255_i32_76 dim 1 : vector<2x256xf32>, i32 -> vector<2x256xf32>
    %441 = arith.select %18, %436, %440 : vector<2x256xi1>, vector<2x256xf32>
    %c95 = arith.constant 95 : index
    %442 = memref.load %arg2[%c95] : memref<98xf32, #tpu.memory_space<smem>>
    %443 = vector.broadcast %442 : f32 to vector<2x256xf32>
    %444 = arith.mulf %443, %441 : vector<2x256xf32>
    %c255_i32_77 = arith.constant 255 : i32
    %445 = tpu.dynamic_rotate %441 by %c255_i32_77 dim 1 : vector<2x256xf32>, i32 -> vector<2x256xf32>
    %446 = arith.select %18, %441, %445 : vector<2x256xi1>, vector<2x256xf32>
    %c96 = arith.constant 96 : index
    %447 = memref.load %arg2[%c96] : memref<98xf32, #tpu.memory_space<smem>>
    %448 = vector.broadcast %447 : f32 to vector<2x256xf32>
    %449 = arith.mulf %448, %446 : vector<2x256xf32>
    %c255_i32_78 = arith.constant 255 : i32
    %450 = tpu.dynamic_rotate %446 by %c255_i32_78 dim 1 : vector<2x256xf32>, i32 -> vector<2x256xf32>
    %451 = arith.select %18, %446, %450 : vector<2x256xi1>, vector<2x256xf32>
    %c97 = arith.constant 97 : index
    %452 = memref.load %arg2[%c97] : memref<98xf32, #tpu.memory_space<smem>>
    %453 = vector.broadcast %452 : f32 to vector<2x256xf32>
    %454 = arith.mulf %453, %451 : vector<2x256xf32>
    %c1_i32_79 = arith.constant 1 : i32
    %455 = tpu.dynamic_rotate %436 by %c1_i32_79 dim 1 : vector<2x256xf32>, i32 -> vector<2x256xf32>
    %456 = arith.select %22, %436, %455 : vector<2x256xi1>, vector<2x256xf32>
    %c93 = arith.constant 93 : index
    %457 = memref.load %arg2[%c93] : memref<98xf32, #tpu.memory_space<smem>>
    %458 = vector.broadcast %457 : f32 to vector<2x256xf32>
    %459 = arith.mulf %458, %456 : vector<2x256xf32>
    %c1_i32_80 = arith.constant 1 : i32
    %460 = tpu.dynamic_rotate %456 by %c1_i32_80 dim 1 : vector<2x256xf32>, i32 -> vector<2x256xf32>
    %461 = arith.select %22, %456, %460 : vector<2x256xi1>, vector<2x256xf32>
    %c92 = arith.constant 92 : index
    %462 = memref.load %arg2[%c92] : memref<98xf32, #tpu.memory_space<smem>>
    %463 = vector.broadcast %462 : f32 to vector<2x256xf32>
    %464 = arith.mulf %463, %461 : vector<2x256xf32>
    %c1_i32_81 = arith.constant 1 : i32
    %465 = tpu.dynamic_rotate %461 by %c1_i32_81 dim 1 : vector<2x256xf32>, i32 -> vector<2x256xf32>
    %466 = arith.select %22, %461, %465 : vector<2x256xi1>, vector<2x256xf32>
    %c91 = arith.constant 91 : index
    %467 = memref.load %arg2[%c91] : memref<98xf32, #tpu.memory_space<smem>>
    %468 = vector.broadcast %467 : f32 to vector<2x256xf32>
    %469 = arith.mulf %468, %466 : vector<2x256xf32>
    %470 = arith.addf %439, %444 : vector<2x256xf32>
    %471 = arith.addf %449, %454 : vector<2x256xf32>
    %472 = arith.addf %459, %464 : vector<2x256xf32>
    %473 = arith.addf %470, %471 : vector<2x256xf32>
    %474 = arith.addf %472, %469 : vector<2x256xf32>
    %475 = arith.addf %473, %474 : vector<2x256xf32>
    %c16_i32_82 = arith.constant 16 : i32
    %476 = tpu.dynamic_rotate %4 by %c16_i32_82 dim 1 : vector<2x256xf32>, i32 -> vector<2x256xf32>
    %477 = arith.select %14, %4, %476 : vector<2x256xi1>, vector<2x256xf32>
    %c66 = arith.constant 66 : index
    %478 = memref.load %arg2[%c66] : memref<98xf32, #tpu.memory_space<smem>>
    %479 = vector.broadcast %478 : f32 to vector<2x256xf32>
    %480 = arith.mulf %479, %477 : vector<2x256xf32>
    %c255_i32_83 = arith.constant 255 : i32
    %481 = tpu.dynamic_rotate %477 by %c255_i32_83 dim 1 : vector<2x256xf32>, i32 -> vector<2x256xf32>
    %482 = arith.select %18, %477, %481 : vector<2x256xi1>, vector<2x256xf32>
    %c67 = arith.constant 67 : index
    %483 = memref.load %arg2[%c67] : memref<98xf32, #tpu.memory_space<smem>>
    %484 = vector.broadcast %483 : f32 to vector<2x256xf32>
    %485 = arith.mulf %484, %482 : vector<2x256xf32>
    %c255_i32_84 = arith.constant 255 : i32
    %486 = tpu.dynamic_rotate %482 by %c255_i32_84 dim 1 : vector<2x256xf32>, i32 -> vector<2x256xf32>
    %487 = arith.select %18, %482, %486 : vector<2x256xi1>, vector<2x256xf32>
    %c68 = arith.constant 68 : index
    %488 = memref.load %arg2[%c68] : memref<98xf32, #tpu.memory_space<smem>>
    %489 = vector.broadcast %488 : f32 to vector<2x256xf32>
    %490 = arith.mulf %489, %487 : vector<2x256xf32>
    %c255_i32_85 = arith.constant 255 : i32
    %491 = tpu.dynamic_rotate %487 by %c255_i32_85 dim 1 : vector<2x256xf32>, i32 -> vector<2x256xf32>
    %492 = arith.select %18, %487, %491 : vector<2x256xi1>, vector<2x256xf32>
    %c69 = arith.constant 69 : index
    %493 = memref.load %arg2[%c69] : memref<98xf32, #tpu.memory_space<smem>>
    %494 = vector.broadcast %493 : f32 to vector<2x256xf32>
    %495 = arith.mulf %494, %492 : vector<2x256xf32>
    %c1_i32_86 = arith.constant 1 : i32
    %496 = tpu.dynamic_rotate %477 by %c1_i32_86 dim 1 : vector<2x256xf32>, i32 -> vector<2x256xf32>
    %497 = arith.select %22, %477, %496 : vector<2x256xi1>, vector<2x256xf32>
    %c65 = arith.constant 65 : index
    %498 = memref.load %arg2[%c65] : memref<98xf32, #tpu.memory_space<smem>>
    %499 = vector.broadcast %498 : f32 to vector<2x256xf32>
    %500 = arith.mulf %499, %497 : vector<2x256xf32>
    %c1_i32_87 = arith.constant 1 : i32
    %501 = tpu.dynamic_rotate %497 by %c1_i32_87 dim 1 : vector<2x256xf32>, i32 -> vector<2x256xf32>
    %502 = arith.select %22, %497, %501 : vector<2x256xi1>, vector<2x256xf32>
    %c64 = arith.constant 64 : index
    %503 = memref.load %arg2[%c64] : memref<98xf32, #tpu.memory_space<smem>>
    %504 = vector.broadcast %503 : f32 to vector<2x256xf32>
    %505 = arith.mulf %504, %502 : vector<2x256xf32>
    %c1_i32_88 = arith.constant 1 : i32
    %506 = tpu.dynamic_rotate %502 by %c1_i32_88 dim 1 : vector<2x256xf32>, i32 -> vector<2x256xf32>
    %507 = arith.select %22, %502, %506 : vector<2x256xi1>, vector<2x256xf32>
    %c63 = arith.constant 63 : index
    %508 = memref.load %arg2[%c63] : memref<98xf32, #tpu.memory_space<smem>>
    %509 = vector.broadcast %508 : f32 to vector<2x256xf32>
    %510 = arith.mulf %509, %507 : vector<2x256xf32>
    %511 = arith.addf %480, %485 : vector<2x256xf32>
    %512 = arith.addf %490, %495 : vector<2x256xf32>
    %513 = arith.addf %500, %505 : vector<2x256xf32>
    %514 = arith.addf %511, %512 : vector<2x256xf32>
    %515 = arith.addf %513, %510 : vector<2x256xf32>
    %516 = arith.addf %514, %515 : vector<2x256xf32>
    %c16_i32_89 = arith.constant 16 : i32
    %517 = tpu.dynamic_rotate %477 by %c16_i32_89 dim 1 : vector<2x256xf32>, i32 -> vector<2x256xf32>
    %518 = arith.select %14, %477, %517 : vector<2x256xi1>, vector<2x256xf32>
    %c59 = arith.constant 59 : index
    %519 = memref.load %arg2[%c59] : memref<98xf32, #tpu.memory_space<smem>>
    %520 = vector.broadcast %519 : f32 to vector<2x256xf32>
    %521 = arith.mulf %520, %518 : vector<2x256xf32>
    %c255_i32_90 = arith.constant 255 : i32
    %522 = tpu.dynamic_rotate %518 by %c255_i32_90 dim 1 : vector<2x256xf32>, i32 -> vector<2x256xf32>
    %523 = arith.select %18, %518, %522 : vector<2x256xi1>, vector<2x256xf32>
    %c60 = arith.constant 60 : index
    %524 = memref.load %arg2[%c60] : memref<98xf32, #tpu.memory_space<smem>>
    %525 = vector.broadcast %524 : f32 to vector<2x256xf32>
    %526 = arith.mulf %525, %523 : vector<2x256xf32>
    %c255_i32_91 = arith.constant 255 : i32
    %527 = tpu.dynamic_rotate %523 by %c255_i32_91 dim 1 : vector<2x256xf32>, i32 -> vector<2x256xf32>
    %528 = arith.select %18, %523, %527 : vector<2x256xi1>, vector<2x256xf32>
    %c61 = arith.constant 61 : index
    %529 = memref.load %arg2[%c61] : memref<98xf32, #tpu.memory_space<smem>>
    %530 = vector.broadcast %529 : f32 to vector<2x256xf32>
    %531 = arith.mulf %530, %528 : vector<2x256xf32>
    %c255_i32_92 = arith.constant 255 : i32
    %532 = tpu.dynamic_rotate %528 by %c255_i32_92 dim 1 : vector<2x256xf32>, i32 -> vector<2x256xf32>
    %533 = arith.select %18, %528, %532 : vector<2x256xi1>, vector<2x256xf32>
    %c62 = arith.constant 62 : index
    %534 = memref.load %arg2[%c62] : memref<98xf32, #tpu.memory_space<smem>>
    %535 = vector.broadcast %534 : f32 to vector<2x256xf32>
    %536 = arith.mulf %535, %533 : vector<2x256xf32>
    %c1_i32_93 = arith.constant 1 : i32
    %537 = tpu.dynamic_rotate %518 by %c1_i32_93 dim 1 : vector<2x256xf32>, i32 -> vector<2x256xf32>
    %538 = arith.select %22, %518, %537 : vector<2x256xi1>, vector<2x256xf32>
    %c58 = arith.constant 58 : index
    %539 = memref.load %arg2[%c58] : memref<98xf32, #tpu.memory_space<smem>>
    %540 = vector.broadcast %539 : f32 to vector<2x256xf32>
    %541 = arith.mulf %540, %538 : vector<2x256xf32>
    %c1_i32_94 = arith.constant 1 : i32
    %542 = tpu.dynamic_rotate %538 by %c1_i32_94 dim 1 : vector<2x256xf32>, i32 -> vector<2x256xf32>
    %543 = arith.select %22, %538, %542 : vector<2x256xi1>, vector<2x256xf32>
    %c57 = arith.constant 57 : index
    %544 = memref.load %arg2[%c57] : memref<98xf32, #tpu.memory_space<smem>>
    %545 = vector.broadcast %544 : f32 to vector<2x256xf32>
    %546 = arith.mulf %545, %543 : vector<2x256xf32>
    %c1_i32_95 = arith.constant 1 : i32
    %547 = tpu.dynamic_rotate %543 by %c1_i32_95 dim 1 : vector<2x256xf32>, i32 -> vector<2x256xf32>
    %548 = arith.select %22, %543, %547 : vector<2x256xi1>, vector<2x256xf32>
    %c56 = arith.constant 56 : index
    %549 = memref.load %arg2[%c56] : memref<98xf32, #tpu.memory_space<smem>>
    %550 = vector.broadcast %549 : f32 to vector<2x256xf32>
    %551 = arith.mulf %550, %548 : vector<2x256xf32>
    %552 = arith.addf %521, %526 : vector<2x256xf32>
    %553 = arith.addf %531, %536 : vector<2x256xf32>
    %554 = arith.addf %541, %546 : vector<2x256xf32>
    %555 = arith.addf %552, %553 : vector<2x256xf32>
    %556 = arith.addf %554, %551 : vector<2x256xf32>
    %557 = arith.addf %555, %556 : vector<2x256xf32>
    %c16_i32_96 = arith.constant 16 : i32
    %558 = tpu.dynamic_rotate %518 by %c16_i32_96 dim 1 : vector<2x256xf32>, i32 -> vector<2x256xf32>
    %559 = arith.select %14, %518, %558 : vector<2x256xi1>, vector<2x256xf32>
    %c52 = arith.constant 52 : index
    %560 = memref.load %arg2[%c52] : memref<98xf32, #tpu.memory_space<smem>>
    %561 = vector.broadcast %560 : f32 to vector<2x256xf32>
    %562 = arith.mulf %561, %559 : vector<2x256xf32>
    %c255_i32_97 = arith.constant 255 : i32
    %563 = tpu.dynamic_rotate %559 by %c255_i32_97 dim 1 : vector<2x256xf32>, i32 -> vector<2x256xf32>
    %564 = arith.select %18, %559, %563 : vector<2x256xi1>, vector<2x256xf32>
    %c53 = arith.constant 53 : index
    %565 = memref.load %arg2[%c53] : memref<98xf32, #tpu.memory_space<smem>>
    %566 = vector.broadcast %565 : f32 to vector<2x256xf32>
    %567 = arith.mulf %566, %564 : vector<2x256xf32>
    %c255_i32_98 = arith.constant 255 : i32
    %568 = tpu.dynamic_rotate %564 by %c255_i32_98 dim 1 : vector<2x256xf32>, i32 -> vector<2x256xf32>
    %569 = arith.select %18, %564, %568 : vector<2x256xi1>, vector<2x256xf32>
    %c54 = arith.constant 54 : index
    %570 = memref.load %arg2[%c54] : memref<98xf32, #tpu.memory_space<smem>>
    %571 = vector.broadcast %570 : f32 to vector<2x256xf32>
    %572 = arith.mulf %571, %569 : vector<2x256xf32>
    %c255_i32_99 = arith.constant 255 : i32
    %573 = tpu.dynamic_rotate %569 by %c255_i32_99 dim 1 : vector<2x256xf32>, i32 -> vector<2x256xf32>
    %574 = arith.select %18, %569, %573 : vector<2x256xi1>, vector<2x256xf32>
    %c55 = arith.constant 55 : index
    %575 = memref.load %arg2[%c55] : memref<98xf32, #tpu.memory_space<smem>>
    %576 = vector.broadcast %575 : f32 to vector<2x256xf32>
    %577 = arith.mulf %576, %574 : vector<2x256xf32>
    %c1_i32_100 = arith.constant 1 : i32
    %578 = tpu.dynamic_rotate %559 by %c1_i32_100 dim 1 : vector<2x256xf32>, i32 -> vector<2x256xf32>
    %579 = arith.select %22, %559, %578 : vector<2x256xi1>, vector<2x256xf32>
    %c51 = arith.constant 51 : index
    %580 = memref.load %arg2[%c51] : memref<98xf32, #tpu.memory_space<smem>>
    %581 = vector.broadcast %580 : f32 to vector<2x256xf32>
    %582 = arith.mulf %581, %579 : vector<2x256xf32>
    %c1_i32_101 = arith.constant 1 : i32
    %583 = tpu.dynamic_rotate %579 by %c1_i32_101 dim 1 : vector<2x256xf32>, i32 -> vector<2x256xf32>
    %584 = arith.select %22, %579, %583 : vector<2x256xi1>, vector<2x256xf32>
    %c50 = arith.constant 50 : index
    %585 = memref.load %arg2[%c50] : memref<98xf32, #tpu.memory_space<smem>>
    %586 = vector.broadcast %585 : f32 to vector<2x256xf32>
    %587 = arith.mulf %586, %584 : vector<2x256xf32>
    %c1_i32_102 = arith.constant 1 : i32
    %588 = tpu.dynamic_rotate %584 by %c1_i32_102 dim 1 : vector<2x256xf32>, i32 -> vector<2x256xf32>
    %589 = arith.select %22, %584, %588 : vector<2x256xi1>, vector<2x256xf32>
    %c49 = arith.constant 49 : index
    %590 = memref.load %arg2[%c49] : memref<98xf32, #tpu.memory_space<smem>>
    %591 = vector.broadcast %590 : f32 to vector<2x256xf32>
    %592 = arith.mulf %591, %589 : vector<2x256xf32>
    %593 = arith.addf %562, %567 : vector<2x256xf32>
    %594 = arith.addf %572, %577 : vector<2x256xf32>
    %595 = arith.addf %582, %587 : vector<2x256xf32>
    %596 = arith.addf %593, %594 : vector<2x256xf32>
    %597 = arith.addf %595, %592 : vector<2x256xf32>
    %598 = arith.addf %596, %597 : vector<2x256xf32>
    %599 = arith.addf %352, %393 : vector<2x256xf32>
    %600 = arith.addf %434, %475 : vector<2x256xf32>
    %601 = arith.addf %516, %557 : vector<2x256xf32>
    %602 = arith.addf %599, %600 : vector<2x256xf32>
    %603 = arith.addf %601, %598 : vector<2x256xf32>
    %604 = arith.addf %602, %603 : vector<2x256xf32>
    %605 = arith.addf %313, %604 : vector<2x256xf32>
    %606 = arith.negf %605 : vector<2x256xf32>
    %607 = math.exp %606 : vector<2x256xf32>
    %cst_103 = arith.constant 1.000000e+00 : f32
    %608 = vector.broadcast %cst_103 : f32 to vector<2x256xf32>
    %609 = arith.addf %608, %607 : vector<2x256xf32>
    %610 = arith.divf %608, %609 : vector<2x256xf32>
    %611 = vector.shape_cast %610 : vector<2x256xf32> to vector<2x1x256xf32>
    %c0_104 = arith.constant 0 : index
    %c0_105 = arith.constant 0 : index
    %c0_106 = arith.constant 0 : index
    %612 = vector.load %arg1[%c0_104, %c0_105, %c0_106] : memref<2x4x256xf32, #tpu.memory_space<vmem>>, vector<2x4x256xf32>
    %613 = vector.broadcast %611 : vector<2x1x256xf32> to vector<2x4x256xf32>
    %614 = arith.mulf %613, %612 : vector<2x4x256xf32>
    %c0_107 = arith.constant 0 : index
    %c0_108 = arith.constant 0 : index
    %c0_109 = arith.constant 0 : index
    %615 = vector.load %arg5[%c0_107, %c0_108, %c0_109] : memref<2x4x256xf32, #tpu.memory_space<vmem>>, vector<2x4x256xf32>
    tpu.vector_store %arg5[%c0_107, %c0_108, %c0_109], %614 {strides = array<i32>} : memref<2x4x256xf32, #tpu.memory_space<vmem>>, vector<2x4x256xf32>,
    return
  }
  func.func @transform_0(%arg0: i32) -> (i32, i32, i32) {
    %c0_i32 = arith.constant 0 : i32
    %c0_i32_0 = arith.constant 0 : i32
    %c0_i32_1 = arith.constant 0 : i32
    return %arg0, %c0_i32, %c0_i32_0 : i32, i32, i32
  }
  func.func @transform_1(%arg0: i32) -> i32 {
    %c0_i32 = arith.constant 0 : i32
    %c0_i32_0 = arith.constant 0 : i32
    return %c0_i32 : i32
  }
  func.func @transform_2(%arg0: i32) -> (i32, i32) {
    %c0_i32 = arith.constant 0 : i32
    %c0_i32_0 = arith.constant 0 : i32
    %c0_i32_1 = arith.constant 0 : i32
    return %c0_i32, %c0_i32_0 : i32, i32
  }
  func.func @transform_3(%arg0: i32) -> (i32, i32) {
    %c0_i32 = arith.constant 0 : i32
    %c0_i32_0 = arith.constant 0 : i32
    %c0_i32_1 = arith.constant 0 : i32
    return %c0_i32, %c0_i32_0 : i32, i32
  }
  func.func @transform_4(%arg0: i32) -> (i32, i32, i32) {
    %c0_i32 = arith.constant 0 : i32
    %c0_i32_0 = arith.constant 0 : i32
    %c0_i32_1 = arith.constant 0 : i32
    return %arg0, %c0_i32, %c0_i32_0 : i32, i32, i32
  }
}

</mosaic_0001>

<bundles_post_ra>
// kernel: spatial_attention_pallas.1
= control target key start
LH: loop header
LB: loop body
LE: loop exit
PB: predicated region body
PF: predicated region fallthrough
CT: control target
= control target key end

     0   :  { %9 = vsyncpa [#allocation3], 0  ;;  %s4242_s0 = inlined_call_operand.vmem [shape: f32[2,4,256], index: 0, kind: input, shape index: {}]   ;;  %s4243_s1 = inlined_call_operand.vmem [shape: f32[98], index: 1, kind: input, shape index: {}]   ;;  %s4244_s2 = inlined_call_operand.vmem [shape: s32[1,256], index: 2, kind: input, shape index: {}]   ;;  %s4245_s3 = inlined_call_operand.vmem [shape: s32[1,256], index: 3, kind: input, shape index: {}]   ;;  %s4246_s4 = inlined_call_operand.vmem [shape: f32[2,4,256], index: 4, kind: output, shape index: {}]  }
   0x1   :  { %s18_s17 = sshll.u32 %s4243_s1, 4  ;;  %s19_s17 = int_to_ptr.vmem [resolvable:$true] %s18_s17 }
   0x2   :  { %s1839_s18 = scalar_lea.vmem %s19_s17, 16  ;;  %p1844_p1 = scmp.lt.s32.totalorder %s19_s17, %s19_s17 }
   0x3   :  { %p1840_p0 = scmp.ne.s32.totalorder %s19_s17, %s1839_s18  ;;  %p1845_p2 = scmp.lt.s32.totalorder %s1839_s18, %s1839_s18 }
   0x5   :  { %p1846_p3 = por %p1845_p2, %p1844_p1 }
   0x7   :  { %p1847_p4 = pnand %p1846_p3, %p1840_p0 }
   0x9   :  { %1850 = shalt.err (!%p1847_p4)
}
   0xa   :  { %s1853_s19 = smov [#allocation2]  }
   0xb   :  { %21 = dma.vmem_to_smem %s19_s17, 16, %s1853_s19, [#allocation3]  }
   0xc   :  { %1851 = dma.done.wait [#allocation3], 16  }
   0xd   :  { %1852 = vsyncadd [#allocation3], 4294967280 }
   0xe   :  { %29 = sfence }
   0xf   :  { %v30_v0 = vld [vmem:[%s4242_s0] sm:$0xff]  ;;  %v31_v1 = vld [vmem:[%s4242_s0 + $0x8] sm:$0xff]  ;;  %vm38_vm0 = vcmask 1043456   ;;  %vm160_vm1 = vcmask 1041409   ;;  %s1854_s1 = smov 16   ;;  %s1855_s24 = smov 112  }
  0x10   :  { %v72_v2 = vsel %vm38_vm0, %v30_v0, -inf  ;;  %v86_v3 = vsel %vm38_vm0, %v31_v1, -inf  ;;  %v39_v4 = vsel %vm38_vm0, %v30_v0, 0.0  ;;  %v53_v5 = vsel %vm38_vm0, %v31_v1, 0.0  ;;  %s1856_s25 = smov 127   ;;  %s1857_s26 = smov 1  }
  0x11   :  { %v73_v6 = vrot.slane %v72_v2, 4  ;;  %v87_v7 = vrot.slane %v86_v3, 4  ;;  %v40_v8 = vrot.slane %v39_v4, 4  ;;  %v54_v9 = vrot.slane %v53_v5, 4  ;;  %s2036_s30 = sld [smem:[#allocation2 + $0x19]]  ;;  %s2075_s6 = sld [smem:[#allocation2 + $0x4a]] }
  0x12   :  { %v1897_v10 = vcombine.high %v30_v0, %v30_v0  ;;  %v1899_v11 = vcombine.high %v31_v1, %v31_v1  ;;  %s1760_s5 = sld [smem:[#allocation2 + $0x49]]  ;;  %s2347_s7 = sld [smem:[#allocation2 + $0x17]] }
  0x13   :  { %v74_v12 = vmax.f32 %v72_v2, %v73_v6  ;;  %v88_v13 = vmax.f32 %v86_v3, %v87_v7  ;;  %v41_v14 = vadd.f32 %v40_v8, %v39_v4  ;;  %v55_v15 = vadd.f32 %v54_v9, %v53_v5  ;;  %v100_v5 = vld [vmem:[%s4244_s2] sm:$0x3]  ;;  %s1717_s8 = sld [smem:[#allocation2 + $0x16]]  ;;  %s1762_s9 = sld [smem:[#allocation2 + $0x4b]] }
  0x14   :  { %4354 = vst [vmem:[#allocation5_spill] sm:$0xff] %v1897_v10  ;;  %4355 = vst [vmem:[#allocation6_spill] sm:$0xff] %v1899_v11  ;;  %v79_v16 = vsel %vm38_vm0, %v1897_v10, -inf  ;;  %v93_v17 = vsel %vm38_vm0, %v1899_v11, -inf  ;;  %v46_v18 = vsel %vm38_vm0, %v1897_v10, 0.0  ;;  %v60_v19 = vsel %vm38_vm0, %v1899_v11, 0.0 }
  0x15   :  { %v75_v20 = vrot.slane %v74_v12, 2  ;;  %v89_v21 = vrot.slane %v88_v13, 2  ;;  %v42_v22 = vrot.slane %v41_v14, 2  ;;  %v56_v23 = vrot.slane %v55_v15, 2  ;;  %s1763_s10 = sld [smem:[#allocation2 + $0x4c]]  ;;  %s2684_s11 = sld [smem:[#allocation2 + $0x1a]] }
  0x16   :  { %v80_v24 = vrot.slane %v79_v16, 4  ;;  %v94_v25 = vrot.slane %v93_v17, 4  ;;  %v47_v26 = vrot.slane %v46_v18, 4  ;;  %v61_v27 = vrot.slane %v60_v19, 4  ;;  %s2708_s12 = sld [smem:[#allocation2 + $0x1b]]  ;;  %s2724_s13 = sld [smem:[#allocation2 + $0x15]] }
  0x17   :  { %v76_v28 = vmax.f32 %v74_v12, %v75_v20  ;;  %v90_v29 = vmax.f32 %v88_v13, %v89_v21  ;;  %v43_v30 = vadd.f32 %v42_v22, %v41_v14  ;;  %v57_v31 = vadd.f32 %v56_v23, %v55_v15  ;;  %s2739_s14 = sld [smem:[#allocation2 + $0x1e]]  ;;  %s2761_s15 = sld [smem:[#allocation2 + $0x1d]] }
  0x18   :  { %v81_v32 = vmax.f32 %v79_v16, %v80_v24  ;;  %v95_v33 = vmax.f32 %v93_v17, %v94_v25  ;;  %v48_v34 = vadd.f32 %v47_v26, %v46_v18  ;;  %v62_v35 = vadd.f32 %v61_v27, %v60_v19  ;;  %v101_v19 = vld [vmem:[%s4245_s3] sm:$0x3]  ;;  %s1712_s3 = sld [smem:[#allocation2 + $0x18]]  ;;  %s1745_s17 = sld [smem:[#allocation2 + $0xf]] }
  0x19   :  { %v77_v36 = vrot.slane %v76_v28, 1  ;;  %v91_v37 = vrot.slane %v90_v29, 1  ;;  %v44_v38 = vrot.slane %v43_v30, 1  ;;  %v58_v39 = vrot.slane %v57_v31, 1  ;;  %s1744_s16 = sld [smem:[#allocation2 + $0x10]]  ;;  %s3069_s18 = sld [smem:[#allocation2 + $0x51]] }
  0x1a   :  { %v82_v40 = vrot.slane %v81_v32, 2  ;;  %v96_v41 = vrot.slane %v95_v33, 2  ;;  %v49_v42 = vrot.slane %v48_v34, 2  ;;  %v63_v43 = vrot.slane %v62_v35, 2  ;;  %s1767_s19 = sld [smem:[#allocation2 + $0x50]]  ;;  %s3079_s20 = sld [smem:[#allocation2 + $0x42]] }
  0x1b   :  { %v1909_v44 = vmax.f32 %v76_v28, %v77_v36  ;;  %v1911_v45 = vmax.f32 %v90_v29, %v91_v37  ;;  %v45_v46 = vadd.f32 %v44_v38, %v43_v30  ;;  %v59_v47 = vadd.f32 %v58_v39, %v57_v31  ;;  %s3091_s21 = sld [smem:[#allocation2 + $0x43]]  ;;  %s3097_s22 = sld [smem:[#allocation2 + $0x52]] }
  0x1c   :  { %v83_v48 = vmax.f32 %v81_v32, %v82_v40  ;;  %v97_v49 = vmax.f32 %v95_v33, %v96_v41  ;;  %v50_v50 = vadd.f32 %v49_v42, %v48_v34  ;;  %v64_v51 = vadd.f32 %v63_v43, %v62_v35  ;;  %s3099_s23 = sld [smem:[#allocation2 + $0x53]]  ;;  %s1720_s27 = sld [smem:[#allocation2 + $0x20]] }
  0x1d   :  { %v1916_v52 = vsel %vm160_vm1, %v1911_v45, %v1909_v44  ;;  %v1918_v53 = vmul.f32 0.25, %v45_v46  ;;  %v1920_v54 = vmul.f32 0.25, %v59_v47  ;;  %v104_v4 = vlaneseq  ;;  %s1719_s28 = sld [smem:[#allocation2 + $0x1f]]  ;;  %s1721_s2 = sld [smem:[#allocation2 + $0x21]] }
  0x1e   :  { %1319 = vrot.lane.b32.xlu0 %v1916_v52, %s1854_s1  ;;  %1031 = vrot.lane.b32.xlu1 %v1916_v52, %s1855_s24  ;;  %v84_v55 = vrot.slane %v83_v48, 1  ;;  %v98_v56 = vrot.slane %v97_v49, 1  ;;  %v51_v57 = vrot.slane %v50_v50, 1  ;;  %v65_v58 = vrot.slane %v64_v51, 1  ;;  %s1722_s29 = sld [smem:[#allocation2 + $0x22]] }
  0x1f   :  { %v1929_v59 = vsel %vm160_vm1, %v1920_v54, %v1918_v53  ;;  %v105_v6 = vshrl.u32 %v104_v4, 7  ;;  %vm102_vm2 = vcmp.eq.s32.totalorder %v100_v5, 15  ;;  %v1858_v9 = vmov 0  }
  0x20   :  { %v1931_v60 = vmax.f32 %v83_v48, %v84_v55  ;;  %v1933_v61 = vmax.f32 %v97_v49, %v98_v56  ;;  %v52_v62 = vadd.f32 %v51_v57, %v50_v50  ;;  %v66_v63 = vadd.f32 %v65_v58, %v64_v51 }
  0x21   :  { %v1980_v7 = vsub.s32 0, %v105_v6  ;;  %v1982_v8 = vsub.s32 1, %v105_v6  ;;  %v103_v12 = vsel %vm102_vm2, 1, %v1858_v9  ;;  %vm114_vm3 = vcmp.eq.s32.totalorder %v100_v5, 0 }
  0x22   :  { %283 = vrot.lane.b32.xlu0 %v1929_v59, %s1855_s24  ;;  %v1940_v0 = vsel %vm160_vm1, %v1933_v61, %v1931_v60  ;;  %v1944_v1 = vmul.f32 0.25, %v52_v62  ;;  %v1946_v2 = vmul.f32 0.25, %v66_v63  ;;  %v1985_v13 = vand.u32 127, %v104_v4 }
  0x23   :  { %1033 = vrot.lane.b32.xlu1 %v1940_v0, %s1855_s24  ;;  %4356 = vst [vmem:[#allocation7_spill] sm:$0xff] %v1980_v7  ;;  %v107_v16 = vrot.slane %v103_v12, %v1980_v7  ;;  %v111_v17 = vrot.slane %v103_v12, %v1982_v8  ;;  %v115_v18 = vsel %vm114_vm3, 1, %v1858_v9  ;;  %vm126_vm7 = vcmp.eq.s32.totalorder %v101_v19, 15 }
  0x24   :  { %v1955_v3 = vsel %vm160_vm1, %v1946_v2, %v1944_v1  ;;  %vm287_vm4 = vcmp.lt.s32.totalorder %v1985_v13, 112  ;;  %v119_v23 = vrot.slane %v115_v18, %v1980_v7  ;;  %v123_v24 = vrot.slane %v115_v18, %v1982_v8 }
  0x25   :  { %vm1996_vm5 = vcmp.eq.s32.totalorder %v107_v16, 1  ;;  %vm2000_vm6 = vcmp.eq.s32.totalorder %v111_v17, 1  ;;  %vm576_vm8 = vcmp.lt.s32.totalorder %v1985_v13, 16  ;;  %v127_v33 = vsel %vm126_vm7, 1, %v1858_v9 }
  0x26   :  { %572 = vrot.lane.b32.xlu0 %v1929_v59, %s1854_s1  ;;  %vm2027_vm9 = vcmp.eq.s32.totalorder %v119_v23, 1  ;;  %vm2031_vm10 = vcmp.eq.s32.totalorder %v123_v24, 1  ;;  %v131_v39 = vrot.slane %v127_v33, %v1980_v7  ;;  %v135_v40 = vrot.slane %v127_v33, %v1982_v8 }
  0x27   :  { %1321 = vrot.lane.b32.xlu1 %v1940_v0, %s1854_s1  ;;  %vm171_vm11 = vcmp.lt.s32.totalorder %v1985_v13, 127  ;;  %v151_v43 = vstv %s1712_s3  ;;  %v177_v50 = vstv %s2036_s30  ;;  %vm138_vm14 = vcmp.eq.s32.totalorder %v101_v19, 0  ;;  %s3168_s3 = sld [smem:[#allocation2 + $0x1c]]  ;;  %s1730_s30 = sld [smem:[#allocation2 + $0x25]] }
  0x28   :  { %vm2061_vm12 = vcmp.eq.s32.totalorder %v131_v39, 1  ;;  %vm2065_vm13 = vcmp.eq.s32.totalorder %v135_v40, 1  ;;  %v153_v56 = vmul.f32 %v151_v43, %v1944_v1  ;;  %v152_v58 = vmul.f32 %v151_v43, %v1918_v53 }
  0x29   :  { %v155_v1 = vmul.f32 %v151_v43, %v1946_v2  ;;  %v154_v53 = vmul.f32 %v151_v43, %v1920_v54  ;;  %v139_v12 = vsel %vm138_vm14, 1, %v1858_v9  ;;  %v904_v16 = vstv %s1760_s5  ;;  %s1731_s5 = sld [smem:[#allocation2 + $0x24]] }
  0x2a   :  { %165 = vrot.lane.b32.xlu0 %v1929_v59, %s1856_s25  ;;  %v143_v54 = vrot.slane %v139_v12, %v1980_v7  ;;  %v926_v9 = vstv %s2075_s6  ;;  %v905_v33 = vmul.f32 %v904_v16, %v1909_v44  ;;  %v907_v44 = vmul.f32 %v904_v16, %v1911_v45  ;;  %s1741_s6 = sld [smem:[#allocation2 + $0x12]] }
  0x2b   :  { %574 = vrot.lane.b32.xlu1 %v1955_v3, %s1854_s1  ;;  %vm208_vm15 = vcmp.lt.s32.totalorder %v1985_v13, 1  ;;  %v226_v11 = vstv %s1717_s8  ;;  %s3285_s8 = sld [smem:[#allocation2 + $0x13]] }
  0x2c   :  { %vm2141_vm0 = vcmp.eq.s32.totalorder %v143_v54, 1 }
  0x2e   :  { %285 = vrot.lane.b32.xlu0 %v1955_v3, %s1855_s24 }
  0x2f   :  { %167 = vrot.lane.b32.xlu1 %v1955_v3, %s1856_s25 }
  0x32   :  { %204 = vrot.lane.b32.xlu0 %v1929_v59, %s1857_s26 }
  0x33   :  { %206 = vrot.lane.b32.xlu1 %v1955_v3, %s1857_s26 }
  0x36   :  { %919 = vrot.lane.b32.xlu0 %v1940_v0, %s1856_s25 }
  0x37   :  { %917 = vrot.lane.b32.xlu1 %v1916_v52, %s1856_s25 }
  0x3a   :  { %955 = vrot.lane.b32.xlu0 %v1940_v0, %s1857_s26 }
  0x3b   :  { %953 = vrot.lane.b32.xlu1 %v1916_v52, %s1857_s26 }
  0x90   :  { %v1320_v14 = vpop.permute.xlu0 %1319  ;;  %v1032_v15 = vpop.permute.xlu1 %1031 }
  0x94   :  { %v1994_v20 = vpop.permute.xlu0 %283 }
  0x95   :  { %v1034_v25 = vpop.permute.xlu1 %1033 }
  0x96   :  { %v1035_v26 = vsel %vm287_vm4, %v1032_v15, %v1034_v25  ;;  %v1036_v27 = vsel %vm287_vm4, %v1034_v25, %v1032_v15 }
  0x97   :  { %v2014_v28 = vsel %vm1996_vm5, %v1916_v52, %v1035_v26  ;;  %v2019_v29 = vsel %vm2000_vm6, %v1940_v0, %v1036_v27  ;;  %v906_v27 = vmul.f32 %v904_v16, %v1931_v60 }
  0x98   :  { %4361 = vst [vmem:[#allocation8_spill] sm:$0xff] %v2014_v28  ;;  %4362 = vst [vmem:[#allocation9_spill] sm:$0xff] %v2019_v29  ;;  %1127 = vrot.lane.b32.xlu1 %v2014_v28, %s1855_s24  ;;  %1129 = vrot.lane.b32.xlu0 %v2019_v29, %s1855_s24  ;;  %v2025_v30 = vpop.permute.xlu0 %572 }
  0x99   :  { %v1322_v34 = vpop.permute.xlu1 %1321 }
  0x9a   :  { %v1323_v35 = vsel %vm576_vm8, %v1320_v14, %v1322_v34  ;;  %v1324_v36 = vsel %vm576_vm8, %v1322_v34, %v1320_v14  ;;  %v147_v34 = vrot.slane %v139_v12, %v1982_v8 }
  0x9b   :  { %v2045_v37 = vsel %vm2027_vm9, %v1916_v52, %v1324_v36  ;;  %v2050_v38 = vsel %vm2031_vm10, %v1940_v0, %v1323_v35  ;;  %v908_v35 = vmul.f32 %v904_v16, %v1933_v61 }
  0x9c   :  { %4367 = vst [vmem:[#allocation10_spill] sm:$0xff] %v2045_v37  ;;  %4368 = vst [vmem:[#allocation11_spill] sm:$0xff] %v2050_v38  ;;  %1415 = vrot.lane.b32.xlu1 %v2045_v37, %s1854_s1  ;;  %1417 = vrot.lane.b32.xlu0 %v2050_v38, %s1854_s1  ;;  %v166_v41 = vpop.permute.xlu0 %165  ;;  %vm2145_vm1 = vcmp.eq.s32.totalorder %v147_v34, 1 }
  0x9d   :  { %v2058_v42 = vpop.permute.xlu1 %574 }
  0xa0   :  { %1043 = vrot.lane.b32.xlu1 %v2014_v28, %s1856_s25  ;;  %1045 = vrot.lane.b32.xlu0 %v2019_v29, %s1856_s25  ;;  %v2073_v48 = vpop.permute.xlu0 %285 }
  0xa1   :  { %v168_v49 = vpop.permute.xlu1 %167 }
  0xa2   :  { %v172_v51 = vsel %vm171_vm11, %v166_v41, %v168_v49  ;;  %v173_v55 = vsel %vm171_vm11, %v168_v49, %v166_v41 }
  0xa3   :  { %v175_v57 = vsel %vm2065_vm13, %v1955_v3, %v173_v55  ;;  %v174_v62 = vsel %vm2061_vm12, %v1929_v59, %v172_v51 }
  0xa4   :  { %1331 = vrot.lane.b32.xlu1 %v2045_v37, %s1856_s25  ;;  %1333 = vrot.lane.b32.xlu0 %v2050_v38, %s1856_s25  ;;  %v2094_v63 = vpop.permute.xlu0 %204  ;;  %v179_v4 = vmul.f32 %v177_v50, %v175_v57  ;;  %v178_v5 = vmul.f32 %v177_v50, %v174_v62 }
  0xa5   :  { %v207_v6 = vpop.permute.xlu1 %206 }
  0xa6   :  { %v244_v14 = vrot.slane %v179_v4, 1  ;;  %v2099_v15 = vadd.f32 %v179_v4, %v153_v56  ;;  %v243_v17 = vrot.slane %v178_v5, 1  ;;  %v2101_v18 = vadd.f32 %v178_v5, %v152_v58 }
  0xa7   :  { %v210_v12 = vsel %vm208_vm15, %v207_v6, %v2094_v63 }
  0xa8   :  { %1079 = vrot.lane.b32.xlu1 %v2014_v28, %s1857_s26  ;;  %1081 = vrot.lane.b32.xlu0 %v2019_v29, %s1857_s26  ;;  %v920_v2 = vpop.permute.xlu0 %919  ;;  %v2107_v19 = vadd.f32 %v244_v14, %v155_v1  ;;  %v2111_v24 = vadd.f32 %v243_v17, %v154_v53  ;;  %v288_v53 = vsel %vm287_vm4, %v1994_v20, %v2073_v48 }
  0xa9   :  { %v918_v23 = vpop.permute.xlu1 %917  ;;  %v2181_v14 = vsel %vm1996_vm5, %v1929_v59, %v288_v53  ;;  %v2186_v16 = vsel %vm2141_vm0, %v1929_v59, %v210_v12  ;;  %v578_v17 = vsel %vm576_vm8, %v2058_v42, %v2025_v30 }
  0xaa   :  { %v921_v25 = vsel %vm171_vm11, %v918_v23, %v920_v2  ;;  %v922_v26 = vsel %vm171_vm11, %v920_v2, %v918_v23 }
  0xab   :  { %v924_v36 = vsel %vm2065_vm13, %v1940_v0, %v922_v26  ;;  %v923_v39 = vsel %vm2061_vm12, %v1916_v52, %v921_v25 }
  0xac   :  { %1367 = vrot.lane.b32.xlu1 %v2045_v37, %s1857_s26  ;;  %1369 = vrot.lane.b32.xlu0 %v2050_v38, %s1857_s26  ;;  %v928_v60 = vmul.f32 %v926_v9, %v924_v36  ;;  %v927_v8 = vmul.f32 %v926_v9, %v923_v39  ;;  %v956_v40 = vpop.permute.xlu0 %955 }
  0xad   :  { %v954_v61 = vpop.permute.xlu1 %953 }
  0xae   :  { %v992_v41 = vrot.slane %v928_v60, 1  ;;  %v2133_v43 = vadd.f32 %v928_v60, %v906_v27  ;;  %v991_v49 = vrot.slane %v927_v8, 1  ;;  %v2135_v50 = vadd.f32 %v927_v8, %v905_v33 }
  0xaf   :  { %v957_v51 = vsel %vm208_vm15, %v954_v61, %v956_v40  ;;  %v958_v55 = vsel %vm208_vm15, %v956_v40, %v954_v61 }
  0xb0   :  { %931 = vrot.lane.b32.xlu0 %v924_v36, %s1856_s25  ;;  %v2150_v58 = vadd.f32 %v992_v41, %v908_v35  ;;  %929 = vrot.lane.b32.xlu1 %v923_v39, %s1856_s25  ;;  %v2153_v1 = vadd.f32 %v991_v49, %v907_v44  ;;  %v2158_v4 = vsel %vm2141_vm0, %v1916_v52, %v958_v55 }
  0xb1   :  { %4377 = vst [vmem:[#allocation12_spill] sm:$0xff] %v2158_v4  ;;  %v2163_v5 = vsel %vm2145_vm1, %v1940_v0, %v957_v51 }
  0xb2   :  { %4378 = vst [vmem:[#allocation13_spill] sm:$0xff] %v2163_v5 }
  0xb4   :  { %965 = vrot.lane.b32.xlu1 %v2158_v4, %s1857_s26  ;;  %967 = vrot.lane.b32.xlu0 %v2163_v5, %s1857_s26 }
  0xb8   :  { %182 = vrot.lane.b32.xlu1 %v175_v57, %s1856_s25  ;;  %180 = vrot.lane.b32.xlu0 %v174_v62, %s1856_s25  ;;  %v289_v57 = vsel %vm287_vm4, %v2073_v48, %v1994_v20  ;;  %v2203_v62 = vsel %vm2027_vm9, %v1929_v59, %v578_v17  ;;  %v577_v20 = vsel %vm576_vm8, %v2025_v30, %v2058_v42 }
  0xb9   :  { %v2208_v2 = vsel %vm2000_vm6, %v1955_v3, %v289_v57  ;;  %v209_v48 = vsel %vm208_vm15, %v2094_v63, %v207_v6  ;;  %v2224_v54 = vsel %vm2031_vm10, %v1955_v3, %v577_v20 }
  0xba   :  { %v2229_v23 = vsel %vm2145_vm1, %v1955_v3, %v209_v48 }
  0xbc   :  { %380 = vrot.lane.b32.xlu1 %v2181_v14, %s1855_s24  ;;  %217 = vrot.lane.b32.xlu0 %v2186_v16, %s1857_s26 }
  0xc0   :  { %669 = vrot.lane.b32.xlu1 %v2203_v62, %s1854_s1  ;;  %382 = vrot.lane.b32.xlu0 %v2208_v2, %s1855_s24 }
  0xc4   :  { %219 = vrot.lane.b32.xlu1 %v2229_v23, %s1857_s26  ;;  %671 = vrot.lane.b32.xlu0 %v2224_v54, %s1854_s1 }
  0xc8   :  { %298 = vrot.lane.b32.xlu1 %v2208_v2, %s1856_s25  ;;  %296 = vrot.lane.b32.xlu0 %v2181_v14, %s1856_s25 }
  0xcc   :  { %334 = vrot.lane.b32.xlu1 %v2208_v2, %s1857_s26  ;;  %332 = vrot.lane.b32.xlu0 %v2181_v14, %s1857_s26 }
  0xd0   :  { %587 = vrot.lane.b32.xlu1 %v2224_v54, %s1856_s25  ;;  %585 = vrot.lane.b32.xlu0 %v2203_v62, %s1856_s25 }
  0xd4   :  { %621 = vrot.lane.b32.xlu1 %v2203_v62, %s1857_s26  ;;  %623 = vrot.lane.b32.xlu0 %v2224_v54, %s1857_s26 }
 0x10a   :  { %v1128_v30 = vpop.permute.xlu1 %1127  ;;  %v1130_v42 = vpop.permute.xlu0 %1129 }
 0x10b   :  { %v1131_v63 = vsel %vm287_vm4, %v1128_v30, %v1130_v42  ;;  %v1132_v6 = vsel %vm287_vm4, %v1130_v42, %v1128_v30 }
 0x10c   :  { %v2258_v9 = vsel %vm1996_vm5, %v1916_v52, %v1131_v63  ;;  %v2263_v25 = vsel %vm2000_vm6, %v1940_v0, %v1132_v6 }
 0x10d   :  { %4379 = vst [vmem:[#allocation14_spill] sm:$0xff] %v2258_v9  ;;  %4380 = vst [vmem:[#allocation15_spill] sm:$0xff] %v2263_v25  ;;  %1225 = vrot.lane.b32.xlu0 %v2263_v25, %s1855_s24  ;;  %1223 = vrot.lane.b32.xlu1 %v2258_v9, %s1855_s24 }
 0x10e   :  { %v1416_v26 = vpop.permute.xlu1 %1415  ;;  %v1418_v27 = vpop.permute.xlu0 %1417 }
 0x10f   :  { %v1419_v33 = vsel %vm576_vm8, %v1416_v26, %v1418_v27  ;;  %v1420_v34 = vsel %vm576_vm8, %v1418_v27, %v1416_v26 }
 0x110   :  { %v2276_v35 = vsel %vm2027_vm9, %v1916_v52, %v1420_v34  ;;  %v2281_v36 = vsel %vm2031_vm10, %v1940_v0, %v1419_v33 }
 0x111   :  { %4381 = vst [vmem:[#allocation16_spill] sm:$0xff] %v2276_v35  ;;  %4382 = vst [vmem:[#allocation17_spill] sm:$0xff] %v2281_v36  ;;  %1511 = vrot.lane.b32.xlu1 %v2276_v35, %s1854_s1  ;;  %1513 = vrot.lane.b32.xlu0 %v2281_v36, %s1854_s1 }
 0x112   :  { %v1044_v39 = vpop.permute.xlu1 %1043  ;;  %v1046_v60 = vpop.permute.xlu0 %1045 }
 0x113   :  { %v1047_v51 = vsel %vm171_vm11, %v1044_v39, %v1046_v60  ;;  %v1048_v55 = vsel %vm171_vm11, %v1046_v60, %v1044_v39 }
 0x114   :  { %v2310_v17 = vsel %vm2065_vm13, %v2019_v29, %v1048_v55  ;;  %v2315_v57 = vsel %vm2061_vm12, %v2014_v28, %v1047_v51 }
 0x115   :  { %1139 = vrot.lane.b32.xlu1 %v2258_v9, %s1856_s25  ;;  %1141 = vrot.lane.b32.xlu0 %v2263_v25, %s1856_s25  ;;  %4383 = vst [vmem:[#allocation18_spill] sm:$0xff] %v2315_v57 }
 0x116   :  { %v1332_v44 = vpop.permute.xlu1 %1331  ;;  %v1334_v8 = vpop.permute.xlu0 %1333 }
 0x117   :  { %v1335_v20 = vsel %vm171_vm11, %v1332_v44, %v1334_v8  ;;  %v1336_v48 = vsel %vm171_vm11, %v1334_v8, %v1332_v44 }
 0x118   :  { %v2332_v63 = vsel %vm2065_vm13, %v2050_v38, %v1336_v48  ;;  %v2337_v6 = vsel %vm2061_vm12, %v2045_v37, %v1335_v20 }
 0x119   :  { %1427 = vrot.lane.b32.xlu1 %v2276_v35, %s1856_s25  ;;  %1429 = vrot.lane.b32.xlu0 %v2281_v36, %s1856_s25  ;;  %4386 = vst [vmem:[#allocation21_spill] sm:$0xff] %v2332_v63  ;;  %4387 = vst [vmem:[#allocation22_spill] sm:$0xff] %v2337_v6 }
 0x11a   :  { %v1080_v40 = vpop.permute.xlu1 %1079  ;;  %v1082_v61 = vpop.permute.xlu0 %1081 }
 0x11b   :  { %v1083_v26 = vsel %vm208_vm15, %v1080_v40, %v1082_v61  ;;  %v1084_v27 = vsel %vm208_vm15, %v1082_v61, %v1080_v40 }
 0x11c   :  { %v2352_v39 = vsel %vm2141_vm0, %v2014_v28, %v1084_v27  ;;  %v2357_v60 = vsel %vm2145_vm1, %v2019_v29, %v1083_v26  ;;  %v214_v26 = vstv %s2347_s7  ;;  %s3283_s7 = sld [smem:[#allocation2 + $0x11]] }
 0x11d   :  { %1175 = vrot.lane.b32.xlu1 %v2258_v9, %s1857_s26  ;;  %1177 = vrot.lane.b32.xlu0 %v2263_v25, %s1857_s26  ;;  %4388 = vst [vmem:[#allocation23_spill] sm:$0xff] %v2352_v39  ;;  %4389 = vst [vmem:[#allocation24_spill] sm:$0xff] %v2357_v60  ;;  %v215_v10 = vmul.f32 %v214_v26, %v2186_v16 }
 0x11e   :  { %v1368_v41 = vpop.permute.xlu1 %1367  ;;  %v1370_v49 = vpop.permute.xlu0 %1369 }
 0x11f   :  { %v1371_v44 = vsel %vm208_vm15, %v1368_v41, %v1370_v49  ;;  %v1372_v8 = vsel %vm208_vm15, %v1370_v49, %v1368_v41 }
 0x120   :  { %v2370_v51 = vsel %vm2141_vm0, %v2045_v37, %v1372_v8  ;;  %v2375_v55 = vsel %vm2145_vm1, %v2050_v38, %v1371_v44 }
 0x121   :  { %1463 = vrot.lane.b32.xlu1 %v2276_v35, %s1857_s26  ;;  %1465 = vrot.lane.b32.xlu0 %v2281_v36, %s1857_s26  ;;  %4390 = vst [vmem:[#allocation25_spill] sm:$0xff] %v2370_v51  ;;  %4391 = vst [vmem:[#allocation26_spill] sm:$0xff] %v2375_v55 }
 0x122   :  { %v930_v53 = vpop.permute.xlu1 %929  ;;  %v932_v12 = vpop.permute.xlu0 %931 }
 0x123   :  { %v933_v41 = vsel %vm171_vm11, %v930_v53, %v932_v12  ;;  %v934_v49 = vsel %vm171_vm11, %v932_v12, %v930_v53 }
 0x124   :  { %v2389_v27 = vsel %vm2065_vm13, %v1940_v0, %v934_v49  ;;  %v2394_v44 = vsel %vm2061_vm12, %v1916_v52, %v933_v41 }
 0x125   :  { %1057 = vrot.lane.b32.xlu0 %v2310_v17, %s1856_s25  ;;  %1055 = vrot.lane.b32.xlu1 %v2315_v57, %s1856_s25 }
 0x126   :  { %v2325_v30 = vpop.permute.xlu1 %965  ;;  %v2327_v42 = vpop.permute.xlu0 %967 }
 0x127   :  { %4384 = vst [vmem:[#allocation19_spill] sm:$0xff] %v2325_v30  ;;  %4385 = vst [vmem:[#allocation20_spill] sm:$0xff] %v2327_v42 }
 0x129   :  { %1345 = vrot.lane.b32.xlu0 %v2332_v63, %s1856_s25  ;;  %1343 = vrot.lane.b32.xlu1 %v2337_v6, %s1856_s25 }
 0x12a   :  { %v183_v33 = vpop.permute.xlu1 %182  ;;  %v181_v34 = vpop.permute.xlu0 %180 }
 0x12b   :  { %v184_v53 = vsel %vm171_vm11, %v181_v34, %v183_v33  ;;  %v185_v12 = vsel %vm171_vm11, %v183_v33, %v181_v34 }
 0x12c   :  { %v2412_v33 = vsel %vm2065_vm13, %v1955_v3, %v185_v12  ;;  %v2417_v34 = vsel %vm2061_vm12, %v1929_v59, %v184_v53 }
 0x12d   :  { %1091 = vrot.lane.b32.xlu1 %v2352_v39, %s1857_s26  ;;  %1093 = vrot.lane.b32.xlu0 %v2357_v60, %s1857_s26 }
 0x12e   :  { %v381_v40 = vpop.permute.xlu1 %380  ;;  %v218_v61 = vpop.permute.xlu0 %217 }
 0x131   :  { %1379 = vrot.lane.b32.xlu1 %v2370_v51, %s1857_s26  ;;  %1381 = vrot.lane.b32.xlu0 %v2375_v55, %s1857_s26 }
 0x132   :  { %v670_v20 = vpop.permute.xlu1 %669  ;;  %v383_v48 = vpop.permute.xlu0 %382 }
 0x135   :  { %943 = vrot.lane.b32.xlu1 %v2389_v27, %s1856_s25  ;;  %941 = vrot.lane.b32.xlu0 %v2394_v44, %s1856_s25 }
 0x136   :  { %v220_v8 = vpop.permute.xlu1 %219  ;;  %v672_v49 = vpop.permute.xlu0 %671 }
 0x137   :  { %v221_v41 = vsel %vm208_vm15, %v218_v61, %v220_v8  ;;  %v222_v7 = vsel %vm208_vm15, %v220_v8, %v218_v61  ;;  %v216_v61 = vmul.f32 %v214_v26, %v2229_v23 }
 0x138   :  { %v223_v16 = vsel %vm2141_vm0, %v1929_v59, %v222_v7  ;;  %v224_v55 = vsel %vm2145_vm1, %v1955_v3, %v221_v41 }
 0x139   :  { %194 = vrot.lane.b32.xlu1 %v2412_v33, %s1856_s25  ;;  %192 = vrot.lane.b32.xlu0 %v2417_v34, %s1856_s25  ;;  %v227_v12 = vmul.f32 %v226_v11, %v223_v16  ;;  %v228_v8 = vmul.f32 %v226_v11, %v224_v55 }
 0x13a   :  { %v299_v53 = vpop.permute.xlu1 %298  ;;  %v297_v51 = vpop.permute.xlu0 %296 }
 0x13b   :  { %v2430_v60 = vadd.f32 %v227_v12, %v215_v10  ;;  %v2432_v39 = vadd.f32 %v228_v8, %v216_v61  ;;  %v300_v7 = vsel %vm171_vm11, %v297_v51, %v299_v53  ;;  %v301_v23 = vsel %vm171_vm11, %v299_v53, %v297_v51 }
 0x13c   :  { %v2443_v11 = vsel %vm2065_vm13, %v2208_v2, %v301_v23  ;;  %v2448_v10 = vsel %vm2061_vm12, %v2181_v14, %v300_v7  ;;  %v384_v12 = vsel %vm287_vm4, %v381_v40, %v383_v48  ;;  %v385_v8 = vsel %vm287_vm4, %v383_v48, %v381_v40 }
 0x13d   :  { %229 = vrot.lane.b32.xlu0 %v223_v16, %s1857_s26  ;;  %231 = vrot.lane.b32.xlu1 %v224_v55, %s1857_s26  ;;  %4392 = vst [vmem:[#allocation27_spill] sm:$0xff] %v2443_v11  ;;  %4393 = vst [vmem:[#allocation28_spill] sm:$0xff] %v2448_v10  ;;  %v2479_v53 = vsel %vm1996_vm5, %v1929_v59, %v384_v12  ;;  %v2484_v7 = vsel %vm2000_vm6, %v1955_v3, %v385_v8 }
 0x13e   :  { %v335_v26 = vpop.permute.xlu1 %334  ;;  %v333_v41 = vpop.permute.xlu0 %332  ;;  %v674_v40 = vsel %vm576_vm8, %v672_v49, %v670_v20  ;;  %v673_v23 = vsel %vm576_vm8, %v670_v20, %v672_v49 }
 0x13f   :  { %v336_v61 = vsel %vm208_vm15, %v333_v41, %v335_v26  ;;  %v337_v51 = vsel %vm208_vm15, %v335_v26, %v333_v41  ;;  %v2499_v48 = vsel %vm2027_vm9, %v1929_v59, %v674_v40 }
 0x140   :  { %v2461_v55 = vsel %vm2141_vm0, %v2181_v14, %v337_v51  ;;  %v2466_v16 = vsel %vm2145_vm1, %v2208_v2, %v336_v61  ;;  %4394 = vst [vmem:[#allocation29_spill] sm:$0xff] %v2499_v48  ;;  %v2510_v61 = vsel %vm2031_vm10, %v1955_v3, %v673_v23 }
 0x141   :  { %310 = vrot.lane.b32.xlu1 %v2443_v11, %s1856_s25  ;;  %308 = vrot.lane.b32.xlu0 %v2448_v10, %s1856_s25  ;;  %4395 = vst [vmem:[#allocation30_spill] sm:$0xff] %v2510_v61 }
 0x142   :  { %v588_v26 = vpop.permute.xlu1 %587  ;;  %v586_v41 = vpop.permute.xlu0 %585 }
 0x143   :  { %v589_v51 = vsel %vm171_vm11, %v586_v41, %v588_v26  ;;  %v590_v12 = vsel %vm171_vm11, %v588_v26, %v586_v41 }
 0x144   :  { %v2523_v20 = vsel %vm2065_vm13, %v2224_v54, %v590_v12  ;;  %v2528_v49 = vsel %vm2061_vm12, %v2203_v62, %v589_v51 }
 0x145   :  { %344 = vrot.lane.b32.xlu0 %v2461_v55, %s1857_s26  ;;  %346 = vrot.lane.b32.xlu1 %v2466_v16, %s1857_s26  ;;  %4396 = vst [vmem:[#allocation31_spill] sm:$0xff] %v2523_v20  ;;  %4397 = vst [vmem:[#allocation32_spill] sm:$0xff] %v2528_v49 }
 0x146   :  { %v622_v8 = vpop.permute.xlu1 %621  ;;  %v624_v40 = vpop.permute.xlu0 %623 }
 0x147   :  { %v625_v23 = vsel %vm208_vm15, %v622_v8, %v624_v40  ;;  %v626_v26 = vsel %vm208_vm15, %v624_v40, %v622_v8 }
 0x148   :  { %v2549_v41 = vsel %vm2141_vm0, %v2203_v62, %v626_v26  ;;  %v2554_v51 = vsel %vm2145_vm1, %v2224_v54, %v625_v23 }
 0x149   :  { %392 = vrot.lane.b32.xlu0 %v2479_v53, %s1856_s25  ;;  %394 = vrot.lane.b32.xlu1 %v2484_v7, %s1856_s25 }
 0x14d   :  { %428 = vrot.lane.b32.xlu0 %v2479_v53, %s1857_s26  ;;  %476 = vrot.lane.b32.xlu1 %v2479_v53, %s1855_s24 }
 0x151   :  { %478 = vrot.lane.b32.xlu0 %v2484_v7, %s1855_s24  ;;  %765 = vrot.lane.b32.xlu1 %v2499_v48, %s1854_s1  ;;  %s3112_s24 = sld [smem:[#allocation2 + $0x45]] }
 0x155   :  { %767 = vrot.lane.b32.xlu0 %v2510_v61, %s1854_s1  ;;  %430 = vrot.lane.b32.xlu1 %v2484_v7, %s1857_s26  ;;  %s3109_s1 = sld [smem:[#allocation2 + $0x44]] }
 0x159   :  { %599 = vrot.lane.b32.xlu1 %v2523_v20, %s1856_s25  ;;  %597 = vrot.lane.b32.xlu0 %v2528_v49, %s1856_s25 }
 0x15d   :  { %681 = vrot.lane.b32.xlu1 %v2499_v48, %s1856_s25  ;;  %683 = vrot.lane.b32.xlu0 %v2510_v61, %s1856_s25 }
 0x161   :  { %717 = vrot.lane.b32.xlu1 %v2499_v48, %s1857_s26  ;;  %719 = vrot.lane.b32.xlu0 %v2510_v61, %s1857_s26 }
 0x165   :  { %633 = vrot.lane.b32.xlu1 %v2549_v41, %s1857_s26  ;;  %635 = vrot.lane.b32.xlu0 %v2554_v51, %s1857_s26 }
 0x17f   :  { %v1224_v12 = vpop.permute.xlu1 %1223  ;;  %v1226_v8 = vpop.permute.xlu0 %1225 }
 0x180   :  { %v1227_v40 = vsel %vm287_vm4, %v1224_v12, %v1226_v8  ;;  %v1228_v26 = vsel %vm287_vm4, %v1226_v8, %v1224_v12 }
 0x181   :  { %v2567_v5 = vsel %vm1996_vm5, %v1916_v52, %v1227_v40  ;;  %v2572_v23 = vsel %vm2000_vm6, %v1940_v0, %v1228_v26 }
 0x182   :  { %4398 = vst [vmem:[#allocation33_spill] sm:$0xff] %v2567_v5  ;;  %4399 = vst [vmem:[#allocation34_spill] sm:$0xff] %v2572_v23  ;;  %1237 = vrot.lane.b32.xlu0 %v2572_v23, %s1856_s25  ;;  %1235 = vrot.lane.b32.xlu1 %v2567_v5, %s1856_s25 }
 0x183   :  { %v1512_v4 = vpop.permute.xlu1 %1511  ;;  %v1514_v49 = vpop.permute.xlu0 %1513 }
 0x184   :  { %v1515_v12 = vsel %vm576_vm8, %v1512_v4, %v1514_v49  ;;  %v1516_v8 = vsel %vm576_vm8, %v1514_v49, %v1512_v4 }
 0x185   :  { %v2589_v20 = vsel %vm2027_vm9, %v1916_v52, %v1516_v8  ;;  %v2594_v30 = vsel %vm2031_vm10, %v1940_v0, %v1515_v12 }
 0x186   :  { %1273 = vrot.lane.b32.xlu0 %v2572_v23, %s1857_s26  ;;  %1271 = vrot.lane.b32.xlu1 %v2567_v5, %s1857_s26  ;;  %4400 = vst [vmem:[#allocation35_spill] sm:$0xff] %v2589_v20  ;;  %4401 = vst [vmem:[#allocation36_spill] sm:$0xff] %v2594_v30 }
 0x187   :  { %v1140_v40 = vpop.permute.xlu1 %1139  ;;  %v1142_v26 = vpop.permute.xlu0 %1141 }
 0x188   :  { %v1143_v42 = vsel %vm171_vm11, %v1140_v40, %v1142_v26  ;;  %v1144_v8 = vsel %vm171_vm11, %v1142_v26, %v1140_v40 }
 0x189   :  { %v2611_v11 = vsel %vm2065_vm13, %v2263_v25, %v1144_v8  ;;  %v2616_v6 = vsel %vm2061_vm12, %v2258_v9, %v1143_v42 }
 0x18a   :  { %1523 = vrot.lane.b32.xlu1 %v2589_v20, %s1856_s25  ;;  %1525 = vrot.lane.b32.xlu0 %v2594_v30, %s1856_s25  ;;  %4402 = vst [vmem:[#allocation37_spill] sm:$0xff] %v2611_v11  ;;  %4403 = vst [vmem:[#allocation38_spill] sm:$0xff] %v2616_v6 }
 0x18b   :  { %v1428_v4 = vpop.permute.xlu1 %1427  ;;  %v1430_v49 = vpop.permute.xlu0 %1429 }
 0x18c   :  { %v1431_v40 = vsel %vm171_vm11, %v1428_v4, %v1430_v49  ;;  %v1432_v26 = vsel %vm171_vm11, %v1430_v49, %v1428_v4 }
 0x18d   :  { %v2629_v57 = vsel %vm2065_vm13, %v2281_v36, %v1432_v26  ;;  %v2634_v42 = vsel %vm2061_vm12, %v2276_v35, %v1431_v40 }
 0x18e   :  { %1559 = vrot.lane.b32.xlu1 %v2589_v20, %s1857_s26  ;;  %1561 = vrot.lane.b32.xlu0 %v2594_v30, %s1857_s26  ;;  %4404 = vst [vmem:[#allocation39_spill] sm:$0xff] %v2629_v57  ;;  %4405 = vst [vmem:[#allocation40_spill] sm:$0xff] %v2634_v42 }
 0x18f   :  { %v1176_v12 = vpop.permute.xlu1 %1175  ;;  %v1178_v10 = vpop.permute.xlu0 %1177 }
 0x190   :  { %v1179_v4 = vsel %vm208_vm15, %v1176_v12, %v1178_v10  ;;  %v1180_v49 = vsel %vm208_vm15, %v1178_v10, %v1176_v12 }
 0x191   :  { %v2652_v40 = vsel %vm2145_vm1, %v2263_v25, %v1179_v4 }
 0x192   :  { %1153 = vrot.lane.b32.xlu0 %v2611_v11, %s1856_s25  ;;  %1151 = vrot.lane.b32.xlu1 %v2616_v6, %s1856_s25  ;;  %v2647_v11 = vsel %vm2141_vm0, %v2258_v9, %v1180_v49  ;;  %4407 = vst [vmem:[#allocation42_spill] sm:$0xff] %v2652_v40 }
 0x193   :  { %v1464_v63 = vpop.permute.xlu1 %1463  ;;  %v1466_v8 = vpop.permute.xlu0 %1465  ;;  %4406 = vst [vmem:[#allocation41_spill] sm:$0xff] %v2647_v11 }
 0x194   :  { %v1467_v10 = vsel %vm208_vm15, %v1464_v63, %v1466_v8  ;;  %v1468_v12 = vsel %vm208_vm15, %v1466_v8, %v1464_v63 }
 0x195   :  { %v2670_v4 = vsel %vm2145_vm1, %v2281_v36, %v1467_v10 }
 0x196   :  { %1441 = vrot.lane.b32.xlu0 %v2629_v57, %s1856_s25  ;;  %1439 = vrot.lane.b32.xlu1 %v2634_v42, %s1856_s25  ;;  %v2665_v57 = vsel %vm2141_vm0, %v2276_v35, %v1468_v12  ;;  %4409 = vst [vmem:[#allocation44_spill] sm:$0xff] %v2670_v4 }
 0x197   :  { %v1056_v6 = vpop.permute.xlu1 %1055  ;;  %v1058_v26 = vpop.permute.xlu0 %1057  ;;  %4408 = vst [vmem:[#allocation43_spill] sm:$0xff] %v2665_v57 }
 0x198   :  { %v1059_v63 = vsel %vm171_vm11, %v1056_v6, %v1058_v26  ;;  %v1060_v8 = vsel %vm171_vm11, %v1058_v26, %v1056_v6 }
 0x199   :  { %v2689_v10 = vsel %vm2065_vm13, %v2019_v29, %v1060_v8  ;;  %v2694_v6 = vsel %vm2061_vm12, %v2014_v28, %v1059_v63  ;;  %v201_v28 = vstv %s2708_s12  ;;  %s3355_s12 = sld [smem:[#allocation2 + $0xe]] }
 0x19a   :  { %1187 = vrot.lane.b32.xlu1 %v2647_v11, %s1857_s26  ;;  %1189 = vrot.lane.b32.xlu0 %v2652_v40, %s1857_s26  ;;  %4412 = vst [vmem:[#allocation47_spill] sm:$0xff] %v2689_v10  ;;  %4413 = vst [vmem:[#allocation48_spill] sm:$0xff] %v2694_v6 }
 0x19b   :  { %v1344_v42 = vpop.permute.xlu1 %1343  ;;  %v1346_v49 = vpop.permute.xlu0 %1345 }
 0x19c   :  { %v1347_v26 = vsel %vm171_vm11, %v1344_v42, %v1346_v49 }
 0x19e   :  { %1475 = vrot.lane.b32.xlu1 %v2665_v57, %s1857_s26  ;;  %1477 = vrot.lane.b32.xlu0 %v2670_v4, %s1857_s26  ;;  %v1348_v4 = vsel %vm171_vm11, %v1346_v49, %v1344_v42  ;;  %v2718_v42 = vsel %vm2061_vm12, %v2045_v37, %v1347_v26  ;;  %v938_v49 = vstv %s1762_s9  ;;  %s3287_s9 = sld [smem:[#allocation2 + $0x9]] }
 0x19f   :  { %v2680_v12 = vpop.permute.xlu1 %1091  ;;  %v2682_v40 = vpop.permute.xlu0 %1093  ;;  %v2713_v63 = vsel %vm2065_vm13, %v2050_v38, %v1348_v4  ;;  %4417 = vst [vmem:[#allocation52_spill] sm:$0xff] %v2718_v42 }
 0x1a0   :  { %4410 = vst [vmem:[#allocation45_spill] sm:$0xff] %v2680_v12  ;;  %4411 = vst [vmem:[#allocation46_spill] sm:$0xff] %v2682_v40  ;;  %v189_v12 = vstv %s2684_s11  ;;  %s3312_s11 = sld [smem:[#allocation2 + $0x8]] }
 0x1a1   :  { %4416 = vst [vmem:[#allocation51_spill] sm:$0xff] %v2713_v63 }
 0x1a2   :  { %1069 = vrot.lane.b32.xlu1 %v2689_v10, %s1856_s25  ;;  %1067 = vrot.lane.b32.xlu0 %v2694_v6, %s1856_s25  ;;  %v939_v6 = vmul.f32 %v938_v49, %v2394_v44 }
 0x1a3   :  { %v2704_v8 = vpop.permute.xlu1 %1379  ;;  %v2706_v57 = vpop.permute.xlu0 %1381 }
 0x1a4   :  { %4414 = vst [vmem:[#allocation49_spill] sm:$0xff] %v2704_v8  ;;  %4415 = vst [vmem:[#allocation50_spill] sm:$0xff] %v2706_v57  ;;  %v950_v8 = vstv %s1763_s10  ;;  %s3310_s10 = sld [smem:[#allocation2 + $0x14]] }
 0x1a6   :  { %1357 = vrot.lane.b32.xlu1 %v2713_v63, %s1856_s25  ;;  %1355 = vrot.lane.b32.xlu0 %v2718_v42, %s1856_s25  ;;  %v940_v63 = vmul.f32 %v938_v49, %v2389_v27  ;;  %v191_v27 = vmul.f32 %v189_v12, %v2412_v33  ;;  %v238_v49 = vstv %s2724_s13  ;;  %s1785_s13 = sld [smem:[#allocation2 + $0x5d]] }
 0x1a7   :  { %v944_v11 = vpop.permute.xlu1 %943  ;;  %v942_v57 = vpop.permute.xlu0 %941 }
 0x1a8   :  { %v945_v4 = vsel %vm171_vm11, %v942_v57, %v944_v11  ;;  %v946_v26 = vsel %vm171_vm11, %v944_v11, %v942_v57 }
 0x1a9   :  { %v947_v40 = vsel %vm2061_vm12, %v1916_v52, %v945_v4  ;;  %v948_v42 = vsel %vm2065_vm13, %v1940_v0, %v946_v26 }
 0x1aa   :  { %v951_v10 = vmul.f32 %v950_v8, %v947_v40  ;;  %v952_v37 = vmul.f32 %v950_v8, %v948_v42 }
 0x1ab   :  { %v195_v38 = vpop.permute.xlu1 %194  ;;  %v193_v57 = vpop.permute.xlu0 %192 }
 0x1ac   :  { %v1001_v11 = vadd.f32 %v951_v10, %v939_v6  ;;  %v1002_v29 = vadd.f32 %v952_v37, %v940_v63  ;;  %v196_v4 = vsel %vm171_vm11, %v193_v57, %v195_v38  ;;  %v197_v26 = vsel %vm171_vm11, %v195_v38, %v193_v57 }
 0x1ad   :  { %v198_v44 = vsel %vm2061_vm12, %v1929_v59, %v196_v4  ;;  %v199_v40 = vsel %vm2065_vm13, %v1955_v3, %v197_v26  ;;  %v190_v38 = vmul.f32 %v189_v12, %v2417_v34  ;;  %v341_v12 = vstv %s2739_s14  ;;  %s3474_s14 = sld [smem:[#allocation2 + $0x5c]] }
 0x1ae   :  { %v1007_v8 = vrot.slane %v1001_v11, 1  ;;  %v1008_v42 = vrot.slane %v1002_v29, 1  ;;  %v2754_v37 = vadd.f32 %v1001_v11, %v2135_v50  ;;  %v2757_v10 = vadd.f32 %v1002_v29, %v2133_v43 }
 0x1af   :  { %v202_v33 = vmul.f32 %v201_v28, %v198_v44  ;;  %v203_v6 = vmul.f32 %v201_v28, %v199_v40  ;;  %v232_v63 = vpop.permute.xlu1 %231  ;;  %v230_v57 = vpop.permute.xlu0 %229 }
 0x1b0   :  { %4418 = vst [vmem:[#allocation53_spill] sm:$0xff] %v2754_v37  ;;  %4419 = vst [vmem:[#allocation54_spill] sm:$0xff] %v2757_v10  ;;  %v2764_v4 = vadd.f32 %v1007_v8, %v2153_v1  ;;  %v2767_v26 = vadd.f32 %v1008_v42, %v2150_v58  ;;  %v233_v29 = vsel %vm208_vm15, %v230_v57, %v232_v63  ;;  %v4446_v10 = vld [vmem:[#allocation9_spill] sm:$0xff] }
 0x1b1   :  { %v234_v43 = vsel %vm208_vm15, %v232_v63, %v230_v57  ;;  %v253_v50 = vadd.f32 %v202_v33, %v190_v38  ;;  %v254_v34 = vadd.f32 %v203_v6, %v191_v27  ;;  %v236_v1 = vsel %vm2145_vm1, %v1955_v3, %v233_v29 }
 0x1b2   :  { %4420 = vst [vmem:[#allocation55_spill] sm:$0xff] %v2764_v4  ;;  %4421 = vst [vmem:[#allocation56_spill] sm:$0xff] %v2767_v26  ;;  %v235_v28 = vsel %vm2141_vm0, %v1929_v59, %v234_v43  ;;  %v240_v58 = vmul.f32 %v238_v49, %v236_v1  ;;  %v642_v26 = vstv %s1745_s17  ;;  %s3518_s17 = sld [smem:[#allocation2 + $0x3b]] }
 0x1b3   :  { %v239_v11 = vmul.f32 %v238_v49, %v235_v28  ;;  %v259_v44 = vrot.slane %v253_v50, 1  ;;  %v260_v40 = vrot.slane %v254_v34, 1  ;;  %v265_v8 = vadd.f32 %v253_v50, %v2101_v18  ;;  %v311_v63 = vpop.permute.xlu1 %310  ;;  %v309_v38 = vpop.permute.xlu0 %308 }
 0x1b4   :  { %v266_v42 = vadd.f32 %v254_v34, %v2099_v15  ;;  %v270_v33 = vadd.f32 %v2432_v39, %v240_v58  ;;  %v312_v6 = vsel %vm171_vm11, %v309_v38, %v311_v63  ;;  %v313_v57 = vsel %vm171_vm11, %v311_v63, %v309_v38 }
 0x1b5   :  { %v269_v27 = vadd.f32 %v2430_v60, %v239_v11  ;;  %v267_v49 = vadd.f32 %v259_v44, %v2111_v24  ;;  %v268_v29 = vadd.f32 %v260_v40, %v2107_v19  ;;  %v2793_v15 = vsel %vm2065_vm13, %v2208_v2, %v313_v57 }
 0x1b6   :  { %v2798_v18 = vsel %vm2061_vm12, %v2181_v14, %v312_v6  ;;  %v274_v60 = vrot.slane %v270_v33, 1  ;;  %v2802_v50 = vadd.f32 %v270_v33, %v266_v42  ;;  %322 = vrot.lane.b32.xlu1 %v2793_v15, %s1856_s25  ;;  %v353_v34 = vstv %s2761_s15  ;;  %s3512_s15 = sld [smem:[#allocation2 + $0x57]] }
 0x1b7   :  { %v273_v39 = vrot.slane %v269_v27, 1  ;;  %v2800_v43 = vadd.f32 %v269_v27, %v265_v8  ;;  %320 = vrot.lane.b32.xlu0 %v2798_v18, %s1856_s25  ;;  %v347_v19 = vpop.permute.xlu1 %346  ;;  %v345_v24 = vpop.permute.xlu0 %344  ;;  %v342_v44 = vmul.f32 %v341_v12, %v2461_v55  ;;  %v343_v42 = vmul.f32 %v341_v12, %v2466_v16 }
 0x1b8   :  { %v2811_v1 = vadd.f32 %v274_v60, %v268_v29  ;;  %v348_v11 = vsel %vm208_vm15, %v345_v24, %v347_v19  ;;  %v349_v58 = vsel %vm208_vm15, %v347_v19, %v345_v24 }
 0x1b9   :  { %v2809_v28 = vadd.f32 %v273_v39, %v267_v49  ;;  %v350_v40 = vsel %vm2141_vm0, %v2181_v14, %v349_v58  ;;  %v351_v8 = vsel %vm2145_vm1, %v2208_v2, %v348_v11 }
 0x1ba   :  { %v354_v63 = vmul.f32 %v353_v34, %v350_v40  ;;  %358 = vrot.lane.b32.xlu1 %v351_v8, %s1857_s26  ;;  %v355_v38 = vmul.f32 %v353_v34, %v351_v8 }
 0x1bb   :  { %356 = vrot.lane.b32.xlu0 %v350_v40, %s1857_s26  ;;  %v395_v27 = vpop.permute.xlu1 %394  ;;  %v393_v33 = vpop.permute.xlu0 %392 }
 0x1bc   :  { %v2827_v6 = vadd.f32 %v354_v63, %v342_v44  ;;  %v2829_v55 = vadd.f32 %v355_v38, %v343_v42  ;;  %v396_v57 = vsel %vm171_vm11, %v393_v33, %v395_v27  ;;  %v397_v49 = vsel %vm171_vm11, %v395_v27, %v393_v33 }
 0x1bd   :  { %v2838_v16 = vsel %vm2065_vm13, %v2484_v7, %v397_v49  ;;  %v2843_v12 = vsel %vm2061_vm12, %v2479_v53, %v396_v57 }
 0x1be   :  { %4422 = vst [vmem:[#allocation57_spill] sm:$0xff] %v2838_v16  ;;  %4423 = vst [vmem:[#allocation58_spill] sm:$0xff] %v2843_v12  ;;  %406 = vrot.lane.b32.xlu1 %v2838_v16, %s1856_s25 }
 0x1bf   :  { %404 = vrot.lane.b32.xlu0 %v2843_v12, %s1856_s25  ;;  %v477_v29 = vpop.permute.xlu1 %476  ;;  %v429_v39 = vpop.permute.xlu0 %428  ;;  %v4447_v12 = vld [vmem:[#allocation8_spill] sm:$0xff] }
 0x1c3   :  { %v766_v60 = vpop.permute.xlu1 %765  ;;  %v479_v19 = vpop.permute.xlu0 %478 }
 0x1c4   :  { %v480_v8 = vsel %vm287_vm4, %v477_v29, %v479_v19  ;;  %v481_v42 = vsel %vm287_vm4, %v479_v19, %v477_v29  ;;  %v630_v19 = vstv %s1744_s16  ;;  %s3514_s16 = sld [smem:[#allocation2 + $0x58]] }
 0x1c5   :  { %v2874_v27 = vsel %vm1996_vm5, %v1929_v59, %v480_v8  ;;  %v2879_v33 = vsel %vm2000_vm6, %v1955_v3, %v481_v42 }
 0x1c7   :  { %v431_v24 = vpop.permute.xlu1 %430  ;;  %v768_v34 = vpop.permute.xlu0 %767 }
 0x1c8   :  { %v432_v11 = vsel %vm208_vm15, %v429_v39, %v431_v24  ;;  %v433_v58 = vsel %vm208_vm15, %v431_v24, %v429_v39  ;;  %v770_v29 = vsel %vm576_vm8, %v768_v34, %v766_v60 }
 0x1c9   :  { %v2856_v44 = vsel %vm2141_vm0, %v2479_v53, %v433_v58  ;;  %v2861_v40 = vsel %vm2145_vm1, %v2484_v7, %v432_v11  ;;  %v2896_v24 = vsel %vm2027_vm9, %v1929_v59, %v770_v29  ;;  %v769_v58 = vsel %vm576_vm8, %v766_v60, %v768_v34 }
 0x1ca   :  { %440 = vrot.lane.b32.xlu0 %v2856_v44, %s1857_s26  ;;  %442 = vrot.lane.b32.xlu1 %v2861_v40, %s1857_s26  ;;  %4424 = vst [vmem:[#allocation59_spill] sm:$0xff] %v2896_v24  ;;  %v631_v59 = vmul.f32 %v630_v19, %v2549_v41  ;;  %v2918_v60 = vsel %vm2031_vm10, %v1955_v3, %v769_v58 }
 0x1cb   :  { %v600_v63 = vpop.permute.xlu1 %599  ;;  %v598_v38 = vpop.permute.xlu0 %597  ;;  %4425 = vst [vmem:[#allocation60_spill] sm:$0xff] %v2918_v60 }
 0x1cc   :  { %v601_v21 = vsel %vm171_vm11, %v598_v38, %v600_v63 }
 0x1cd   :  { %v2901_v11 = vsel %vm2061_vm12, %v2203_v62, %v601_v21  ;;  %v632_v21 = vmul.f32 %v630_v19, %v2554_v51 }
 0x1ce   :  { %490 = vrot.lane.b32.xlu1 %v2879_v33, %s1856_s25  ;;  %488 = vrot.lane.b32.xlu0 %v2874_v27, %s1856_s25 }
 0x1cf   :  { %v682_v57 = vpop.permute.xlu1 %681  ;;  %v684_v49 = vpop.permute.xlu0 %683 }
 0x1d0   :  { %v685_v4 = vsel %vm171_vm11, %v682_v57, %v684_v49 }
 0x1d1   :  { %v2939_v58 = vsel %vm2061_vm12, %v2499_v48, %v685_v4 }
 0x1d2   :  { %526 = vrot.lane.b32.xlu1 %v2879_v33, %s1857_s26  ;;  %524 = vrot.lane.b32.xlu0 %v2874_v27, %s1857_s26  ;;  %4428 = vst [vmem:[#allocation63_spill] sm:$0xff] %v2939_v58 }
 0x1d3   :  { %v718_v22 = vpop.permute.xlu1 %717  ;;  %v720_v39 = vpop.permute.xlu0 %719 }
 0x1d6   :  { %777 = vrot.lane.b32.xlu1 %v2896_v24, %s1856_s25  ;;  %609 = vrot.lane.b32.xlu0 %v2901_v11, %s1856_s25 }
 0x1d7   :  { %v634_v8 = vpop.permute.xlu1 %633  ;;  %v636_v42 = vpop.permute.xlu0 %635 }
 0x1d8   :  { %v637_v31 = vsel %vm208_vm15, %v634_v8, %v636_v42  ;;  %v638_v29 = vsel %vm208_vm15, %v636_v42, %v634_v8  ;;  %v686_v8 = vsel %vm171_vm11, %v684_v49, %v682_v57  ;;  %v722_v42 = vsel %vm208_vm15, %v720_v39, %v718_v22 }
 0x1d9   :  { %v639_v34 = vsel %vm2141_vm0, %v2203_v62, %v638_v29  ;;  %v640_v41 = vsel %vm2145_vm1, %v2224_v54, %v637_v31  ;;  %v2957_v4 = vsel %vm2141_vm0, %v2499_v48, %v722_v42  ;;  %v602_v57 = vsel %vm171_vm11, %v600_v63, %v598_v38 }
 0x1da   :  { %813 = vrot.lane.b32.xlu1 %v2896_v24, %s1857_s26  ;;  %779 = vrot.lane.b32.xlu0 %v2918_v60, %s1856_s25  ;;  %v643_v32 = vmul.f32 %v642_v26, %v639_v34  ;;  %v644_v3 = vmul.f32 %v642_v26, %v640_v41  ;;  %v2952_v26 = vsel %vm2065_vm13, %v2510_v61, %v686_v8 }
 0x1db   :  { %4429 = vst [vmem:[#allocation64_spill] sm:$0xff] %v2952_v26  ;;  %v721_v49 = vsel %vm208_vm15, %v718_v22, %v720_v39 }
 0x1dc   :  { %v2932_v51 = vadd.f32 %v643_v32, %v631_v59  ;;  %v2934_v19 = vadd.f32 %v644_v3, %v632_v21  ;;  %v2970_v59 = vsel %vm2065_vm13, %v2224_v54, %v602_v57  ;;  %v2975_v31 = vsel %vm2145_vm1, %v2510_v61, %v721_v49 }
 0x1de   :  { %4426 = vst [vmem:[#allocation61_spill] sm:$0xff] %v2932_v51  ;;  %4427 = vst [vmem:[#allocation62_spill] sm:$0xff] %v2934_v19  ;;  %815 = vrot.lane.b32.xlu0 %v2918_v60, %s1857_s26  ;;  %693 = vrot.lane.b32.xlu1 %v2939_v58, %s1856_s25 }
 0x1e2   :  { %695 = vrot.lane.b32.xlu0 %v2952_v26, %s1856_s25  ;;  %729 = vrot.lane.b32.xlu1 %v2957_v4, %s1857_s26 }
 0x1e6   :  { %611 = vrot.lane.b32.xlu1 %v2970_v59, %s1856_s25  ;;  %731 = vrot.lane.b32.xlu0 %v2975_v31, %s1857_s26 }
 0x1ea   :  { %645 = vrot.lane.b32.xlu0 %v639_v34, %s1857_s26  ;;  %647 = vrot.lane.b32.xlu1 %v640_v41, %s1857_s26 }
 0x1f4   :  { %v1236_v63 = vpop.permute.xlu1 %1235  ;;  %v1238_v38 = vpop.permute.xlu0 %1237 }
 0x1f5   :  { %v1239_v22 = vsel %vm171_vm11, %v1236_v63, %v1238_v38  ;;  %v1240_v39 = vsel %vm171_vm11, %v1238_v38, %v1236_v63 }
 0x1f6   :  { %v2990_v29 = vsel %vm2065_vm13, %v2572_v23, %v1240_v39  ;;  %v2995_v21 = vsel %vm2061_vm12, %v2567_v5, %v1239_v22 }
 0x1f7   :  { %4430 = vst [vmem:[#allocation65_spill] sm:$0xff] %v2990_v29  ;;  %4431 = vst [vmem:[#allocation66_spill] sm:$0xff] %v2995_v21  ;;  %1249 = vrot.lane.b32.xlu0 %v2990_v29, %s1856_s25  ;;  %1247 = vrot.lane.b32.xlu1 %v2995_v21, %s1856_s25 }
 0x1f8   :  { %v1272_v34 = vpop.permute.xlu1 %1271  ;;  %v1274_v41 = vpop.permute.xlu0 %1273 }
 0x1f9   :  { %v1275_v32 = vsel %vm208_vm15, %v1272_v34, %v1274_v41  ;;  %v1276_v3 = vsel %vm208_vm15, %v1274_v41, %v1272_v34 }
 0x1fa   :  { %v3008_v8 = vsel %vm2141_vm0, %v2567_v5, %v1276_v3  ;;  %v3013_v42 = vsel %vm2145_vm1, %v2572_v23, %v1275_v32  ;;  %v4449_v23 = vld [vmem:[#allocation11_spill] sm:$0xff] }
 0x1fb   :  { %4432 = vst [vmem:[#allocation67_spill] sm:$0xff] %v3008_v8  ;;  %4433 = vst [vmem:[#allocation68_spill] sm:$0xff] %v3013_v42  ;;  %1283 = vrot.lane.b32.xlu1 %v3008_v8, %s1857_s26  ;;  %1285 = vrot.lane.b32.xlu0 %v3013_v42, %s1857_s26  ;;  %v4450_v8 = vld [vmem:[#allocation10_spill] sm:$0xff] }
 0x1fc   :  { %v1524_v57 = vpop.permute.xlu1 %1523  ;;  %v1526_v49 = vpop.permute.xlu0 %1525 }
 0x1fd   :  { %v1527_v63 = vsel %vm171_vm11, %v1524_v57, %v1526_v49  ;;  %v1528_v38 = vsel %vm171_vm11, %v1526_v49, %v1524_v57 }
 0x1fe   :  { %v3026_v22 = vsel %vm2065_vm13, %v2594_v30, %v1528_v38  ;;  %v3031_v39 = vsel %vm2061_vm12, %v2589_v20, %v1527_v63 }
 0x1ff   :  { %4434 = vst [vmem:[#allocation69_spill] sm:$0xff] %v3026_v22  ;;  %4435 = vst [vmem:[#allocation70_spill] sm:$0xff] %v3031_v39  ;;  %1537 = vrot.lane.b32.xlu0 %v3026_v22, %s1856_s25  ;;  %1535 = vrot.lane.b32.xlu1 %v3031_v39, %s1856_s25  ;;  %v1052_v39 = vstv %s3069_s18  ;;  %v1040_v22 = vstv %s1767_s19  ;;  %s3535_s18 = sld [smem:[#allocation2 + $0x3c]]  ;;  %s3542_s19 = sld [smem:[#allocation2 + $0x59]] }
 0x200   :  { %v1560_v34 = vpop.permute.xlu1 %1559  ;;  %v1562_v41 = vpop.permute.xlu0 %1561  ;;  %v1042_v37 = vmul.f32 %v1040_v22, %v4446_v10  ;;  %v1041_v16 = vmul.f32 %v1040_v22, %v4447_v12  ;;  %v1352_v22 = vstv %s3109_s1  ;;  %s1726_s1 = sld [smem:[#allocation2 + $0x26]] }
 0x201   :  { %v1563_v32 = vsel %vm208_vm15, %v1560_v34, %v1562_v41  ;;  %v1564_v3 = vsel %vm208_vm15, %v1562_v41, %v1560_v34 }
 0x202   :  { %v3044_v57 = vsel %vm2141_vm0, %v2589_v20, %v1564_v3  ;;  %v3049_v49 = vsel %vm2145_vm1, %v2594_v30, %v1563_v32  ;;  %v1076_v30 = vstv %s3099_s23  ;;  %s1727_s23 = sld [smem:[#allocation2 + $0x27]] }
 0x203   :  { %4436 = vst [vmem:[#allocation71_spill] sm:$0xff] %v3044_v57  ;;  %4437 = vst [vmem:[#allocation72_spill] sm:$0xff] %v3049_v49  ;;  %1571 = vrot.lane.b32.xlu1 %v3044_v57, %s1857_s26  ;;  %1573 = vrot.lane.b32.xlu0 %v3049_v49, %s1857_s26 }
 0x204   :  { %v1152_v63 = vpop.permute.xlu1 %1151  ;;  %v1154_v38 = vpop.permute.xlu0 %1153 }
 0x205   :  { %v1155_v34 = vsel %vm171_vm11, %v1152_v63, %v1154_v38  ;;  %v1156_v41 = vsel %vm171_vm11, %v1154_v38, %v1152_v63 }
 0x206   :  { %v3062_v3 = vsel %vm2065_vm13, %v2263_v25, %v1156_v41  ;;  %v3067_v32 = vsel %vm2061_vm12, %v2258_v9, %v1155_v34 }
 0x207   :  { %4438 = vst [vmem:[#allocation73_spill] sm:$0xff] %v3062_v3  ;;  %4439 = vst [vmem:[#allocation74_spill] sm:$0xff] %v3067_v32  ;;  %1165 = vrot.lane.b32.xlu1 %v3062_v3, %s1856_s25  ;;  %1163 = vrot.lane.b32.xlu0 %v3067_v32, %s1856_s25  ;;  %v1340_v32 = vstv %s3091_s21  ;;  %v1064_v3 = vstv %s3097_s22  ;;  %s3546_s21 = sld [smem:[#allocation2 + $0x3d]]  ;;  %s3573_s22 = sld [smem:[#allocation2 + $0x3e]] }
 0x208   :  { %v1440_v63 = vpop.permute.xlu1 %1439  ;;  %v1442_v38 = vpop.permute.xlu0 %1441 }
 0x209   :  { %v1443_v41 = vsel %vm171_vm11, %v1440_v63, %v1442_v38  ;;  %v1444_v49 = vsel %vm171_vm11, %v1442_v38, %v1440_v63 }
 0x20a   :  { %v3084_v34 = vsel %vm2065_vm13, %v2281_v36, %v1444_v49  ;;  %v3089_v57 = vsel %vm2061_vm12, %v2276_v35, %v1443_v41 }
 0x20b   :  { %4440 = vst [vmem:[#allocation75_spill] sm:$0xff] %v3084_v34  ;;  %4441 = vst [vmem:[#allocation76_spill] sm:$0xff] %v3089_v57  ;;  %1453 = vrot.lane.b32.xlu1 %v3084_v34, %s1856_s25  ;;  %1451 = vrot.lane.b32.xlu0 %v3089_v57, %s1856_s25  ;;  %v4448_v57 = vld [vmem:[#allocation18_spill] sm:$0xff] }
 0x20c   :  { %v1188_v63 = vpop.permute.xlu1 %1187  ;;  %v1190_v38 = vpop.permute.xlu0 %1189  ;;  %v1053_v34 = vmul.f32 %v1052_v39, %v4448_v57 }
 0x20d   :  { %v3103_v49 = vsel %vm208_vm15, %v1188_v63, %v1190_v38  ;;  %v3107_v41 = vsel %vm208_vm15, %v1190_v38, %v1188_v63  ;;  %v1054_v63 = vmul.f32 %v1052_v39, %v2310_v17  ;;  %v1328_v38 = vstv %s3079_s20  ;;  %s3544_s20 = sld [smem:[#allocation2 + $0x5a]] }
 0x20e   :  { %4442 = vst [vmem:[#allocation77_spill] sm:$0xff] %v3103_v49  ;;  %4443 = vst [vmem:[#allocation78_spill] sm:$0xff] %v3107_v41  ;;  %v1330_v5 = vmul.f32 %v1328_v38, %v4449_v23  ;;  %v1115_v9 = vadd.f32 %v1053_v34, %v1041_v16  ;;  %v4453_v41 = vld [vmem:[#allocation21_spill] sm:$0xff] }
 0x20f   :  { %v1116_v35 = vadd.f32 %v1054_v63, %v1042_v37  ;;  %v1342_v25 = vmul.f32 %v1340_v32, %v4453_v41  ;;  %v1364_v63 = vstv %s3112_s24  ;;  %s1728_s24 = sld [smem:[#allocation2 + $0x28]] }
 0x210   :  { %v1476_v21 = vpop.permute.xlu1 %1475  ;;  %v1478_v29 = vpop.permute.xlu0 %1477 }
 0x211   :  { %v3116_v26 = vsel %vm208_vm15, %v1476_v21, %v1478_v29  ;;  %v3120_v58 = vsel %vm208_vm15, %v1478_v29, %v1476_v21  ;;  %v1329_v29 = vmul.f32 %v1328_v38, %v4450_v8  ;;  %v1404_v41 = vadd.f32 %v1342_v25, %v1330_v5 }
 0x212   :  { %4444 = vst [vmem:[#allocation79_spill] sm:$0xff] %v3116_v26  ;;  %4445 = vst [vmem:[#allocation80_spill] sm:$0xff] %v3120_v58  ;;  %v4451_v58 = vld [vmem:[#allocation47_spill] sm:$0xff]  ;;  %v4452_v26 = vld [vmem:[#allocation48_spill] sm:$0xff]  ;;  %v317_v5 = vstv %s1721_s2  ;;  %s3656_s2 = sld [smem:[#allocation2 + $0x2c]] }
 0x213   :  { %v1066_v36 = vmul.f32 %v1064_v3, %v4451_v58  ;;  %v1065_v38 = vmul.f32 %v1064_v3, %v4452_v26  ;;  %v4456_v3 = vld [vmem:[#allocation52_spill] sm:$0xff] }
 0x214   :  { %v1070_v20 = vpop.permute.xlu1 %1069  ;;  %v1068_v42 = vpop.permute.xlu0 %1067 }
 0x215   :  { %v1071_v17 = vsel %vm171_vm11, %v1068_v42, %v1070_v20  ;;  %v1072_v21 = vsel %vm171_vm11, %v1070_v20, %v1068_v42  ;;  %v4454_v20 = vld [vmem:[#allocation22_spill] sm:$0xff] }
 0x216   :  { %v1073_v39 = vsel %vm2061_vm12, %v4447_v12, %v1071_v17  ;;  %v1074_v57 = vsel %vm2065_vm13, %v4446_v10, %v1072_v21  ;;  %v1341_v37 = vmul.f32 %v1340_v32, %v4454_v20  ;;  %v4455_v21 = vld [vmem:[#allocation51_spill] sm:$0xff]  ;;  %v4462_v20 = vld [vmem:[#allocation28_spill] sm:$0xff] }
 0x217   :  { %v1077_v19 = vmul.f32 %v1076_v30, %v1073_v39  ;;  %v1078_v51 = vmul.f32 %v1076_v30, %v1074_v57  ;;  %v1354_v26 = vmul.f32 %v1352_v22, %v4455_v21  ;;  %v1353_v30 = vmul.f32 %v1352_v22, %v4456_v3 }
 0x218   :  { %v1358_v42 = vpop.permute.xlu1 %1357  ;;  %v1356_v49 = vpop.permute.xlu0 %1355 }
 0x219   :  { %v1117_v61 = vadd.f32 %v1077_v19, %v1065_v38  ;;  %v1118_v17 = vadd.f32 %v1078_v51, %v1066_v36  ;;  %v1359_v48 = vsel %vm171_vm11, %v1356_v49, %v1358_v42  ;;  %v1360_v58 = vsel %vm171_vm11, %v1358_v42, %v1356_v49 }
 0x21a   :  { %v1361_v16 = vsel %vm2061_vm12, %v4450_v8, %v1359_v48  ;;  %v1362_v32 = vsel %vm2065_vm13, %v4449_v23, %v1360_v58  ;;  %v1403_v49 = vadd.f32 %v1341_v37, %v1329_v29  ;;  %v293_v48 = vstv %s1719_s28  ;;  %s1732_s28 = sld [smem:[#allocation2 + $0x23]] }
 0x21b   :  { %v3160_v19 = vadd.f32 %v1117_v61, %v1115_v9  ;;  %v3162_v36 = vadd.f32 %v1118_v17, %v1116_v35  ;;  %v1365_v51 = vmul.f32 %v1364_v63, %v1361_v16  ;;  %v1366_v34 = vmul.f32 %v1364_v63, %v1362_v32  ;;  %v4461_v35 = vld [vmem:[#allocation27_spill] sm:$0xff] }
 0x21c   :  { %v305_v9 = vstv %s1720_s27  ;;  %v329_v29 = vstv %s1722_s29  ;;  %v295_v58 = vmul.f32 %v293_v48, %v2208_v2  ;;  %v294_v21 = vmul.f32 %v293_v48, %v2181_v14  ;;  %s1729_s27 = sld [smem:[#allocation2 + $0x29]]  ;;  %s3658_s29 = sld [smem:[#allocation2 + $0x2b]] }
 0x21d   :  { %4457 = vst [vmem:[#allocation18_spill] sm:$0xff] %v3160_v19  ;;  %4458 = vst [vmem:[#allocation47_spill] sm:$0xff] %v3162_v36  ;;  %v1405_v39 = vadd.f32 %v1365_v51, %v1353_v30  ;;  %v1406_v57 = vadd.f32 %v1366_v34, %v1354_v26  ;;  %v307_v61 = vmul.f32 %v305_v9, %v4461_v35 }
 0x21e   :  { %v306_v42 = vmul.f32 %v305_v9, %v4462_v20  ;;  %v319_v30 = vmul.f32 %v317_v5, %v2793_v15  ;;  %v318_v16 = vmul.f32 %v317_v5, %v2798_v18 }
 0x21f   :  { %v3164_v22 = vadd.f32 %v1405_v39, %v1403_v49  ;;  %v3166_v38 = vadd.f32 %v1406_v57, %v1404_v41  ;;  %v369_v34 = vadd.f32 %v307_v61, %v295_v58  ;;  %v365_v39 = vstv %s3168_s3  ;;  %s3664_s3 = sld [smem:[#allocation2 + $0x47]] }
 0x220   :  { %v368_v41 = vadd.f32 %v306_v42, %v294_v21 }
 0x221   :  { %4459 = vst [vmem:[#allocation48_spill] sm:$0xff] %v3164_v22  ;;  %4460 = vst [vmem:[#allocation21_spill] sm:$0xff] %v3166_v38 }
 0x228   :  { %v323_v25 = vpop.permute.xlu1 %322 }
 0x229   :  { %v321_v37 = vpop.permute.xlu0 %320 }
 0x22a   :  { %v324_v63 = vsel %vm171_vm11, %v321_v37, %v323_v25  ;;  %v325_v17 = vsel %vm171_vm11, %v323_v25, %v321_v37 }
 0x22b   :  { %v326_v26 = vsel %vm2061_vm12, %v2181_v14, %v324_v63  ;;  %v327_v3 = vsel %vm2065_vm13, %v2208_v2, %v325_v17 }
 0x22c   :  { %v330_v32 = vmul.f32 %v329_v29, %v326_v26  ;;  %v331_v51 = vmul.f32 %v329_v29, %v327_v3  ;;  %v359_v49 = vpop.permute.xlu1 %358 }
 0x22d   :  { %v357_v57 = vpop.permute.xlu0 %356 }
 0x22e   :  { %v370_v9 = vadd.f32 %v330_v32, %v318_v16  ;;  %v371_v48 = vadd.f32 %v331_v51, %v319_v30  ;;  %v360_v35 = vsel %vm208_vm15, %v357_v57, %v359_v49  ;;  %v361_v20 = vsel %vm208_vm15, %v359_v49, %v357_v57 }
 0x22f   :  { %v362_v15 = vsel %vm2141_vm0, %v2181_v14, %v361_v20  ;;  %v363_v18 = vsel %vm2145_vm1, %v2208_v2, %v360_v35 }
 0x230   :  { %v374_v61 = vadd.f32 %v370_v9, %v368_v41  ;;  %v375_v42 = vadd.f32 %v371_v48, %v369_v34  ;;  %v366_v5 = vmul.f32 %v365_v39, %v362_v15  ;;  %v367_v25 = vmul.f32 %v365_v39, %v363_v18  ;;  %v407_v29 = vpop.permute.xlu1 %406 }
 0x231   :  { %v405_v37 = vpop.permute.xlu0 %404  ;;  %v437_v34 = vstv %s1730_s30  ;;  %v449_v39 = vstv %s1731_s5  ;;  %s3672_s30 = sld [smem:[#allocation2 + $0x48]]  ;;  %s3674_s5 = sld [smem:[#allocation2 + $0x4f]] }
 0x232   :  { %v376_v63 = vadd.f32 %v2827_v6, %v366_v5  ;;  %v377_v17 = vadd.f32 %v2829_v55, %v367_v25  ;;  %v408_v58 = vsel %vm171_vm11, %v405_v37, %v407_v29  ;;  %v409_v14 = vsel %vm171_vm11, %v407_v29, %v405_v37 }
 0x233   :  { %v3206_v2 = vsel %vm2065_vm13, %v2484_v7, %v409_v14  ;;  %v3211_v21 = vsel %vm2061_vm12, %v2479_v53, %v408_v58  ;;  %v438_v9 = vmul.f32 %v437_v34, %v2856_v44 }
 0x234   :  { %v378_v6 = vadd.f32 %v376_v63, %v374_v61  ;;  %v379_v26 = vadd.f32 %v377_v17, %v375_v42  ;;  %418 = vrot.lane.b32.xlu1 %v3206_v2, %s1856_s25  ;;  %416 = vrot.lane.b32.xlu0 %v3211_v21, %s1856_s25 }
 0x236   :  { %v863_v55 = vrot.slane %v378_v6, 1  ;;  %v864_v3 = vrot.slane %v379_v26, 1  ;;  %v3218_v30 = vadd.f32 %v378_v6, %v2800_v43  ;;  %v3221_v16 = vadd.f32 %v379_v26, %v2802_v50 }
 0x238   :  { %4463 = vst [vmem:[#allocation22_spill] sm:$0xff] %v3218_v30  ;;  %4464 = vst [vmem:[#allocation51_spill] sm:$0xff] %v3221_v16  ;;  %v3224_v32 = vadd.f32 %v863_v55, %v2809_v28  ;;  %v3227_v51 = vadd.f32 %v864_v3, %v2811_v1  ;;  %v439_v1 = vmul.f32 %v437_v34, %v2861_v40 }
 0x23a   :  { %4465 = vst [vmem:[#allocation52_spill] sm:$0xff] %v3224_v32  ;;  %4466 = vst [vmem:[#allocation27_spill] sm:$0xff] %v3227_v51  ;;  %v738_v32 = vstv %s3312_s11  ;;  %s3711_s11 = sld [smem:[#allocation2 + $0x4e]] }
 0x23c   :  { %v443_v41 = vpop.permute.xlu1 %442  ;;  %v441_v49 = vpop.permute.xlu0 %440 }
 0x23d   :  { %v444_v57 = vsel %vm208_vm15, %v441_v49, %v443_v41  ;;  %v445_v43 = vsel %vm208_vm15, %v443_v41, %v441_v49 }
 0x23e   :  { %v446_v50 = vsel %vm2141_vm0, %v2479_v53, %v445_v43  ;;  %v447_v28 = vsel %vm2145_vm1, %v2484_v7, %v444_v57  ;;  %v582_v57 = vstv %s3283_s7  ;;  %s3684_s7 = sld [smem:[#allocation2 + $0xa]] }
 0x23f   :  { %452 = vrot.lane.b32.xlu0 %v446_v50, %s1857_s26  ;;  %v450_v48 = vmul.f32 %v449_v39, %v446_v50  ;;  %454 = vrot.lane.b32.xlu1 %v447_v28, %s1857_s26  ;;  %v451_v35 = vmul.f32 %v449_v39, %v447_v28  ;;  %v594_v39 = vstv %s1741_s6  ;;  %v4471_v50 = vld [vmem:[#allocation20_spill] sm:$0xff]  ;;  %v4472_v28 = vld [vmem:[#allocation19_spill] sm:$0xff]  ;;  %s3676_s6 = sld [smem:[#allocation2 + $0x41]] }
 0x240   :  { %v491_v20 = vpop.permute.xlu1 %490  ;;  %v489_v15 = vpop.permute.xlu0 %488 }
 0x241   :  { %v3243_v18 = vadd.f32 %v450_v48, %v438_v9  ;;  %v3245_v44 = vadd.f32 %v451_v35, %v439_v1  ;;  %v492_v61 = vsel %vm171_vm11, %v489_v15, %v491_v20  ;;  %v493_v42 = vsel %vm171_vm11, %v491_v20, %v489_v15  ;;  %v4473_v15 = vld [vmem:[#allocation31_spill] sm:$0xff] }
 0x242   :  { %v3254_v40 = vsel %vm2065_vm13, %v2879_v33, %v493_v42  ;;  %v3259_v5 = vsel %vm2061_vm12, %v2874_v27, %v492_v61  ;;  %v969_v1 = vsel %vm208_vm15, %v4472_v28, %v4471_v50  ;;  %v970_v48 = vsel %vm208_vm15, %v4471_v50, %v4472_v28  ;;  %v4474_v42 = vld [vmem:[#allocation32_spill] sm:$0xff]  ;;  %v4596_v47 = vld [vmem:[#allocation27_spill] sm:$0xff] }
 0x243   :  { %4467 = vst [vmem:[#allocation28_spill] sm:$0xff] %v3254_v40  ;;  %4468 = vst [vmem:[#allocation81_spill] sm:$0xff] %v3259_v5  ;;  %502 = vrot.lane.b32.xlu1 %v3254_v40, %s1856_s25  ;;  %500 = vrot.lane.b32.xlu0 %v3259_v5, %s1856_s25  ;;  %v596_v61 = vmul.f32 %v594_v39, %v4473_v15  ;;  %v726_v28 = vstv %s3287_s9  ;;  %v4481_v5 = vld [vmem:[#allocation77_spill] sm:$0xff]  ;;  %s3698_s9 = sld [smem:[#allocation2 + $0x56]] }
 0x244   :  { %v527_v25 = vpop.permute.xlu1 %526  ;;  %v525_v29 = vpop.permute.xlu0 %524 }
 0x245   :  { %v528_v37 = vsel %vm208_vm15, %v525_v29, %v527_v25  ;;  %v529_v63 = vsel %vm208_vm15, %v527_v25, %v525_v29  ;;  %v595_v25 = vmul.f32 %v594_v39, %v4474_v42  ;;  %v606_v39 = vstv %s3285_s8  ;;  %s3686_s8 = sld [smem:[#allocation2 + $0x5e]] }
 0x246   :  { %v3272_v17 = vsel %vm2141_vm0, %v2874_v27, %v529_v63  ;;  %v3277_v58 = vsel %vm2145_vm1, %v2879_v33, %v528_v37  ;;  %v4475_v63 = vld [vmem:[#allocation46_spill] sm:$0xff] }
 0x247   :  { %536 = vrot.lane.b32.xlu0 %v3272_v17, %s1857_s26  ;;  %538 = vrot.lane.b32.xlu1 %v3277_v58, %s1857_s26 }
 0x248   :  { %v778_v14 = vpop.permute.xlu1 %777  ;;  %v610_v6 = vpop.permute.xlu0 %609 }
 0x24c   :  { %v814_v26 = vpop.permute.xlu1 %813  ;;  %v780_v55 = vpop.permute.xlu0 %779 }
 0x24d   :  { %v781_v3 = vsel %vm171_vm11, %v778_v14, %v780_v55  ;;  %v782_v34 = vsel %vm171_vm11, %v780_v55, %v778_v14  ;;  %v4476_v14 = vld [vmem:[#allocation45_spill] sm:$0xff] }
 0x24e   :  { %v3296_v41 = vsel %vm2065_vm13, %v2918_v60, %v782_v34  ;;  %v3301_v49 = vsel %vm2061_vm12, %v2896_v24, %v781_v3  ;;  %v1095_v55 = vsel %vm208_vm15, %v4476_v14, %v4475_v63  ;;  %v584_v3 = vmul.f32 %v582_v57, %v2224_v54 }
 0x24f   :  { %4469 = vst [vmem:[#allocation82_spill] sm:$0xff] %v3296_v41  ;;  %4470 = vst [vmem:[#allocation83_spill] sm:$0xff] %v3301_v49  ;;  %791 = vrot.lane.b32.xlu0 %v3296_v41, %s1856_s25  ;;  %789 = vrot.lane.b32.xlu1 %v3301_v49, %s1856_s25  ;;  %v583_v34 = vmul.f32 %v582_v57, %v2203_v62  ;;  %v3371_v42 = vsel %vm2145_vm1, %v4446_v10, %v1095_v55 }
 0x250   :  { %v3308_v43 = vpop.permute.xlu1 %693  ;;  %v816_v9 = vpop.permute.xlu0 %815  ;;  %v658_v57 = vadd.f32 %v596_v61, %v584_v3  ;;  %v608_v61 = vmul.f32 %v606_v39, %v2970_v59  ;;  %v728_v55 = vmul.f32 %v726_v28, %v2975_v31 }
 0x251   :  { %v817_v35 = vsel %vm208_vm15, %v814_v26, %v816_v9  ;;  %v818_v20 = vsel %vm208_vm15, %v816_v9, %v814_v26  ;;  %v1096_v26 = vsel %vm208_vm15, %v4475_v63, %v4476_v14  ;;  %v657_v15 = vadd.f32 %v595_v25, %v583_v34  ;;  %v4478_v14 = vld [vmem:[#allocation49_spill] sm:$0xff] }
 0x252   :  { %v3331_v29 = vsel %vm2141_vm0, %v2896_v24, %v818_v20  ;;  %v3336_v37 = vsel %vm2145_vm1, %v2918_v60, %v817_v35  ;;  %v3361_v35 = vsel %vm2145_vm1, %v1940_v0, %v969_v1  ;;  %v3366_v20 = vsel %vm2141_vm0, %v1916_v52, %v970_v48  ;;  %v4477_v1 = vld [vmem:[#allocation50_spill] sm:$0xff] }
 0x253   :  { %825 = vrot.lane.b32.xlu1 %v3331_v29, %s1857_s26  ;;  %827 = vrot.lane.b32.xlu0 %v3336_v37, %s1857_s26  ;;  %v3376_v63 = vsel %vm2141_vm0, %v4447_v12, %v1096_v26  ;;  %v1383_v51 = vsel %vm208_vm15, %v4478_v14, %v4477_v1  ;;  %v607_v48 = vmul.f32 %v606_v39, %v2901_v11  ;;  %v618_v26 = vstv %s3310_s10  ;;  %s3700_s10 = sld [smem:[#allocation2 + $0x3a]] }
 0x254   :  { %v730_v9 = vpop.permute.xlu1 %729  ;;  %v3353_v50 = vpop.permute.xlu0 %695  ;;  %v727_v25 = vmul.f32 %v726_v28, %v2957_v4  ;;  %v4479_v28 = vld [vmem:[#allocation29_spill] sm:$0xff] }
 0x257   :  { %979 = vrot.lane.b32.xlu1 %v3361_v35, %s1857_s26  ;;  %977 = vrot.lane.b32.xlu0 %v3366_v20, %s1857_s26 }
 0x258   :  { %v612_v3 = vpop.permute.xlu1 %611  ;;  %v732_v34 = vpop.permute.xlu0 %731 }
 0x259   :  { %v613_v11 = vsel %vm171_vm11, %v610_v6, %v612_v3  ;;  %v614_v59 = vsel %vm171_vm11, %v612_v3, %v610_v6  ;;  %v733_v39 = vsel %vm208_vm15, %v730_v9, %v732_v34  ;;  %v734_v16 = vsel %vm208_vm15, %v732_v34, %v730_v9  ;;  %v4480_v6 = vld [vmem:[#allocation30_spill] sm:$0xff] }
 0x25a   :  { %v615_v4 = vsel %vm2061_vm12, %v2203_v62, %v613_v11  ;;  %v616_v31 = vsel %vm2065_vm13, %v2224_v54, %v614_v59  ;;  %v3409_v30 = vsel %vm2141_vm0, %v4479_v28, %v734_v16  ;;  %v736_v3 = vsel %vm2145_vm1, %v4480_v6, %v733_v39  ;;  %v4482_v16 = vld [vmem:[#allocation15_spill] sm:$0xff]  ;;  %v4484_v39 = vld [vmem:[#allocation78_spill] sm:$0xff] }
 0x25b   :  { %v619_v49 = vmul.f32 %v618_v26, %v615_v4  ;;  %v620_v41 = vmul.f32 %v618_v26, %v616_v31  ;;  %1105 = vrot.lane.b32.xlu1 %v3371_v42, %s1857_s26  ;;  %1103 = vrot.lane.b32.xlu0 %v3376_v63, %s1857_s26  ;;  %v739_v9 = vmul.f32 %v738_v32, %v3409_v30  ;;  %v654_v11 = vstv %s3355_s12  ;;  %v4485_v4 = vld [vmem:[#allocation14_spill] sm:$0xff]  ;;  %s3714_s12 = sld [smem:[#allocation2 + $0x40]] }
 0x25c   :  { %v648_v34 = vpop.permute.xlu1 %647  ;;  %v646_v59 = vpop.permute.xlu0 %645  ;;  %v3424_v40 = vsel %vm2145_vm1, %v4482_v16, %v4481_v5  ;;  %v3430_v26 = vsel %vm2141_vm0, %v4485_v4, %v4484_v39  ;;  %v740_v31 = vmul.f32 %v738_v32, %v736_v3 }
 0x25d   :  { %4483 = vst [vmem:[#allocation20_spill] sm:$0xff] %v3424_v40  ;;  %4486 = vst [vmem:[#allocation19_spill] sm:$0xff] %v3430_v26  ;;  %v659_v38 = vadd.f32 %v619_v49, %v607_v48  ;;  %v660_v22 = vadd.f32 %v620_v41, %v608_v61  ;;  %v649_v36 = vsel %vm208_vm15, %v646_v59, %v648_v34 }
 0x25e   :  { %v650_v19 = vsel %vm208_vm15, %v648_v34, %v646_v59  ;;  %v652_v10 = vsel %vm2145_vm1, %v2224_v54, %v649_v36  ;;  %v3442_v12 = vadd.f32 %v739_v9, %v727_v25  ;;  %v3444_v39 = vadd.f32 %v740_v31, %v728_v55  ;;  %v4489_v54 = vld [vmem:[#allocation61_spill] sm:$0xff]  ;;  %v4490_v36 = vld [vmem:[#allocation62_spill] sm:$0xff]  ;;  %v4496_v25 = vld [vmem:[#allocation80_spill] sm:$0xff] }
 0x25f   :  { %v651_v5 = vsel %vm2141_vm0, %v2203_v62, %v650_v19  ;;  %v663_v32 = vadd.f32 %v659_v38, %v657_v15  ;;  %v664_v41 = vadd.f32 %v660_v22, %v658_v57  ;;  %v656_v48 = vmul.f32 %v654_v11, %v652_v10  ;;  %1201 = vrot.lane.b32.xlu1 %v3424_v40, %s1857_s26  ;;  %v4494_v15 = vld [vmem:[#allocation17_spill] sm:$0xff]  ;;  %v4497_v55 = vld [vmem:[#allocation16_spill] sm:$0xff] }
 0x260   :  { %4487 = vst [vmem:[#allocation31_spill] sm:$0xff] %v3442_v12  ;;  %4488 = vst [vmem:[#allocation32_spill] sm:$0xff] %v3444_v39  ;;  %v655_v49 = vmul.f32 %v654_v11, %v651_v5  ;;  %v1384_v62 = vsel %vm208_vm15, %v4477_v1, %v4478_v14  ;;  %1199 = vrot.lane.b32.xlu0 %v3430_v26, %s1857_s26  ;;  %v3459_v22 = vsel %vm2145_vm1, %v4449_v23, %v1383_v51  ;;  %v4493_v51 = vld [vmem:[#allocation79_spill] sm:$0xff]  ;;  %v4511_v23 = vld [vmem:[#allocation36_spill] sm:$0xff] }
 0x261   :  { %v666_v61 = vadd.f32 %v4490_v36, %v656_v48  ;;  %v3470_v57 = vsel %vm2141_vm0, %v4450_v8, %v1384_v62  ;;  %v3480_v1 = vsel %vm2145_vm1, %v4494_v15, %v4493_v51  ;;  %v698_v14 = vsel %vm171_vm11, %v3353_v50, %v3308_v43  ;;  %v4501_v62 = vld [vmem:[#allocation67_spill] sm:$0xff]  ;;  %v4502_v36 = vld [vmem:[#allocation33_spill] sm:$0xff]  ;;  %v4503_v51 = vld [vmem:[#allocation34_spill] sm:$0xff] }
 0x262   :  { %v665_v19 = vadd.f32 %v4489_v54, %v655_v49  ;;  %4495 = vst [vmem:[#allocation50_spill] sm:$0xff] %v3480_v1  ;;  %v3492_v9 = vsel %vm2141_vm0, %v4497_v55, %v4496_v25  ;;  %v697_v34 = vsel %vm171_vm11, %v3308_v43, %v3353_v50  ;;  %v3503_v31 = vsel %vm2065_vm13, %v4480_v6, %v698_v14  ;;  %v4504_v25 = vld [vmem:[#allocation68_spill] sm:$0xff] }
 0x263   :  { %v3463_v38 = vadd.f32 %v666_v61, %v664_v41  ;;  %1393 = vrot.lane.b32.xlu1 %v3459_v22, %s1857_s26  ;;  %4498 = vst [vmem:[#allocation49_spill] sm:$0xff] %v3492_v9  ;;  %4499 = vst [vmem:[#allocation29_spill] sm:$0xff] %v3503_v31  ;;  %v3510_v5 = vsel %vm2061_vm12, %v4479_v28, %v697_v34  ;;  %v1280_v43 = vstv %s1785_s13  ;;  %v1292_v41 = vstv %s3474_s14  ;;  %s3721_s13 = sld [smem:[#allocation2 + $0x2]]  ;;  %s3731_s14 = sld [smem:[#allocation2 + $0xb]] }
 0x264   :  { %v3461_v10 = vadd.f32 %v665_v19, %v663_v32  ;;  %1391 = vrot.lane.b32.xlu0 %v3470_v57, %s1857_s26  ;;  %4500 = vst [vmem:[#allocation30_spill] sm:$0xff] %v3510_v5  ;;  %v1281_v54 = vmul.f32 %v1280_v43, %v4501_v62  ;;  %v1282_v34 = vmul.f32 %v1280_v43, %v4504_v25 }
 0x265   :  { %4492 = vst [vmem:[#allocation45_spill] sm:$0xff] %v3463_v38  ;;  %v1436_v38 = vstv %s3535_s18  ;;  %s3759_s18 = sld [smem:[#allocation2 + $0x55]] }
 0x266   :  { %4491 = vst [vmem:[#allocation46_spill] sm:$0xff] %v3461_v10 }
 0x267   :  { %1489 = vrot.lane.b32.xlu1 %v3480_v1, %s1857_s26  ;;  %v4517_v1 = vld [vmem:[#allocation40_spill] sm:$0xff] }
 0x268   :  { %1487 = vrot.lane.b32.xlu0 %v3492_v9, %s1857_s26  ;;  %v4516_v9 = vld [vmem:[#allocation39_spill] sm:$0xff] }
 0x269   :  { %v1248_v11 = vpop.permute.xlu1 %1247  ;;  %v1250_v59 = vpop.permute.xlu0 %1249 }
 0x26a   :  { %v1252_v19 = vsel %vm171_vm11, %v1250_v59, %v1248_v11 }
 0x26b   :  { %707 = vrot.lane.b32.xlu1 %v3503_v31, %s1856_s25  ;;  %v3551_v43 = vsel %vm2065_vm13, %v4503_v51, %v1252_v19  ;;  %v1424_v19 = vstv %s3518_s17  ;;  %v1448_v31 = vstv %s3546_s21  ;;  %s3741_s17 = sld [smem:[#allocation2 + $0x1]]  ;;  %s3815_s21 = sld [smem:[#allocation2 + $0x4d]] }
 0x26c   :  { %705 = vrot.lane.b32.xlu0 %v3510_v5, %s1856_s25  ;;  %4505 = vst [vmem:[#allocation77_spill] sm:$0xff] %v3551_v43  ;;  %v1425_v39 = vmul.f32 %v1424_v19, %v4497_v55 }
 0x26d   :  { %v1284_v50 = vpop.permute.xlu1 %1283  ;;  %v1286_v32 = vpop.permute.xlu0 %1285 }
 0x26e   :  { %v1287_v49 = vsel %vm208_vm15, %v1284_v50, %v1286_v32  ;;  %v1288_v48 = vsel %vm208_vm15, %v1286_v32, %v1284_v50  ;;  %v1251_v50 = vsel %vm171_vm11, %v1248_v11, %v1250_v59 }
 0x26f   :  { %743 = vrot.lane.b32.xlu1 %v736_v3, %s1857_s26  ;;  %v1289_v61 = vsel %vm2141_vm0, %v4502_v36, %v1288_v48  ;;  %v1290_v14 = vsel %vm2145_vm1, %v4503_v51, %v1287_v49  ;;  %v1148_v49 = vstv %s3514_s16  ;;  %s3739_s16 = sld [smem:[#allocation2 + $0x35]] }
 0x270   :  { %741 = vrot.lane.b32.xlu0 %v3409_v30, %s1857_s26  ;;  %v1293_v3 = vmul.f32 %v1292_v41, %v1289_v61  ;;  %v1294_v32 = vmul.f32 %v1292_v41, %v1290_v14  ;;  %v3562_v30 = vsel %vm2061_vm12, %v4502_v36, %v1251_v50  ;;  %v1136_v41 = vstv %s3512_s15  ;;  %s3733_s15 = sld [smem:[#allocation2 + $0x5f]] }
 0x271   :  { %v1536_v48 = vpop.permute.xlu1 %1535  ;;  %v1538_v62 = vpop.permute.xlu0 %1537  ;;  %4508 = vst [vmem:[#allocation62_spill] sm:$0xff] %v3562_v30  ;;  %v1172_v36 = vstv %s3544_s20  ;;  %s3799_s20 = sld [smem:[#allocation2 + $0x39]] }
 0x272   :  { %v3553_v11 = vadd.f32 %v1293_v3, %v1281_v54  ;;  %v3555_v59 = vadd.f32 %v1294_v32, %v1282_v34  ;;  %v1138_v34 = vmul.f32 %v1136_v41, %v4482_v16  ;;  %v4509_v3 = vld [vmem:[#allocation37_spill] sm:$0xff]  ;;  %v1540_v32 = vsel %vm171_vm11, %v1538_v62, %v1536_v48 }
 0x273   :  { %1261 = vrot.lane.b32.xlu1 %v3551_v43, %s1856_s25  ;;  %v1150_v50 = vmul.f32 %v1148_v49, %v4509_v3  ;;  %v1539_v10 = vsel %vm171_vm11, %v1536_v48, %v1538_v62  ;;  %v1160_v3 = vstv %s3542_s19  ;;  %s3771_s19 = sld [smem:[#allocation2 + $0x46]] }
 0x274   :  { %4506 = vst [vmem:[#allocation78_spill] sm:$0xff] %v3553_v11  ;;  %4507 = vst [vmem:[#allocation61_spill] sm:$0xff] %v3555_v59  ;;  %1259 = vrot.lane.b32.xlu0 %v3562_v30, %s1856_s25  ;;  %v1137_v59 = vmul.f32 %v1136_v41, %v4485_v4  ;;  %v1426_v11 = vmul.f32 %v1424_v19, %v4494_v15  ;;  %v4510_v30 = vld [vmem:[#allocation38_spill] sm:$0xff] }
 0x275   :  { %v3569_v54 = vpop.permute.xlu1 %1571  ;;  %v3571_v25 = vpop.permute.xlu0 %1573  ;;  %v1149_v43 = vmul.f32 %v1148_v49, %v4510_v30  ;;  %v1212_v48 = vadd.f32 %v1150_v50, %v1138_v34  ;;  %v4513_v49 = vld [vmem:[#allocation35_spill] sm:$0xff] }
 0x277   :  { %1297 = vrot.lane.b32.xlu1 %v1290_v14, %s1857_s26 }
 0x278   :  { %1295 = vrot.lane.b32.xlu0 %v1289_v61, %s1857_s26  ;;  %v3598_v61 = vsel %vm2065_vm13, %v4511_v23, %v1540_v32  ;;  %v4515_v32 = vld [vmem:[#allocation74_spill] sm:$0xff] }
 0x279   :  { %v1166_v12 = vpop.permute.xlu1 %1165  ;;  %v1164_v5 = vpop.permute.xlu0 %1163  ;;  %4512 = vst [vmem:[#allocation79_spill] sm:$0xff] %v3598_v61  ;;  %v1161_v34 = vmul.f32 %v1160_v3, %v4515_v32 }
 0x27a   :  { %v1167_v14 = vsel %vm171_vm11, %v1164_v5, %v1166_v12  ;;  %v1168_v41 = vsel %vm171_vm11, %v1166_v12, %v1164_v5  ;;  %v3611_v12 = vsel %vm2061_vm12, %v4513_v49, %v1539_v10  ;;  %v4514_v5 = vld [vmem:[#allocation73_spill] sm:$0xff] }
 0x27b   :  { %v1169_v62 = vsel %vm2061_vm12, %v4485_v4, %v1167_v14  ;;  %v1170_v30 = vsel %vm2065_vm13, %v4482_v16, %v1168_v41  ;;  %1549 = vrot.lane.b32.xlu1 %v3598_v61, %s1856_s25  ;;  %v1162_v19 = vmul.f32 %v1160_v3, %v4514_v5  ;;  %v1211_v14 = vadd.f32 %v1149_v43, %v1137_v59 }
 0x27c   :  { %v1173_v50 = vmul.f32 %v1172_v36, %v1169_v62  ;;  %v1174_v8 = vmul.f32 %v1172_v36, %v1170_v30  ;;  %1547 = vrot.lane.b32.xlu0 %v3611_v12, %s1856_s25  ;;  %v1438_v41 = vmul.f32 %v1436_v38, %v4516_v9  ;;  %v1437_v16 = vmul.f32 %v1436_v38, %v4517_v1  ;;  %v4518_v36 = vld [vmem:[#allocation75_spill] sm:$0xff]  ;;  %v4519_v30 = vld [vmem:[#allocation76_spill] sm:$0xff] }
 0x27d   :  { %v1454_v61 = vpop.permute.xlu1 %1453  ;;  %v1460_v4 = vstv %s3573_s22  ;;  %v1452_v26 = vpop.permute.xlu0 %1451  ;;  %v1450_v62 = vmul.f32 %v1448_v31, %v4518_v36  ;;  %v1449_v32 = vmul.f32 %v1448_v31, %v4519_v30  ;;  %v4520_v36 = vld [vmem:[#allocation57_spill] sm:$0xff]  ;;  %s3892_s22 = sld [smem:[#allocation2 + $0x3f]] }
 0x27e   :  { %v1213_v40 = vadd.f32 %v1173_v50, %v1161_v34  ;;  %v1214_v10 = vadd.f32 %v1174_v8, %v1162_v19  ;;  %v1455_v5 = vsel %vm171_vm11, %v1452_v26, %v1454_v61  ;;  %v1456_v3 = vsel %vm171_vm11, %v1454_v61, %v1452_v26 }
 0x27f   :  { %v1457_v9 = vsel %vm2061_vm12, %v4497_v55, %v1455_v5  ;;  %v1458_v38 = vsel %vm2065_vm13, %v4494_v15, %v1456_v3  ;;  %v1500_v19 = vadd.f32 %v1438_v41, %v1426_v11  ;;  %v1499_v26 = vadd.f32 %v1437_v16, %v1425_v39  ;;  %v4521_v11 = vld [vmem:[#allocation58_spill] sm:$0xff] }
 0x280   :  { %v3632_v1 = vadd.f32 %v1213_v40, %v1211_v14  ;;  %v3634_v8 = vadd.f32 %v1214_v10, %v1212_v48  ;;  %v1461_v43 = vmul.f32 %v1460_v4, %v1457_v9  ;;  %v1462_v59 = vmul.f32 %v1460_v4, %v1458_v38 }
 0x281   :  { %v401_v5 = vstv %s1727_s23  ;;  %v389_v3 = vstv %s1726_s1  ;;  %v413_v40 = vstv %s1728_s24  ;;  %v425_v48 = vstv %s1729_s27  ;;  %s3912_s23 = sld [smem:[#allocation2 + $0xc]]  ;;  %s3932_s1 = sld [smem:[#allocation2 + $0xd]] }
 0x282   :  { %v1501_v61 = vadd.f32 %v1461_v43, %v1449_v32  ;;  %v1502_v34 = vadd.f32 %v1462_v59, %v1450_v62  ;;  %v403_v4 = vmul.f32 %v401_v5, %v4520_v36  ;;  %v402_v16 = vmul.f32 %v401_v5, %v4521_v11  ;;  %s3958_s24 = sld [smem:[#allocation2 + $0x7]]  ;;  %s3968_s27 = sld [smem:[#allocation2 + $0x60]] }
 0x283   :  { %v391_v62 = vmul.f32 %v389_v3, %v2484_v7  ;;  %v390_v30 = vmul.f32 %v389_v3, %v2479_v53  ;;  %v415_v38 = vmul.f32 %v413_v40, %v3206_v2  ;;  %v414_v43 = vmul.f32 %v413_v40, %v3211_v21 }
 0x284   :  { %v3636_v50 = vadd.f32 %v1501_v61, %v1499_v26  ;;  %v3638_v31 = vadd.f32 %v1502_v34, %v1500_v19  ;;  %v461_v36 = vstv %s1732_s28  ;;  %s3984_s28 = sld [smem:[#allocation2 + $0x61]] }
 0x285   :  { %v465_v26 = vadd.f32 %v403_v4, %v391_v62  ;;  %v464_v61 = vadd.f32 %v402_v16, %v390_v30 }
 0x2a6   :  { %v419_v14 = vpop.permute.xlu1 %418  ;;  %v417_v10 = vpop.permute.xlu0 %416 }
 0x2a7   :  { %v420_v39 = vsel %vm171_vm11, %v417_v10, %v419_v14  ;;  %v421_v41 = vsel %vm171_vm11, %v419_v14, %v417_v10 }
 0x2a8   :  { %v422_v32 = vsel %vm2061_vm12, %v2479_v53, %v420_v39  ;;  %v423_v9 = vsel %vm2065_vm13, %v2484_v7, %v421_v41 }
 0x2a9   :  { %v426_v59 = vmul.f32 %v425_v48, %v422_v32  ;;  %v427_v19 = vmul.f32 %v425_v48, %v423_v9 }
 0x2ab   :  { %v466_v34 = vadd.f32 %v426_v59, %v414_v43  ;;  %v467_v5 = vadd.f32 %v427_v19, %v415_v38  ;;  %v545_v19 = vstv %s3658_s29  ;;  %s4008_s29 = sld [smem:[#allocation2 + $0x5b]] }
 0x2ad   :  { %v470_v3 = vadd.f32 %v466_v34, %v464_v61  ;;  %v471_v14 = vadd.f32 %v467_v5, %v465_v26  ;;  %v974_v5 = vstv %s3664_s3  ;;  %s4031_s3 = sld [smem:[#allocation2 + $0x34]] }
 0x2b1   :  { %v455_v10 = vpop.permute.xlu1 %454  ;;  %v453_v11 = vpop.permute.xlu0 %452 }
 0x2b2   :  { %v456_v2 = vsel %vm208_vm15, %v453_v11, %v455_v10  ;;  %v457_v21 = vsel %vm208_vm15, %v455_v10, %v453_v11  ;;  %v962_v10 = vstv %s3672_s30  ;;  %s4034_s30 = sld [smem:[#allocation2 + $0x37]] }
 0x2b3   :  { %v458_v40 = vsel %vm2141_vm0, %v2479_v53, %v457_v21  ;;  %v459_v48 = vsel %vm2145_vm1, %v2484_v7, %v456_v2  ;;  %v1088_v2 = vstv %s3674_s5  ;;  %v1376_v21 = vstv %s3676_s6  ;;  %s1734_s5 = sld [smem:[#allocation2 + $0x2e]]  ;;  %s1733_s6 = sld [smem:[#allocation2 + $0x2d]] }
 0x2b4   :  { %v462_v4 = vmul.f32 %v461_v36, %v458_v40  ;;  %v463_v16 = vmul.f32 %v461_v36, %v459_v48  ;;  %v976_v40 = vmul.f32 %v974_v5, %v3361_v35  ;;  %v4527_v35 = vld [vmem:[#allocation24_spill] sm:$0xff] }
 0x2b5   :  { %v503_v39 = vpop.permute.xlu1 %502  ;;  %v501_v41 = vpop.permute.xlu0 %500 }
 0x2b6   :  { %v472_v62 = vadd.f32 %v3243_v18, %v462_v4  ;;  %v473_v30 = vadd.f32 %v3245_v44, %v463_v16  ;;  %v504_v53 = vsel %vm171_vm11, %v501_v41, %v503_v39  ;;  %v505_v7 = vsel %vm171_vm11, %v503_v39, %v501_v41  ;;  %v4524_v4 = vld [vmem:[#allocation12_spill] sm:$0xff]  ;;  %v4525_v39 = vld [vmem:[#allocation13_spill] sm:$0xff] }
 0x2b7   :  { %v3691_v32 = vsel %vm2065_vm13, %v2879_v33, %v505_v7  ;;  %v3696_v18 = vsel %vm2061_vm12, %v2874_v27, %v504_v53  ;;  %v533_v44 = vstv %s3656_s2  ;;  %v963_v16 = vmul.f32 %v962_v10, %v4524_v4  ;;  %v4526_v53 = vld [vmem:[#allocation23_spill] sm:$0xff]  ;;  %s3986_s2 = sld [smem:[#allocation2 + $0x36]] }
 0x2b8   :  { %v3703_v9 = vadd.f32 %v472_v62, %v470_v3  ;;  %v3705_v38 = vadd.f32 %v473_v30, %v471_v14  ;;  %514 = vrot.lane.b32.xlu1 %v3691_v32, %s1856_s25  ;;  %512 = vrot.lane.b32.xlu0 %v3696_v18, %s1856_s25  ;;  %v534_v34 = vmul.f32 %v533_v44, %v3272_v17  ;;  %v678_v62 = vstv %s3684_s7  ;;  %s1735_s7 = sld [smem:[#allocation2 + $0x2f]] }
 0x2b9   :  { %v539_v43 = vpop.permute.xlu1 %538  ;;  %v537_v59 = vpop.permute.xlu0 %536  ;;  %v535_v17 = vmul.f32 %v533_v44, %v3277_v58  ;;  %v964_v41 = vmul.f32 %v962_v10, %v4525_v39  ;;  %v975_v30 = vmul.f32 %v974_v5, %v3366_v20  ;;  %v3754_v7 = vmul.f32 %v1088_v2, %v4526_v53 }
 0x2ba   :  { %4522 = vst [vmem:[#allocation17_spill] sm:$0xff] %v3703_v9  ;;  %4523 = vst [vmem:[#allocation80_spill] sm:$0xff] %v3705_v38  ;;  %v540_v26 = vsel %vm208_vm15, %v537_v59, %v539_v43  ;;  %v541_v61 = vsel %vm208_vm15, %v539_v43, %v537_v59  ;;  %v1184_v44 = vstv %s3698_s9  ;;  %v1472_v43 = vstv %s3700_s10  ;;  %s4111_s9 = sld [smem:[#allocation2 + $0x4]]  ;;  %s4113_s10 = sld [smem:[#allocation2 + $0x2a]] }
 0x2bb   :  { %v542_v3 = vsel %vm2141_vm0, %v2874_v27, %v541_v61  ;;  %v543_v14 = vsel %vm2145_vm1, %v2879_v33, %v540_v26  ;;  %v4346_v59 = vstv %s3686_s8  ;;  %v4528_v26 = vld [vmem:[#allocation25_spill] sm:$0xff]  ;;  %v1100_v20 = vstv %s3711_s11  ;;  %s4115_s11 = sld [smem:[#allocation2 + $0x3]] }
 0x2bc   :  { %548 = vrot.lane.b32.xlu0 %v542_v3, %s1857_s26  ;;  %v546_v36 = vmul.f32 %v545_v19, %v542_v3  ;;  %550 = vrot.lane.b32.xlu1 %v543_v14, %s1857_s26  ;;  %v547_v11 = vmul.f32 %v545_v19, %v543_v14  ;;  %v3762_v19 = vmul.f32 %v1088_v2, %v4527_v35  ;;  %v822_v2 = vstv %s3721_s13  ;;  %s4133_s13 = sld [smem:[#allocation2 + $0x33]] }
 0x2bd   :  { %v3765_v61 = vmul.f32 %v1376_v21, %v4528_v26  ;;  %v3773_v10 = vadd.f32 %v976_v40, %v964_v41  ;;  %v3792_v39 = vmul.f32 %v678_v62, %v4479_v28  ;;  %v3796_v53 = vmul.f32 %v678_v62, %v4480_v6 }
 0x2be   :  { %v3745_v48 = vadd.f32 %v546_v36, %v534_v34  ;;  %v3747_v58 = vadd.f32 %v547_v11, %v535_v17  ;;  %v4529_v34 = vld [vmem:[#allocation26_spill] sm:$0xff]  ;;  %v1388_v17 = vstv %s3714_s12  ;;  %v3811_v26 = vmul.f32 %v4346_v59, %v4503_v51  ;;  %s4119_s12 = sld [smem:[#allocation2 + $0x32]] }
 0x2bf   :  { %v3768_v3 = vmul.f32 %v1376_v21, %v4529_v34  ;;  %v1003_v21 = vadd.f32 %v975_v30, %v963_v16  ;;  %v4532_v16 = vld [vmem:[#allocation41_spill] sm:$0xff]  ;;  %v823_v35 = vmul.f32 %v822_v2, %v3331_v29  ;;  %v824_v59 = vmul.f32 %v822_v2, %v3336_v37 }
 0x2c0   :  { %v3806_v30 = vmul.f32 %v1184_v44, %v4532_v16  ;;  %v1575_v34 = vsel %vm208_vm15, %v3569_v54, %v3571_v25  ;;  %v986_v9 = vstv %s3771_s19 }
 0x2c1   :  { %v790_v5 = vpop.permute.xlu1 %789  ;;  %v792_v14 = vpop.permute.xlu0 %791 }
 0x2c2   :  { %v793_v36 = vsel %vm171_vm11, %v790_v5, %v792_v14  ;;  %v794_v11 = vsel %vm171_vm11, %v792_v14, %v790_v5  ;;  %v834_v14 = vstv %s3741_s17  ;;  %s4167_s17 = sld [smem:[#allocation2 + $0x31]] }
 0x2c3   :  { %v3784_v4 = vsel %vm2065_vm13, %v2918_v60, %v794_v11  ;;  %v3789_v40 = vsel %vm2061_vm12, %v2896_v24, %v793_v36  ;;  %v4533_v36 = vld [vmem:[#allocation42_spill] sm:$0xff] }
 0x2c4   :  { %4530 = vst [vmem:[#allocation16_spill] sm:$0xff] %v3784_v4  ;;  %4531 = vst [vmem:[#allocation67_spill] sm:$0xff] %v3789_v40  ;;  %803 = vrot.lane.b32.xlu1 %v3784_v4, %s1856_s25  ;;  %801 = vrot.lane.b32.xlu0 %v3789_v40, %s1856_s25  ;;  %v3818_v11 = vmul.f32 %v1184_v44, %v4533_v36  ;;  %v1196_v36 = vstv %s3759_s18  ;;  %s3859_s25 = sld [smem:[#allocation2 + $0x54]] }
 0x2c5   :  { %v826_v62 = vpop.permute.xlu1 %825  ;;  %v828_v5 = vpop.permute.xlu0 %827 }
 0x2c6   :  { %v829_v41 = vsel %vm208_vm15, %v826_v62, %v828_v5  ;;  %v830_v16 = vsel %vm208_vm15, %v828_v5, %v826_v62  ;;  %v1576_v62 = vsel %vm208_vm15, %v3571_v25, %v3569_v54  ;;  %v4534_v5 = vld [vmem:[#allocation43_spill] sm:$0xff] }
 0x2c7   :  { %v831_v44 = vsel %vm2141_vm0, %v2896_v24, %v830_v16  ;;  %v832_v29 = vsel %vm2145_vm1, %v2918_v60, %v829_v41  ;;  %v3844_v40 = vmul.f32 %v1472_v43, %v4534_v5  ;;  %v4535_v16 = vld [vmem:[#allocation44_spill] sm:$0xff]  ;;  %v1102_v41 = vmul.f32 %v1100_v20, %v3371_v42 }
 0x2c8   :  { %837 = vrot.lane.b32.xlu0 %v831_v44, %s1857_s26  ;;  %v835_v37 = vmul.f32 %v834_v14, %v831_v44  ;;  %839 = vrot.lane.b32.xlu1 %v832_v29, %s1857_s26  ;;  %v836_v2 = vmul.f32 %v834_v14, %v832_v29  ;;  %v3847_v4 = vmul.f32 %v1472_v43, %v4535_v16  ;;  %v4540_v16 = vld [vmem:[#allocation19_spill] sm:$0xff] }
 0x2c9   :  { %v980_v38 = vpop.permute.xlu1 %979  ;;  %v978_v24 = vpop.permute.xlu0 %977 }
 0x2ca   :  { %v3851_v60 = vadd.f32 %v835_v37, %v823_v35  ;;  %v3853_v54 = vadd.f32 %v836_v2, %v824_v59  ;;  %v981_v25 = vsel %vm208_vm15, %v978_v24, %v980_v38  ;;  %v982_v14 = vsel %vm208_vm15, %v980_v38, %v978_v24 }
 0x2cb   :  { %v983_v42 = vsel %vm2141_vm0, %v1916_v52, %v982_v14  ;;  %v984_v43 = vsel %vm2145_vm1, %v1940_v0, %v981_v25  ;;  %v3870_v59 = vsel %vm2141_vm0, %v4513_v49, %v1576_v62  ;;  %v3875_v24 = vsel %vm2145_vm1, %v4511_v23, %v1575_v34 }
 0x2cc   :  { %4536 = vst [vmem:[#allocation34_spill] sm:$0xff] %v3851_v60  ;;  %4537 = vst [vmem:[#allocation68_spill] sm:$0xff] %v3853_v54  ;;  %v1101_v38 = vmul.f32 %v1100_v20, %v3376_v63  ;;  %v1484_v35 = vstv %s3799_s20  ;;  %v987_v44 = vmul.f32 %v986_v9, %v983_v42  ;;  %v988_v29 = vmul.f32 %v986_v9, %v984_v43  ;;  %v4543_v42 = vld [vmem:[#allocation53_spill] sm:$0xff]  ;;  %v4546_v60 = vld [vmem:[#allocation56_spill] sm:$0xff] }
 0x2cd   :  { %4538 = vst [vmem:[#allocation37_spill] sm:$0xff] %v3875_v24  ;;  %1583 = vrot.lane.b32.xlu0 %v3870_v59, %s1857_s26  ;;  %1585 = vrot.lane.b32.xlu1 %v3875_v24, %s1857_s26  ;;  %v1120_v52 = vadd.f32 %v1102_v41, %v3762_v19  ;;  %v1390_v0 = vmul.f32 %v1388_v17, %v3459_v22  ;;  %v1106_v37 = vpop.permute.xlu1 %1105  ;;  %v1112_v34 = vstv %s3815_s21  ;;  %v1104_v2 = vpop.permute.xlu0 %1103  ;;  %s3894_s26 = sld [smem:[#allocation2 + $0x38]]  ;;  %v4539_v19 = vld [vmem:[#allocation20_spill] sm:$0xff] }
 0x2ce   :  { %v1389_v62 = vmul.f32 %v1388_v17, %v3470_v57  ;;  %v1017_v5 = vadd.f32 %v1003_v21, %v987_v44  ;;  %v1018_v63 = vadd.f32 %v3773_v10, %v988_v29  ;;  %v1107_v9 = vsel %vm208_vm15, %v1104_v2, %v1106_v37  ;;  %v4541_v17 = vld [vmem:[#allocation8_spill] sm:$0xff]  ;;  %v4542_v10 = vld [vmem:[#allocation9_spill] sm:$0xff]  ;;  %v4544_v44 = vld [vmem:[#allocation54_spill] sm:$0xff] }
 0x2cf   :  { %v1108_v20 = vsel %vm208_vm15, %v1106_v37, %v1104_v2  ;;  %v1198_v22 = vmul.f32 %v1196_v36, %v4539_v19  ;;  %v1197_v57 = vmul.f32 %v1196_v36, %v4540_v16  ;;  %v1110_v41 = vsel %vm2145_vm1, %v4542_v10, %v1107_v9 }
 0x2d0   :  { %v1109_v21 = vsel %vm2141_vm0, %v4541_v17, %v1108_v20  ;;  %v1021_v25 = vrot.slane %v1017_v5, 1  ;;  %v1022_v14 = vrot.slane %v1018_v63, 1  ;;  %v1027_v43 = vadd.f32 %v1017_v5, %v4543_v42  ;;  %v4545_v20 = vld [vmem:[#allocation55_spill] sm:$0xff] }
 0x2d1   :  { %v1028_v29 = vadd.f32 %v1018_v63, %v4544_v44  ;;  %v1119_v37 = vadd.f32 %v1101_v38, %v3754_v7  ;;  %v1408_v2 = vadd.f32 %v1390_v0, %v3768_v3  ;;  %v1113_v19 = vmul.f32 %v1112_v34, %v1109_v21  ;;  %v1202_v16 = vpop.permute.xlu1 %1201  ;;  %v4547_v0 = vld [vmem:[#allocation14_spill] sm:$0xff] }
 0x2d2   :  { %v1114_v36 = vmul.f32 %v1112_v34, %v1110_v41  ;;  %v1407_v54 = vadd.f32 %v1389_v62, %v3765_v61  ;;  %v1029_v17 = vadd.f32 %v1021_v25, %v4545_v20  ;;  %v1030_v24 = vadd.f32 %v1022_v14, %v4546_v60  ;;  %v1200_v10 = vpop.permute.xlu0 %1199  ;;  %v4548_v62 = vld [vmem:[#allocation15_spill] sm:$0xff] }
 0x2d3   :  { %v1208_v9 = vstv %s3859_s25  ;;  %v1123_v5 = vadd.f32 %v1119_v37, %v1113_v19  ;;  %v1203_v7 = vsel %vm208_vm15, %v1200_v10, %v1202_v16  ;;  %v1204_v3 = vsel %vm208_vm15, %v1202_v16, %v1200_v10  ;;  %v4550_v41 = vld [vmem:[#allocation47_spill] sm:$0xff]  ;;  %v4551_v37 = vld [vmem:[#allocation50_spill] sm:$0xff] }
 0x2d4   :  { %v1124_v63 = vadd.f32 %v1120_v52, %v1114_v36  ;;  %v1216_v61 = vadd.f32 %v1198_v22, %v3818_v11  ;;  %v1215_v38 = vadd.f32 %v1197_v57, %v3806_v30  ;;  %v1205_v60 = vsel %vm2141_vm0, %v4547_v0, %v1204_v3  ;;  %v4549_v52 = vld [vmem:[#allocation18_spill] sm:$0xff]  ;;  %v4552_v11 = vld [vmem:[#allocation49_spill] sm:$0xff] }
 0x2d5   :  { %v1206_v34 = vsel %vm2145_vm1, %v4548_v62, %v1203_v7  ;;  %v1125_v21 = vadd.f32 %v1123_v5, %v4549_v52  ;;  %v1209_v14 = vmul.f32 %v1208_v9, %v1205_v60  ;;  %v1394_v44 = vpop.permute.xlu1 %1393  ;;  %v1486_v19 = vmul.f32 %v1484_v35, %v4551_v37  ;;  %v4553_v60 = vld [vmem:[#allocation10_spill] sm:$0xff] }
 0x2d6   :  { %v1126_v25 = vadd.f32 %v1124_v63, %v4550_v41  ;;  %v1210_v42 = vmul.f32 %v1208_v9, %v1206_v34  ;;  %v1485_v22 = vmul.f32 %v1484_v35, %v4552_v11  ;;  %v1400_v30 = vstv %s3892_s22  ;;  %v1392_v57 = vpop.permute.xlu0 %1391 }
 0x2d7   :  { %v1496_v36 = vstv %s3894_s26  ;;  %v1609_v16 = vrot.slane %v1125_v21, 1  ;;  %v3934_v10 = vadd.f32 %v1125_v21, %v1027_v43  ;;  %v1219_v5 = vadd.f32 %v1215_v38, %v1209_v14 }
 0x2d8   :  { %v1610_v20 = vrot.slane %v1126_v25, 1  ;;  %v3936_v7 = vadd.f32 %v1126_v25, %v1028_v29  ;;  %v1220_v9 = vadd.f32 %v1216_v61, %v1210_v42  ;;  %v1395_v63 = vsel %vm208_vm15, %v1392_v57, %v1394_v44  ;;  %v4554_v29 = vld [vmem:[#allocation11_spill] sm:$0xff] }
 0x2d9   :  { %v1396_v35 = vsel %vm208_vm15, %v1394_v44, %v1392_v57  ;;  %v3942_v3 = vadd.f32 %v1609_v16, %v1029_v17  ;;  %v1398_v38 = vsel %vm2145_vm1, %v4554_v29, %v1395_v63  ;;  %v1490_v62 = vpop.permute.xlu1 %1489  ;;  %v3953_v61 = vadd.f32 %v1219_v5, %v3632_v1 }
 0x2da   :  { %v3944_v0 = vadd.f32 %v1610_v20, %v1030_v24  ;;  %v1397_v43 = vsel %vm2141_vm0, %v4553_v60, %v1396_v35  ;;  %v3956_v34 = vadd.f32 %v1220_v9, %v3634_v8  ;;  %v1402_v17 = vmul.f32 %v1400_v30, %v1398_v38  ;;  %v1488_v21 = vpop.permute.xlu0 %1487  ;;  %v4555_v24 = vld [vmem:[#allocation63_spill] sm:$0xff]  ;;  %v4557_v9 = vld [vmem:[#allocation64_spill] sm:$0xff]  ;;  %v4560_v60 = vld [vmem:[#allocation21_spill] sm:$0xff] }
 0x2db   :  { %v1401_v52 = vmul.f32 %v1400_v30, %v1397_v43  ;;  %v4556_v41 = vstv %s3731_s14  ;;  %v702_v14 = vstv %s3912_s23  ;;  %v1491_v42 = vsel %vm208_vm15, %v1488_v21, %v1490_v62  ;;  %v4562_v38 = vld [vmem:[#allocation30_spill] sm:$0xff]  ;;  %s4137_s14 = sld [smem:[#allocation2 + $0x5]] }
 0x2dc   :  { %v691_v25 = vmul.f32 %v4556_v41, %v4555_v24  ;;  %v1492_v1 = vsel %vm208_vm15, %v1490_v62, %v1488_v21  ;;  %v1412_v44 = vadd.f32 %v1408_v2, %v1402_v17  ;;  %v1494_v11 = vsel %vm2145_vm1, %v4494_v15, %v1491_v42 }
 0x2dd   :  { %v1411_v8 = vadd.f32 %v1407_v54, %v1401_v52  ;;  %v1493_v37 = vsel %vm2141_vm0, %v4497_v55, %v1492_v1  ;;  %v1504_v30 = vadd.f32 %v1486_v19, %v3847_v4  ;;  %v1503_v57 = vadd.f32 %v1485_v22, %v3844_v40  ;;  %v708_v5 = vpop.permute.xlu1 %707  ;;  %v4559_v54 = vld [vmem:[#allocation48_spill] sm:$0xff]  ;;  %v4561_v22 = vld [vmem:[#allocation29_spill] sm:$0xff] }
 0x2de   :  { %v1497_v16 = vmul.f32 %v1496_v36, %v1493_v37  ;;  %v1498_v20 = vmul.f32 %v1496_v36, %v1494_v11  ;;  %v4558_v63 = vmov %v4556_v41  ;;  %v1414_v43 = vadd.f32 %v1412_v44, %v4560_v60  ;;  %v706_v55 = vpop.permute.xlu0 %705  ;;  %v4563_v44 = vld [vmem:[#allocation65_spill] sm:$0xff] }
 0x2df   :  { %v692_v35 = vmul.f32 %v4558_v63, %v4557_v9  ;;  %v1413_v2 = vadd.f32 %v1411_v8, %v4559_v54  ;;  %v714_v29 = vstv %s3932_s1  ;;  %v709_v40 = vsel %vm171_vm11, %v706_v55, %v708_v5 }
 0x2e0   :  { %v1507_v15 = vadd.f32 %v1503_v57, %v1497_v16  ;;  %v1508_v4 = vadd.f32 %v1504_v30, %v1498_v20  ;;  %v710_v19 = vsel %vm171_vm11, %v708_v5, %v706_v55  ;;  %v704_v36 = vmul.f32 %v702_v14, %v4561_v22  ;;  %v4565_v5 = vld [vmem:[#allocation33_spill] sm:$0xff] }
 0x2e1   :  { %v703_v62 = vmul.f32 %v702_v14, %v4562_v38  ;;  %v711_v52 = vsel %vm2061_vm12, %v4479_v28, %v709_v40  ;;  %v712_v17 = vsel %vm2065_vm13, %v4480_v6, %v710_v19  ;;  %v744_v1 = vpop.permute.xlu1 %743  ;;  %v753_v8 = vadd.f32 %v691_v25, %v3792_v39 }
 0x2e2   :  { %v1509_v21 = vadd.f32 %v1507_v15, %v3636_v50  ;;  %v1510_v24 = vadd.f32 %v1508_v4, %v3638_v31  ;;  %v715_v41 = vmul.f32 %v714_v29, %v711_v52  ;;  %v716_v42 = vmul.f32 %v714_v29, %v712_v17  ;;  %v742_v57 = vpop.permute.xlu0 %741  ;;  %v4567_v29 = vld [vmem:[#allocation66_spill] sm:$0xff]  ;;  %v4570_v17 = vld [vmem:[#allocation32_spill] sm:$0xff] }
 0x2e3   :  { %v754_v14 = vadd.f32 %v692_v35, %v3796_v53  ;;  %v4564_v37 = vstv %s3733_s15  ;;  %v750_v30 = vstv %s3958_s24  ;;  %v4566_v9 = vstv %s3686_s8  ;;  %s1736_s8 = sld [smem:[#allocation2 + $0x30]]  ;;  %s4141_s15 = sld [smem:[#allocation2 + $0x6]] }
 0x2e4   :  { %v1246_v11 = vmul.f32 %v4564_v37, %v4563_v44  ;;  %v4010_v16 = vadd.f32 %v1509_v21, %v1413_v2  ;;  %v4012_v50 = vadd.f32 %v1510_v24, %v1414_v43  ;;  %v755_v31 = vadd.f32 %v715_v41, %v703_v62  ;;  %v4569_v62 = vld [vmem:[#allocation31_spill] sm:$0xff]  ;;  %v4571_v41 = vld [vmem:[#allocation77_spill] sm:$0xff] }
 0x2e5   :  { %v756_v20 = vadd.f32 %v716_v42, %v704_v36  ;;  %v1233_v39 = vmul.f32 %v4566_v9, %v4565_v5  ;;  %v1256_v25 = vstv %s3968_s27  ;;  %v745_v53 = vsel %vm208_vm15, %v742_v57, %v744_v1  ;;  %v1262_v43 = vpop.permute.xlu1 %1261 }
 0x2e6   :  { %v746_v63 = vsel %vm208_vm15, %v744_v1, %v742_v57  ;;  %v759_v35 = vadd.f32 %v755_v31, %v753_v8  ;;  %v748_v60 = vsel %vm2145_vm1, %v4480_v6, %v745_v53  ;;  %v4568_v55 = vmov %v4564_v37  ;;  %v1260_v22 = vpop.permute.xlu0 %1259  ;;  %v4572_v1 = vld [vmem:[#allocation62_spill] sm:$0xff] }
 0x2e7   :  { %v760_v54 = vadd.f32 %v756_v20, %v754_v14  ;;  %v747_v2 = vsel %vm2141_vm0, %v4479_v28, %v746_v63  ;;  %v1245_v15 = vmul.f32 %v4568_v55, %v4567_v29  ;;  %v752_v40 = vmul.f32 %v750_v30, %v748_v60 }
 0x2e8   :  { %v751_v4 = vmul.f32 %v750_v30, %v747_v2  ;;  %v1268_v19 = vstv %s3984_s28  ;;  %v1308_v36 = vadd.f32 %v1246_v11, %v3811_v26  ;;  %v1544_v28 = vstv %s3986_s2  ;;  %v4573_v2 = vld [vmem:[#allocation46_spill] sm:$0xff] }
 0x2e9   :  { %v1263_v38 = vsel %vm171_vm11, %v1260_v22, %v1262_v43  ;;  %v1264_v6 = vsel %vm171_vm11, %v1262_v43, %v1260_v22  ;;  %v762_v21 = vadd.f32 %v4570_v17, %v752_v40  ;;  %v1258_v42 = vmul.f32 %v1256_v25, %v4571_v41  ;;  %v1298_v37 = vpop.permute.xlu1 %1297  ;;  %v4575_v22 = vld [vmem:[#allocation69_spill] sm:$0xff] }
 0x2ea   :  { %v761_v52 = vadd.f32 %v4569_v62, %v751_v4  ;;  %v1265_v24 = vsel %vm2061_vm12, %v4565_v5, %v1263_v38  ;;  %v1266_v26 = vsel %vm2065_vm13, %v4503_v51, %v1264_v6  ;;  %v1257_v8 = vmul.f32 %v1256_v25, %v4572_v1  ;;  %v1296_v20 = vpop.permute.xlu0 %1295  ;;  %v4577_v62 = vld [vmem:[#allocation70_spill] sm:$0xff]  ;;  %v4580_v41 = vld [vmem:[#allocation61_spill] sm:$0xff]  ;;  %v4581_v1 = vld [vmem:[#allocation79_spill] sm:$0xff] }
 0x2eb   :  { %v1269_v14 = vmul.f32 %v1268_v19, %v1265_v24  ;;  %v1270_v44 = vmul.f32 %v1268_v19, %v1266_v26  ;;  %v1307_v11 = vadd.f32 %v1245_v15, %v1233_v39  ;;  %v764_v57 = vadd.f32 %v762_v21, %v760_v54  ;;  %v4574_v39 = vld [vmem:[#allocation45_spill] sm:$0xff]  ;;  %v4579_v26 = vld [vmem:[#allocation78_spill] sm:$0xff] }
 0x2ec   :  { %v763_v30 = vadd.f32 %v761_v52, %v759_v35  ;;  %v1304_v31 = vstv %s4008_s29  ;;  %v1299_v63 = vsel %vm208_vm15, %v1296_v20, %v1298_v37  ;;  %v1300_v25 = vsel %vm208_vm15, %v1298_v37, %v1296_v20 }
 0x2ed   :  { %v1309_v9 = vadd.f32 %v1269_v14, %v1257_v8  ;;  %v1310_v53 = vadd.f32 %v1270_v44, %v1258_v42  ;;  %v4061_v35 = vadd.f32 %v764_v57, %v4574_v39  ;;  %v1301_v54 = vsel %vm2141_vm0, %v4565_v5, %v1300_v25  ;;  %v1550_v40 = vpop.permute.xlu1 %1549 }
 0x2ee   :  { %v4058_v60 = vadd.f32 %v763_v30, %v4573_v2  ;;  %v1302_v43 = vsel %vm2145_vm1, %v4503_v51, %v1299_v63  ;;  %v1305_v15 = vmul.f32 %v1304_v31, %v1301_v54  ;;  %v1520_v19 = vstv %s4031_s3  ;;  %v1548_v24 = vpop.permute.xlu0 %1547 }
 0x2ef   :  { %v1313_v29 = vadd.f32 %v1309_v9, %v1307_v11  ;;  %v1314_v55 = vadd.f32 %v1310_v53, %v1308_v36  ;;  %v1306_v4 = vmul.f32 %v1304_v31, %v1302_v43  ;;  %v4576_v38 = vstv %s3739_s16  ;;  %s4154_s16 = sld [smem:[#allocation2]] }
 0x2f0   :  { %v1534_v6 = vmul.f32 %v4576_v38, %v4575_v22  ;;  %v4578_v52 = vmov %v4576_v38  ;;  %v1556_v21 = vstv %s4034_s30  ;;  %v1315_v5 = vadd.f32 %v4579_v26, %v1305_v15 }
 0x2f1   :  { %v1533_v17 = vmul.f32 %v4578_v52, %v4577_v62  ;;  %v1316_v42 = vadd.f32 %v4580_v41, %v1306_v4  ;;  %v1551_v51 = vsel %vm171_vm11, %v1548_v24, %v1550_v40  ;;  %v1552_v36 = vsel %vm171_vm11, %v1550_v40, %v1548_v24  ;;  %v4582_v4 = vld [vmem:[#allocation28_spill] sm:$0xff] }
 0x2f2   :  { %v1546_v8 = vmul.f32 %v1544_v28, %v4581_v1  ;;  %v1545_v14 = vmul.f32 %v1544_v28, %v3611_v12  ;;  %v1553_v44 = vsel %vm2061_vm12, %v4513_v49, %v1551_v51  ;;  %v1554_v37 = vsel %vm2065_vm13, %v4511_v23, %v1552_v36 }
 0x2f3   :  { %v1317_v11 = vadd.f32 %v1315_v5, %v1313_v29  ;;  %v1318_v30 = vadd.f32 %v1316_v42, %v1314_v55  ;;  %v1557_v57 = vmul.f32 %v1556_v21, %v1553_v44  ;;  %v1558_v31 = vmul.f32 %v1556_v21, %v1554_v37 }
 0x2f4   :  { %v1522_v20 = vmul.f32 %v1520_v19, %v4511_v23  ;;  %v1521_v9 = vmul.f32 %v1520_v19, %v4513_v49  ;;  %v4583_v19 = vld [vmem:[#allocation81_spill] sm:$0xff]  ;;  %v509_v22 = vstv %s1735_s7  ;;  %v557_v44 = vstv %s4113_s10 }
 0x2f5   :  { %v1619_v53 = vadd.f32 %v1317_v11, %v3953_v61  ;;  %v1620_v12 = vadd.f32 %v1318_v30, %v3956_v34  ;;  %v1597_v28 = vadd.f32 %v1557_v57, %v1545_v14  ;;  %v1598_v63 = vadd.f32 %v1558_v31, %v1546_v8 }
 0x2f6   :  { %v1596_v25 = vadd.f32 %v1534_v6, %v1522_v20  ;;  %v1595_v2 = vadd.f32 %v1533_v17, %v1521_v9  ;;  %v511_v5 = vmul.f32 %v509_v22, %v3691_v32  ;;  %v510_v41 = vmul.f32 %v509_v22, %v3696_v18 }
 0x2f7   :  { %v1625_v39 = vrot.slane %v1619_v53, 1  ;;  %v1626_v54 = vrot.slane %v1620_v12, 1  ;;  %v4096_v43 = vadd.f32 %v1619_v53, %v3934_v10  ;;  %v4099_v29 = vadd.f32 %v1620_v12, %v3936_v7 }
 0x2f8   :  { %v4101_v55 = vadd.f32 %v1597_v28, %v1595_v2  ;;  %v4103_v15 = vadd.f32 %v1598_v63, %v1596_v25  ;;  %v497_v10 = vstv %s1734_s5  ;;  %v485_v7 = vstv %s1733_s6  ;;  %v4584_v63 = vld [vmem:[#allocation82_spill] sm:$0xff]  ;;  %v4585_v2 = vld [vmem:[#allocation83_spill] sm:$0xff] }
 0x2f9   :  { %v4106_v61 = vadd.f32 %v1625_v39, %v3942_v3  ;;  %v4109_v34 = vadd.f32 %v1626_v54, %v3944_v0  ;;  %v499_v40 = vmul.f32 %v497_v10, %v4582_v4  ;;  %v498_v3 = vmul.f32 %v497_v10, %v4583_v19 }
 0x2fa   :  { %v521_v0 = vstv %s1736_s8  ;;  %v487_v17 = vmul.f32 %v485_v7, %v2879_v33  ;;  %v486_v21 = vmul.f32 %v485_v7, %v2874_v27  ;;  %v786_v8 = vstv %s4111_s9  ;;  %v4586_v7 = vld [vmem:[#allocation60_spill] sm:$0xff] }
 0x2fb   :  { %v774_v57 = vstv %s4115_s11  ;;  %v788_v25 = vmul.f32 %v786_v8, %v4584_v63  ;;  %v787_v39 = vmul.f32 %v786_v8, %v4585_v2  ;;  %v1580_v54 = vstv %s4119_s12 }
 0x2fc   :  { %v561_v36 = vadd.f32 %v499_v40, %v487_v17  ;;  %v560_v1 = vadd.f32 %v498_v3, %v486_v21  ;;  %v776_v4 = vmul.f32 %v774_v57, %v4586_v7  ;;  %v4587_v40 = vld [vmem:[#allocation59_spill] sm:$0xff]  ;;  %v1568_v19 = vstv %s4133_s13 }
 0x2fd   :  { %v798_v3 = vstv %s4137_s14  ;;  %v810_v17 = vstv %s4141_s15 }
 0x32a   :  { %v515_v38 = vpop.permute.xlu1 %514  ;;  %v513_v6 = vpop.permute.xlu0 %512 }
 0x32b   :  { %v516_v62 = vsel %vm171_vm11, %v513_v6, %v515_v38  ;;  %v517_v52 = vsel %vm171_vm11, %v515_v38, %v513_v6 }
 0x32c   :  { %v518_v24 = vsel %vm2061_vm12, %v2874_v27, %v516_v62  ;;  %v519_v26 = vsel %vm2065_vm13, %v2879_v33, %v517_v52  ;;  %v1581_v62 = vmul.f32 %v1580_v54, %v3870_v59 }
 0x32d   :  { %v522_v42 = vmul.f32 %v521_v0, %v518_v24  ;;  %v523_v51 = vmul.f32 %v521_v0, %v519_v26  ;;  %v850_v0 = vadd.f32 %v788_v25, %v776_v4  ;;  %v4589_v24 = vld [vmem:[#allocation80_spill] sm:$0xff]  ;;  %v4597_v4 = vld [vmem:[#allocation71_spill] sm:$0xff] }
 0x32e   :  { %v551_v14 = vpop.permute.xlu1 %550  ;;  %v549_v37 = vpop.permute.xlu0 %548 }
 0x32f   :  { %v562_v11 = vadd.f32 %v522_v42, %v510_v41  ;;  %v563_v30 = vadd.f32 %v523_v51, %v511_v5  ;;  %v552_v32 = vsel %vm208_vm15, %v549_v37, %v551_v14  ;;  %v553_v18 = vsel %vm208_vm15, %v551_v14, %v549_v37  ;;  %v4590_v42 = vld [vmem:[#allocation37_spill] sm:$0xff] }
 0x330   :  { %v554_v31 = vsel %vm2141_vm0, %v2874_v27, %v553_v18  ;;  %v555_v20 = vsel %vm2145_vm1, %v2879_v33, %v552_v32  ;;  %v775_v33 = vmul.f32 %v774_v57, %v4587_v40  ;;  %v1582_v51 = vmul.f32 %v1580_v54, %v4590_v42  ;;  %v4593_v32 = vld [vmem:[#allocation16_spill] sm:$0xff]  ;;  %v4594_v57 = vld [vmem:[#allocation67_spill] sm:$0xff] }
 0x331   :  { %v566_v9 = vadd.f32 %v562_v11, %v560_v1  ;;  %v567_v53 = vadd.f32 %v563_v30, %v561_v36  ;;  %v558_v12 = vmul.f32 %v557_v44, %v554_v31  ;;  %v559_v28 = vmul.f32 %v557_v44, %v555_v20  ;;  %v4591_v44 = vld [vmem:[#allocation22_spill] sm:$0xff]  ;;  %v4592_v11 = vld [vmem:[#allocation51_spill] sm:$0xff] }
 0x332   :  { %v849_v6 = vadd.f32 %v787_v39, %v775_v33  ;;  %v846_v1 = vstv %s4154_s16  ;;  %v800_v18 = vmul.f32 %v798_v3, %v4593_v32  ;;  %v799_v31 = vmul.f32 %v798_v3, %v4594_v57 }
 0x333   :  { %v568_v10 = vadd.f32 %v3745_v48, %v558_v12  ;;  %v569_v27 = vadd.f32 %v3747_v58, %v559_v28  ;;  %v4588_v48 = vld [vmem:[#allocation17_spill] sm:$0xff]  ;;  %v4595_v12 = vld [vmem:[#allocation52_spill] sm:$0xff]  ;;  %v1569_v33 = vmul.f32 %v1568_v19, %v4597_v4 }
 0x335   :  { %v570_v22 = vadd.f32 %v568_v10, %v566_v9  ;;  %v571_v38 = vadd.f32 %v569_v27, %v567_v53 }
 0x336   :  { %v804_v52 = vpop.permute.xlu1 %803  ;;  %v802_v21 = vpop.permute.xlu0 %801 }
 0x337   :  { %v873_v58 = vadd.f32 %v570_v22, %v4588_v48  ;;  %v874_v26 = vadd.f32 %v571_v38, %v4589_v24  ;;  %v805_v5 = vsel %vm171_vm11, %v802_v21, %v804_v52  ;;  %v806_v41 = vsel %vm171_vm11, %v804_v52, %v802_v21  ;;  %v4598_v38 = vld [vmem:[#allocation72_spill] sm:$0xff] }
 0x338   :  { %v807_v59 = vsel %vm2061_vm12, %v4587_v40, %v805_v5  ;;  %v808_v36 = vsel %vm2065_vm13, %v4586_v7, %v806_v41  ;;  %v1570_v52 = vmul.f32 %v1568_v19, %v4598_v38  ;;  %v4600_v41 = vld [vmem:[#allocation68_spill] sm:$0xff] }
 0x339   :  { %v879_v8 = vrot.slane %v873_v58, 1  ;;  %v880_v14 = vrot.slane %v874_v26, 1  ;;  %v885_v37 = vadd.f32 %v873_v58, %v4591_v44  ;;  %v886_v30 = vadd.f32 %v874_v26, %v4592_v11  ;;  %v4599_v26 = vld [vmem:[#allocation34_spill] sm:$0xff] }
 0x33a   :  { %v811_v20 = vmul.f32 %v810_v17, %v807_v59  ;;  %v812_v9 = vmul.f32 %v810_v17, %v808_v36  ;;  %v840_v53 = vpop.permute.xlu1 %839  ;;  %v838_v46 = vpop.permute.xlu0 %837  ;;  %v1592_v58 = vstv %s4167_s17  ;;  %v1599_v59 = vadd.f32 %v1581_v62, %v1569_v33 }
 0x33b   :  { %v887_v28 = vadd.f32 %v879_v8, %v4595_v12  ;;  %v888_v63 = vadd.f32 %v880_v14, %v4596_v47  ;;  %v841_v25 = vsel %vm208_vm15, %v838_v46, %v840_v53  ;;  %v842_v2 = vsel %vm208_vm15, %v840_v53, %v838_v46 }
 0x33c   :  { %v851_v39 = vadd.f32 %v811_v20, %v799_v31  ;;  %v852_v54 = vadd.f32 %v812_v9, %v800_v18  ;;  %v843_v10 = vsel %vm2141_vm0, %v4587_v40, %v842_v2  ;;  %v844_v27 = vsel %vm2145_vm1, %v4586_v7, %v841_v25 }
 0x33d   :  { %v847_v3 = vmul.f32 %v846_v1, %v843_v10  ;;  %v848_v22 = vmul.f32 %v846_v1, %v844_v27  ;;  %v1600_v36 = vadd.f32 %v1582_v51, %v1570_v52  ;;  %v4601_v27 = vld [vmem:[#allocation7_spill] sm:$0xff]  ;;  %v1837_v52 = vld [vmem:[%s4242_s0] sm:$0xff] }
 0x33e   :  { %v855_v17 = vadd.f32 %v851_v39, %v849_v6  ;;  %v856_v21 = vadd.f32 %v852_v54, %v850_v0 }
 0x33f   :  { %v1586_v48 = vpop.permute.xlu1 %1585  ;;  %v1584_v24 = vpop.permute.xlu0 %1583  ;;  %v857_v5 = vadd.f32 %v4599_v26, %v847_v3  ;;  %v858_v42 = vadd.f32 %v4600_v41, %v848_v22 }
 0x340   :  { %v1587_v40 = vsel %vm208_vm15, %v1584_v24, %v1586_v48  ;;  %v1588_v7 = vsel %vm208_vm15, %v1586_v48, %v1584_v24  ;;  %v4602_v48 = vld [vmem:[#allocation5_spill] sm:$0xff]  ;;  %v1838_v24 = vld [vmem:[%s4242_s0 + $0x8] sm:$0xff] }
 0x341   :  { %v1589_v19 = vsel %vm2141_vm0, %v4513_v49, %v1588_v7  ;;  %v1590_v0 = vsel %vm2145_vm1, %v4511_v23, %v1587_v40  ;;  %v859_v6 = vadd.f32 %v857_v5, %v855_v17  ;;  %v860_v1 = vadd.f32 %v858_v42, %v856_v21  ;;  %v4603_v5 = vld [vmem:[#allocation6_spill] sm:$0xff] }
 0x342   :  { %v1593_v8 = vmul.f32 %v1592_v58, %v1589_v19  ;;  %v1594_v14 = vmul.f32 %v1592_v58, %v1590_v0 }
 0x343   :  { %v889_v44 = vadd.f32 %v4058_v60, %v859_v6  ;;  %v890_v11 = vadd.f32 %v4061_v35, %v860_v1 }
 0x344   :  { %v1603_v13 = vadd.f32 %v1599_v59, %v1593_v8  ;;  %v1604_v32 = vadd.f32 %v1600_v36, %v1594_v14 }
 0x345   :  { %v893_v62 = vrot.slane %v889_v44, 1  ;;  %v894_v51 = vrot.slane %v890_v11, 1  ;;  %v899_v18 = vadd.f32 %v889_v44, %v885_v37  ;;  %v900_v57 = vadd.f32 %v890_v11, %v886_v30 }
 0x346   :  { %v1605_v56 = vadd.f32 %v1603_v13, %v4101_v55  ;;  %v1606_v49 = vadd.f32 %v1604_v32, %v4103_v15 }
 0x347   :  { %v901_v45 = vadd.f32 %v893_v62, %v887_v28  ;;  %v902_v23 = vadd.f32 %v894_v51, %v888_v63 }
 0x348   :  { %v1635_v31 = vadd.f32 %v4010_v16, %v1605_v56  ;;  %v1636_v20 = vadd.f32 %v4012_v50, %v1606_v49 }
 0x34a   :  { %v1639_v9 = vrot.slane %v1635_v31, 1  ;;  %v1640_v60 = vrot.slane %v1636_v20, 1  ;;  %v1645_v35 = vadd.f32 %v1635_v31, %v4096_v43  ;;  %v1646_v53 = vadd.f32 %v1636_v20, %v4099_v29 }
 0x34c   :  { %v1647_v46 = vadd.f32 %v1639_v9, %v4106_v61  ;;  %v1648_v37 = vadd.f32 %v1640_v60, %v4109_v34  ;;  %v1649_v30 = vadd.f32 %v1645_v35, %v899_v18  ;;  %v1650_v55 = vadd.f32 %v1646_v53, %v900_v57 }
 0x34e   :  { %v1651_v12 = vadd.f32 %v1647_v46, %v901_v45  ;;  %v1652_v15 = vadd.f32 %v1648_v37, %v902_v23  ;;  %v1809_v28 = vmul.f32 -1.442695, %v1649_v30  ;;  %v1810_v47 = vmul.f32 -1.442695, %v1650_v55 }
 0x350   :  { %1821 = vpow2.f32 %v1809_v28  ;;  %v1811_v16 = vmul.f32 -1.442695, %v1651_v12  ;;  %v1812_v63 = vmul.f32 -1.442695, %v1652_v15 }
 0x351   :  { %1823 = vpow2.f32 %v1810_v47 }
 0x352   :  { %1825 = vpow2.f32 %v1811_v16 }
 0x353   :  { %1827 = vpow2.f32 %v1812_v63 }
 0x35a   :  { %v1822_v50 = vpop.eup %1821 }
 0x35b   :  { %v1824_v43 = vpop.eup %1823  ;;  %v1665_v25 = vadd.f32 1.0, %v1822_v50 }
 0x35c   :  { %v1826_v29 = vpop.eup %1825  ;;  %v1666_v2 = vadd.f32 1.0, %v1824_v43 }
 0x35d   :  { %v1828_v61 = vpop.eup %1827  ;;  %v1667_v39 = vadd.f32 1.0, %v1826_v29  ;;  %1829 = vrcp.f32 %v1665_v25 }
 0x35e   :  { %v1668_v34 = vadd.f32 1.0, %v1828_v61  ;;  %1831 = vrcp.f32 %v1666_v2 }
 0x35f   :  { %1833 = vrcp.f32 %v1667_v39 }
 0x360   :  { %1835 = vrcp.f32 %v1668_v34 }
 0x367   :  { %v1830_v54 = vpop.eup %1829 }
 0x368   :  { %v1832_v10 = vpop.eup %1831  ;;  %v1680_v4 = vrot.slane %v1830_v54, %v4601_v27 }
 0x369   :  { %v1834_v33 = vpop.eup %1833  ;;  %v1684_v3 = vrot.slane %v1832_v10, %v4601_v27 }
 0x36a   :  { %v1836_v22 = vpop.eup %1835  ;;  %v1688_v38 = vrot.slane %v1834_v33, %v4601_v27  ;;  %v1693_v17 = vmul.f32 %v1837_v52, %v1680_v4 }
 0x36b   :  { %v1692_v21 = vrot.slane %v1836_v22, %v4601_v27  ;;  %v1694_v58 = vmul.f32 %v1684_v3, %v4602_v48 }
 0x36c   :  { %v1695_v26 = vmul.f32 %v1838_v24, %v1688_v38 }
 0x36d   :  { %v1696_v41 = vmul.f32 %v1692_v21, %v4603_v5  ;;  %v1701_v42 = vcombine.low %v1693_v17, %v1694_v58 }
 0x36f   :  { %v1702_v40 = vcombine.low %v1695_v26, %v1696_v41  ;;  %1705 = vst [vmem:[%s4246_s4] sm:$0xff] %v1701_v42 }
 0x371   :  { %1706 = vst [vmem:[%s4246_s4 + $0x8] sm:$0xff] %v1702_v40 }
 0x372   :  { %1711 = vsyncpa [#allocation3], 1 }

</bundles_post_ra>
